<compile_context>
chip_gen: v5e
topology: v5e:2x2
jax: 0.10.0
libtpu: 0.0.40
codegen_flags: <defaults>
</compile_context>

<pallas_src>
import functools

import jax
import jax.numpy as jnp
from jax.experimental import pallas as pl
from jax.experimental.pallas import tpu as pltpu

LN_EPS = 1e-5


# ---------------------------------------------------------------------------
# Fused kernel: (linear -> layernorm -> relu) x num_hidden_layers, then linear.
# ---------------------------------------------------------------------------
def _fused_mlp_kernel(x_ref, *refs, num_hidden_layers):
    """refs = (w0, b0, g0, beta0, ..., w_{H-1}, b_{H-1}, g_{H-1}, beta_{H-1},
               w_final, b_final, o_ref)."""
    o_ref = refs[-1]
    p = refs[:-1]

    def to_dtype(a, dt):
        return a if a.dtype == dt else a.astype(dt)

    # Intermediate activations live entirely in vregs/VMEM (never written to HBM).
    h = x_ref[...]
    for layer in range(num_hidden_layers):
        w_ref, b_ref, g_ref, beta_ref = p[4 * layer: 4 * layer + 4]

        # Matmul in the weight's storage dtype (f32 or bf16), f32 accumulation (MXU).
        y = jnp.dot(to_dtype(h, w_ref.dtype), w_ref[...],
                    preferred_element_type=jnp.float32)
        y = y + b_ref[...].astype(jnp.float32)           # (tile_n, H) + (1, H)

        # LayerNorm over the feature (lane) axis: combined E[y], E[y^2] pass,
        # guarded against negative variance from cancellation.
        mean = jnp.mean(y, axis=-1, keepdims=True)
        mean_sq = jnp.mean(y * y, axis=-1, keepdims=True)
        var = jnp.maximum(mean_sq - mean * mean, 0.0)
        inv = jax.lax.rsqrt(var + LN_EPS)
        y = (y - mean) * inv * g_ref[...].astype(jnp.float32) \
            + beta_ref[...].astype(jnp.float32)

        # ReLU
        h = jnp.maximum(y, 0.0)

    # Final projection (no norm / activation). Output is lane-dense (width padded
    # to a multiple of 128 by the wrapper) -> unmasked stores.
    w_ref, b_ref = p[-2], p[-1]
    y = jnp.dot(to_dtype(h, w_ref.dtype), w_ref[...],
                preferred_element_type=jnp.float32)
    o_ref[...] = (y + b_ref[...].astype(jnp.float32)).astype(o_ref.dtype)


# ---------------------------------------------------------------------------
# Helpers
# ---------------------------------------------------------------------------
def _round_up(x, m):
    return -(-x // m) * m


def _choose_tile_n(n, *, desired=2048, align=256, min_steps=4):
    """Largest aligned row tile <= `desired` that still leaves >= min_steps grid
    steps (when n allows). Big tiles amortize the ~0.35 us per-grid-step overhead;
    >= 2 steps keeps both v7x TensorCores busy on the "parallel" row axis."""
    n_al = _round_up(max(n, 1), align)
    max_steps = n_al // align
    target_steps = max(1, min(min_steps, max_steps))
    cap = max(align, (n_al // target_steps) // align * align)
    return max(align, min(desired, cap))


def _vmem_capacity_bytes():
    try:
        cap = getattr(pltpu.get_tpu_info(), "vmem_capacity_bytes", None)
        if cap:
            return int(cap)
    except Exception:
        pass
    return 64 * 1024 * 1024   # conservative fallback (v7x per-TC)


# ---------------------------------------------------------------------------
# Wrapper
# ---------------------------------------------------------------------------
def mlp_forward(x, edge_index, params, *, tile_n=None, interpret=False):
    """Forward pass of the MLP. `edge_index` is unused (matches the torch forward)."""
    del edge_index

    n, in_dim = x.shape
    hidden = params["hidden"]
    w_final, b_final = params["final"]
    out_dim = w_final.shape[1]

    if tile_n is None:
        tile_n = _choose_tile_n(n)
    assert tile_n % 8 == 0, "tile_n must be a multiple of 8 (sublane)"

    # Lane-dense output: zero-pad the final projection so out_dim is a multiple of 128
    # -> unmasked vector stores. Padded columns are zero and sliced off below.
    out_dim_p = _round_up(out_dim, 128)
    col_pad = out_dim_p - out_dim
    if col_pad:
        w_final = jnp.pad(w_final, ((0, 0), (0, col_pad)))
        b_final = jnp.pad(b_final, ((0, col_pad),))

    # Flatten parameters; 1-D vectors become (1, H) rows so they broadcast over the tile.
    flat_params = []
    for (w, b, g, beta) in hidden:
        flat_params += [w, b.reshape(1, -1), g.reshape(1, -1), beta.reshape(1, -1)]
    flat_params += [w_final, b_final.reshape(1, -1)]

    # Pad the node axis to a multiple of tile_n; padded rows pass through LN/ReLU
    # harmlessly and are sliced off below.
    n_pad = -n % tile_n
    if n_pad:
        x = jnp.pad(x, ((0, n_pad), (0, 0)))
    n_total = n + n_pad
    grid = (n_total // tile_n,)

    # Params are constant across the grid: memory_space-only VMEM specs keep a single
    # fully resident copy outside the pipeline (no per-step DMA, no double-buffering --
    # equivalent to the Buffered(1) request in the review).
    param_specs = [pl.BlockSpec(memory_space=pltpu.MemorySpace.VMEM)
                   for _ in flat_params]

    # Generation-aware VMEM budget: resident params + double-buffered x/out tiles +
    # f32 intermediates, clamped to ~85% of the chip's physical VMEM.
    widest = max([w.shape[1] for (w, _, _, _) in hidden] + [in_dim, out_dim_p])
    param_bytes = sum(int(p.size) * p.dtype.itemsize for p in flat_params)
    io_bytes = 2 * tile_n * (in_dim + out_dim_p) * x.dtype.itemsize
    act_bytes = 8 * tile_n * widest * 4
    vmem_limit = int(min(max(2 * (param_bytes + io_bytes + act_bytes),
                             32 * 1024 * 1024),
                         int(0.85 * _vmem_capacity_bytes())))

    kernel = functools.partial(_fused_mlp_kernel, num_hidden_layers=len(hidden))
    out = pl.pallas_call(
        kernel,
        out_shape=jax.ShapeDtypeStruct((n_total, out_dim_p), x.dtype),
        grid_spec=pltpu.PrefetchScalarGridSpec(
            num_scalar_prefetch=0,
            grid=grid,
            in_specs=[pl.BlockSpec((tile_n, in_dim), lambda i: (i, 0))] + param_specs,
            out_specs=pl.BlockSpec((tile_n, out_dim_p), lambda i: (i, 0)),
        ),
        compiler_params=pltpu.CompilerParams(
            dimension_semantics=("parallel",),   # row tiles shard across v7x's 2 TCs
            vmem_limit_bytes=vmem_limit,
        ),
        interpret=interpret,
    )(x, *flat_params)

    return out[:n, :out_dim]


# ---------------------------------------------------------------------------
# Deterministic parameter init (shapes follow nn.Linear / LayerNorm in __init__).
# weight_dtype=jnp.bfloat16 is the recommended production setting on v6e/v7x;
# keep f32 on v5e (weights are VMEM-resident, and v5e's VPU has no native bf16).
# ---------------------------------------------------------------------------
def init_mlp_params(key, in_dim, num_hidden, out_dim, num_layers,
                    weight_dtype=jnp.float32):
    if num_layers < 1:
        raise ValueError("number of layers should be positive!")

    def linear(key, d_in, d_out):
        kw, kb = jax.random.split(key)
        bound = 1.0 / (d_in ** 0.5)
        w = jax.random.uniform(kw, (d_in, d_out), jnp.float32, -bound, bound)
        b = jax.random.uniform(kb, (d_out,), jnp.float32, -bound, bound)
        return w.astype(weight_dtype), b

    if num_layers == 1:
        key, k = jax.random.split(key)
        return {"hidden": [], "final": linear(k, in_dim, out_dim)}

    dims = [in_dim] + [num_hidden] * (num_layers - 1)
    hidden = []
    for i in range(num_layers - 1):
        key, k = jax.random.split(key)
        w, b = linear(k, dims[i], dims[i + 1])
        gamma = jnp.ones((dims[i + 1],), jnp.float32)   # LayerNorm weight
        beta = jnp.zeros((dims[i + 1],), jnp.float32)   # LayerNorm bias
        hidden.append((w, b, gamma, beta))
    key, k = jax.random.split(key)
    return {"hidden": hidden, "final": linear(k, num_hidden, out_dim)}


# ---------------------------------------------------------------------------
# Reference (pure JAX) for correctness checks. Mirrors the kernel's dtype
# behavior (activations cast to the weight dtype before each matmul) so the
# bf16 path can be checked with a meaningful tolerance too.
# ---------------------------------------------------------------------------
def mlp_reference(x, params):
    def to_dtype(a, dt):
        return a if a.dtype == dt else a.astype(dt)

    h = jnp.asarray(x)
    for (w, b, g, beta) in params["hidden"]:
        y = jnp.dot(to_dtype(h, w.dtype), w, preferred_element_type=jnp.float32) + b
        mean = jnp.mean(y, axis=-1, keepdims=True)
        var = jnp.mean((y - mean) ** 2, axis=-1, keepdims=True)
        y = (y - mean) * jax.lax.rsqrt(var + LN_EPS) * g + beta
        h = jnp.maximum(y, 0.0)
    w, b = params["final"]
    return jnp.dot(to_dtype(h, w.dtype), w, preferred_element_type=jnp.float32) + b


if __name__ == "__main__":
    key = jax.random.PRNGKey(0)

    # Small config consistent with the module's forward: node features [N, in_dim].
    # N is deliberately NOT a multiple of the tile to exercise the padding path,
    # and out_dim=16 exercises the lane-dense (pad-to-128) output path.
    N, IN_DIM, NUM_HIDDEN, OUT_DIM, NUM_LAYERS = 500, 32, 64, 16, 3

    kx, kp = jax.random.split(key)
    x = jax.random.normal(kx, (N, IN_DIM), jnp.float32)
    edge_index = jnp.zeros((2, 8), jnp.int32)   # accepted but unused by forward

    # --- f32 weights (v5e path): exact check against the pure-JAX reference ---
    params = init_mlp_params(kp, IN_DIM, NUM_HIDDEN, OUT_DIM, NUM_LAYERS)
    out = jax.block_until_ready(mlp_forward(x, edge_index, params))
    ref = mlp_reference(x, params)
    assert out.shape == (N, OUT_DIM)
    assert jnp.allclose(out, ref, atol=1e-4, rtol=1e-4), "f32 mismatch vs reference"

    # --- num_layers == 1 (pure linear) path ------------------------------------
    params1 = init_mlp_params(kp, IN_DIM, NUM_HIDDEN, OUT_DIM, 1)
    out1 = jax.block_until_ready(mlp_forward(x, edge_index, params1))
    ref1 = mlp_reference(x, params1)
    assert out1.shape == (N, OUT_DIM)
    assert jnp.allclose(out1, ref1, atol=1e-4, rtol=1e-4), "linear mismatch vs reference"

    # --- bf16 weights + bf16 activations (v6e/v7x production path) -------------
    # x is converted upstream (halves input HBM traffic); relative-error check
    # against the dtype-matched reference.
    params_bf16 = init_mlp_params(kp, IN_DIM, NUM_HIDDEN, OUT_DIM, NUM_LAYERS,
                                  weight_dtype=jnp.bfloat16)
    x_bf16 = x.astype(jnp.bfloat16)
    out_bf16 = jax.block_until_ready(mlp_forward(x_bf16, edge_index, params_bf16))
    ref_bf16 = mlp_reference(x_bf16, params_bf16)
    assert out_bf16.shape == (N, OUT_DIM)
    assert bool(jnp.all(jnp.isfinite(out_bf16.astype(jnp.float32))))
    assert jnp.allclose(out_bf16.astype(jnp.float32), ref_bf16,
                        atol=2e-2, rtol=2e-2), "bf16 mismatch vs reference"

    print("KERNEL_OK")
</pallas_src>

<mosaic_0001>
module attributes {stable_mosaic.version = 11 : i64} {
  func.func @_fused_mlp_kernel(%arg0: i32, %arg1: memref<256x32xf32, #tpu.memory_space<vmem>>, %arg2: memref<32x64xf32, #tpu.memory_space<vmem>>, %arg3: memref<1x64xf32, #tpu.memory_space<vmem>>, %arg4: memref<1x64xf32, #tpu.memory_space<vmem>>, %arg5: memref<1x64xf32, #tpu.memory_space<vmem>>, %arg6: memref<64x64xf32, #tpu.memory_space<vmem>>, %arg7: memref<1x64xf32, #tpu.memory_space<vmem>>, %arg8: memref<1x64xf32, #tpu.memory_space<vmem>>, %arg9: memref<1x64xf32, #tpu.memory_space<vmem>>, %arg10: memref<64x128xf32, #tpu.memory_space<vmem>>, %arg11: memref<1x128xf32, #tpu.memory_space<vmem>>, %arg12: memref<256x128xf32, #tpu.memory_space<vmem>>) attributes {dimension_semantics = [#tpu.dimension_semantics<parallel>], iteration_bounds = array<i64: 2>, scalar_prefetch = 0 : i64, scratch_operands = 0 : i64, tpu.core_type = #tpu.core_type<tc>, window_params = [{transform_indices = @transform_0, window_bounds = array<i64: 256, 32>}, {pipeline_mode = #tpu.pipeline_mode<synchronous>, transform_indices = @transform_1, window_bounds = array<i64: 32, 64>}, {pipeline_mode = #tpu.pipeline_mode<synchronous>, transform_indices = @transform_2, window_bounds = array<i64: 1, 64>}, {pipeline_mode = #tpu.pipeline_mode<synchronous>, transform_indices = @transform_3, window_bounds = array<i64: 1, 64>}, {pipeline_mode = #tpu.pipeline_mode<synchronous>, transform_indices = @transform_4, window_bounds = array<i64: 1, 64>}, {pipeline_mode = #tpu.pipeline_mode<synchronous>, transform_indices = @transform_5, window_bounds = array<i64: 64, 64>}, {pipeline_mode = #tpu.pipeline_mode<synchronous>, transform_indices = @transform_6, window_bounds = array<i64: 1, 64>}, {pipeline_mode = #tpu.pipeline_mode<synchronous>, transform_indices = @transform_7, window_bounds = array<i64: 1, 64>}, {pipeline_mode = #tpu.pipeline_mode<synchronous>, transform_indices = @transform_8, window_bounds = array<i64: 1, 64>}, {pipeline_mode = #tpu.pipeline_mode<synchronous>, transform_indices = @transform_9, window_bounds = array<i64: 64, 128>}, {pipeline_mode = #tpu.pipeline_mode<synchronous>, transform_indices = @transform_10, window_bounds = array<i64: 1, 128>}, {transform_indices = @transform_11, window_bounds = array<i64: 256, 128>}]} {
    %c0 = arith.constant 0 : index
    %c0_0 = arith.constant 0 : index
    %0 = vector.load %arg1[%c0, %c0_0] : memref<256x32xf32, #tpu.memory_space<vmem>>, vector<256x32xf32>
    %c0_1 = arith.constant 0 : index
    %c0_2 = arith.constant 0 : index
    %1 = vector.load %arg2[%c0_1, %c0_2] : memref<32x64xf32, #tpu.memory_space<vmem>>, vector<32x64xf32>
    %cst = arith.constant dense<0.000000e+00> : vector<256x64xf32>
    %2 = tpu.matmul %0, %1, %cst {dimension_numbers = #tpu.dot_dimension_numbers<[1], [0], [0], [1], [0, 0, 1, 1], [], []>} : vector<256x32xf32>, vector<32x64xf32>, vector<256x64xf32> -> vector<256x64xf32>
    %c0_3 = arith.constant 0 : index
    %c0_4 = arith.constant 0 : index
    %3 = vector.load %arg3[%c0_3, %c0_4] : memref<1x64xf32, #tpu.memory_space<vmem>>, vector<1x64xf32>
    %4 = vector.broadcast %3 : vector<1x64xf32> to vector<256x64xf32>
    %5 = arith.addf %2, %4 : vector<256x64xf32>
    %cst_5 = arith.constant dense<0.000000e+00> : vector<256xf32>
    %6 = vector.multi_reduction <add>, %5, %cst_5 [1] : vector<256x64xf32> to vector<256xf32>
    %7 = vector.shape_cast %6 : vector<256xf32> to vector<256x1xf32>
    %cst_6 = arith.constant 6.400000e+01 : f32
    %8 = vector.broadcast %cst_6 : f32 to vector<256x1xf32>
    %9 = arith.divf %7, %8 : vector<256x1xf32>
    %10 = arith.mulf %5, %5 : vector<256x64xf32>
    %cst_7 = arith.constant dense<0.000000e+00> : vector<256xf32>
    %11 = vector.multi_reduction <add>, %10, %cst_7 [1] : vector<256x64xf32> to vector<256xf32>
    %12 = vector.shape_cast %11 : vector<256xf32> to vector<256x1xf32>
    %cst_8 = arith.constant 6.400000e+01 : f32
    %13 = vector.broadcast %cst_8 : f32 to vector<256x1xf32>
    %14 = arith.divf %12, %13 : vector<256x1xf32>
    %15 = arith.mulf %9, %9 : vector<256x1xf32>
    %16 = arith.subf %14, %15 : vector<256x1xf32>
    %cst_9 = arith.constant 0.000000e+00 : f32
    %17 = vector.broadcast %cst_9 : f32 to vector<256x1xf32>
    %18 = arith.maximumf %16, %17 : vector<256x1xf32>
    %cst_10 = arith.constant 9.99999974E-6 : f32
    %19 = vector.broadcast %cst_10 : f32 to vector<256x1xf32>
    %20 = arith.addf %18, %19 : vector<256x1xf32>
    %21 = math.rsqrt %20 : vector<256x1xf32>
    %22 = vector.broadcast %9 : vector<256x1xf32> to vector<256x64xf32>
    %23 = arith.subf %5, %22 : vector<256x64xf32>
    %24 = vector.broadcast %21 : vector<256x1xf32> to vector<256x64xf32>
    %25 = arith.mulf %23, %24 : vector<256x64xf32>
    %c0_11 = arith.constant 0 : index
    %c0_12 = arith.constant 0 : index
    %26 = vector.load %arg4[%c0_11, %c0_12] : memref<1x64xf32, #tpu.memory_space<vmem>>, vector<1x64xf32>
    %27 = vector.broadcast %26 : vector<1x64xf32> to vector<256x64xf32>
    %28 = arith.mulf %25, %27 : vector<256x64xf32>
    %c0_13 = arith.constant 0 : index
    %c0_14 = arith.constant 0 : index
    %29 = vector.load %arg5[%c0_13, %c0_14] : memref<1x64xf32, #tpu.memory_space<vmem>>, vector<1x64xf32>
    %30 = vector.broadcast %29 : vector<1x64xf32> to vector<256x64xf32>
    %31 = arith.addf %28, %30 : vector<256x64xf32>
    %cst_15 = arith.constant 0.000000e+00 : f32
    %32 = vector.broadcast %cst_15 : f32 to vector<256x64xf32>
    %33 = arith.maximumf %31, %32 : vector<256x64xf32>
    %c0_16 = arith.constant 0 : index
    %c0_17 = arith.constant 0 : index
    %34 = vector.load %arg6[%c0_16, %c0_17] : memref<64x64xf32, #tpu.memory_space<vmem>>, vector<64x64xf32>
    %cst_18 = arith.constant dense<0.000000e+00> : vector<256x64xf32>
    %35 = tpu.matmul %33, %34, %cst_18 {dimension_numbers = #tpu.dot_dimension_numbers<[1], [0], [0], [1], [0, 0, 1, 1], [], []>} : vector<256x64xf32>, vector<64x64xf32>, vector<256x64xf32> -> vector<256x64xf32>
    %c0_19 = arith.constant 0 : index
    %c0_20 = arith.constant 0 : index
    %36 = vector.load %arg7[%c0_19, %c0_20] : memref<1x64xf32, #tpu.memory_space<vmem>>, vector<1x64xf32>
    %37 = vector.broadcast %36 : vector<1x64xf32> to vector<256x64xf32>
    %38 = arith.addf %35, %37 : vector<256x64xf32>
    %cst_21 = arith.constant dense<0.000000e+00> : vector<256xf32>
    %39 = vector.multi_reduction <add>, %38, %cst_21 [1] : vector<256x64xf32> to vector<256xf32>
    %40 = vector.shape_cast %39 : vector<256xf32> to vector<256x1xf32>
    %cst_22 = arith.constant 6.400000e+01 : f32
    %41 = vector.broadcast %cst_22 : f32 to vector<256x1xf32>
    %42 = arith.divf %40, %41 : vector<256x1xf32>
    %43 = arith.mulf %38, %38 : vector<256x64xf32>
    %cst_23 = arith.constant dense<0.000000e+00> : vector<256xf32>
    %44 = vector.multi_reduction <add>, %43, %cst_23 [1] : vector<256x64xf32> to vector<256xf32>
    %45 = vector.shape_cast %44 : vector<256xf32> to vector<256x1xf32>
    %cst_24 = arith.constant 6.400000e+01 : f32
    %46 = vector.broadcast %cst_24 : f32 to vector<256x1xf32>
    %47 = arith.divf %45, %46 : vector<256x1xf32>
    %48 = arith.mulf %42, %42 : vector<256x1xf32>
    %49 = arith.subf %47, %48 : vector<256x1xf32>
    %cst_25 = arith.constant 0.000000e+00 : f32
    %50 = vector.broadcast %cst_25 : f32 to vector<256x1xf32>
    %51 = arith.maximumf %49, %50 : vector<256x1xf32>
    %cst_26 = arith.constant 9.99999974E-6 : f32
    %52 = vector.broadcast %cst_26 : f32 to vector<256x1xf32>
    %53 = arith.addf %51, %52 : vector<256x1xf32>
    %54 = math.rsqrt %53 : vector<256x1xf32>
    %55 = vector.broadcast %42 : vector<256x1xf32> to vector<256x64xf32>
    %56 = arith.subf %38, %55 : vector<256x64xf32>
    %57 = vector.broadcast %54 : vector<256x1xf32> to vector<256x64xf32>
    %58 = arith.mulf %56, %57 : vector<256x64xf32>
    %c0_27 = arith.constant 0 : index
    %c0_28 = arith.constant 0 : index
    %59 = vector.load %arg8[%c0_27, %c0_28] : memref<1x64xf32, #tpu.memory_space<vmem>>, vector<1x64xf32>
    %60 = vector.broadcast %59 : vector<1x64xf32> to vector<256x64xf32>
    %61 = arith.mulf %58, %60 : vector<256x64xf32>
    %c0_29 = arith.constant 0 : index
    %c0_30 = arith.constant 0 : index
    %62 = vector.load %arg9[%c0_29, %c0_30] : memref<1x64xf32, #tpu.memory_space<vmem>>, vector<1x64xf32>
    %63 = vector.broadcast %62 : vector<1x64xf32> to vector<256x64xf32>
    %64 = arith.addf %61, %63 : vector<256x64xf32>
    %cst_31 = arith.constant 0.000000e+00 : f32
    %65 = vector.broadcast %cst_31 : f32 to vector<256x64xf32>
    %66 = arith.maximumf %64, %65 : vector<256x64xf32>
    %c0_32 = arith.constant 0 : index
    %c0_33 = arith.constant 0 : index
    %67 = vector.load %arg10[%c0_32, %c0_33] : memref<64x128xf32, #tpu.memory_space<vmem>>, vector<64x128xf32>
    %cst_34 = arith.constant dense<0.000000e+00> : vector<256x128xf32>
    %68 = tpu.matmul %66, %67, %cst_34 {dimension_numbers = #tpu.dot_dimension_numbers<[1], [0], [0], [1], [0, 0, 1, 1], [], []>} : vector<256x64xf32>, vector<64x128xf32>, vector<256x128xf32> -> vector<256x128xf32>
    %c0_35 = arith.constant 0 : index
    %c0_36 = arith.constant 0 : index
    %69 = vector.load %arg11[%c0_35, %c0_36] : memref<1x128xf32, #tpu.memory_space<vmem>>, vector<1x128xf32>
    %70 = vector.broadcast %69 : vector<1x128xf32> to vector<256x128xf32>
    %71 = arith.addf %68, %70 : vector<256x128xf32>
    %c0_37 = arith.constant 0 : index
    %c0_38 = arith.constant 0 : index
    %72 = vector.load %arg12[%c0_37, %c0_38] : memref<256x128xf32, #tpu.memory_space<vmem>>, vector<256x128xf32>
    tpu.vector_store %arg12[%c0_37, %c0_38], %71 {strides = array<i32>} : memref<256x128xf32, #tpu.memory_space<vmem>>, vector<256x128xf32>,
    return
  }
  func.func @transform_0(%arg0: i32) -> (i32, i32) {
    %c0_i32 = arith.constant 0 : i32
    %c0_i32_0 = arith.constant 0 : i32
    return %arg0, %c0_i32 : i32, i32
  }
  func.func @transform_1(%arg0: i32) -> (i32, i32) {
    %c0_i32 = arith.constant 0 : i32
    %c0_i32_0 = arith.constant 0 : i32
    %c0_i32_1 = arith.constant 0 : i32
    return %c0_i32, %c0_i32_0 : i32, i32
  }
  func.func @transform_2(%arg0: i32) -> (i32, i32) {
    %c0_i32 = arith.constant 0 : i32
    %c0_i32_0 = arith.constant 0 : i32
    %c0_i32_1 = arith.constant 0 : i32
    return %c0_i32, %c0_i32_0 : i32, i32
  }
  func.func @transform_3(%arg0: i32) -> (i32, i32) {
    %c0_i32 = arith.constant 0 : i32
    %c0_i32_0 = arith.constant 0 : i32
    %c0_i32_1 = arith.constant 0 : i32
    return %c0_i32, %c0_i32_0 : i32, i32
  }
  func.func @transform_4(%arg0: i32) -> (i32, i32) {
    %c0_i32 = arith.constant 0 : i32
    %c0_i32_0 = arith.constant 0 : i32
    %c0_i32_1 = arith.constant 0 : i32
    return %c0_i32, %c0_i32_0 : i32, i32
  }
  func.func @transform_5(%arg0: i32) -> (i32, i32) {
    %c0_i32 = arith.constant 0 : i32
    %c0_i32_0 = arith.constant 0 : i32
    %c0_i32_1 = arith.constant 0 : i32
    return %c0_i32, %c0_i32_0 : i32, i32
  }
  func.func @transform_6(%arg0: i32) -> (i32, i32) {
    %c0_i32 = arith.constant 0 : i32
    %c0_i32_0 = arith.constant 0 : i32
    %c0_i32_1 = arith.constant 0 : i32
    return %c0_i32, %c0_i32_0 : i32, i32
  }
  func.func @transform_7(%arg0: i32) -> (i32, i32) {
    %c0_i32 = arith.constant 0 : i32
    %c0_i32_0 = arith.constant 0 : i32
    %c0_i32_1 = arith.constant 0 : i32
    return %c0_i32, %c0_i32_0 : i32, i32
  }
  func.func @transform_8(%arg0: i32) -> (i32, i32) {
    %c0_i32 = arith.constant 0 : i32
    %c0_i32_0 = arith.constant 0 : i32
    %c0_i32_1 = arith.constant 0 : i32
    return %c0_i32, %c0_i32_0 : i32, i32
  }
  func.func @transform_9(%arg0: i32) -> (i32, i32) {
    %c0_i32 = arith.constant 0 : i32
    %c0_i32_0 = arith.constant 0 : i32
    %c0_i32_1 = arith.constant 0 : i32
    return %c0_i32, %c0_i32_0 : i32, i32
  }
  func.func @transform_10(%arg0: i32) -> (i32, i32) {
    %c0_i32 = arith.constant 0 : i32
    %c0_i32_0 = arith.constant 0 : i32
    %c0_i32_1 = arith.constant 0 : i32
    return %c0_i32, %c0_i32_0 : i32, i32
  }
  func.func @transform_11(%arg0: i32) -> (i32, i32) {
    %c0_i32 = arith.constant 0 : i32
    %c0_i32_0 = arith.constant 0 : i32
    return %arg0, %c0_i32 : i32, i32
  }
}

</mosaic_0001>

<bundles_post_ra>
// kernel: tpu_custom_call.1
= control target key start
LH: loop header
LB: loop body
LE: loop exit
PB: predicated region body
PF: predicated region fallthrough
CT: control target
= control target key end

     0   :  { %s5764_s0 = inlined_call_operand.vmem [shape: f32[512,32], index: 0, kind: input, shape index: {}]   ;;  %s5765_s1 = inlined_call_operand.vmem [shape: f32[32,64], index: 1, kind: input, shape index: {}]   ;;  %s5766_s2 = inlined_call_operand.vmem [shape: f32[1,64], index: 2, kind: input, shape index: {}]   ;;  %s5767_s3 = inlined_call_operand.vmem [shape: f32[1,64], index: 3, kind: input, shape index: {}]   ;;  %s5768_s4 = inlined_call_operand.vmem [shape: f32[1,64], index: 4, kind: input, shape index: {}]   ;;  %s5769_s5 = inlined_call_operand.vmem [shape: f32[64,64], index: 5, kind: input, shape index: {}]   ;;  %s5770_s6 = inlined_call_operand.vmem [shape: f32[1,64], index: 6, kind: input, shape index: {}]   ;;  %s5771_s7 = inlined_call_operand.vmem [shape: f32[1,64], index: 7, kind: input, shape index: {}]   ;;  %s5772_s8 = inlined_call_operand.vmem [shape: f32[1,64], index: 8, kind: input, shape index: {}]   ;;  %s5773_s9 = inlined_call_operand.vmem [shape: f32[64,128], index: 9, kind: input, shape index: {}]   ;;  %s5774_s10 = inlined_call_operand.vmem [shape: f32[1,128], index: 10, kind: input, shape index: {}]   ;;  %s5775_s11 = inlined_call_operand.hbm [shape: f32[512,128], index: 11, kind: output, shape index: {}]  }
   0x1   :  { %5776 = sst [smem:[#allocation5_spill]] %s5764_s0 }
   0x2   :  { %16 = vsyncpa [#allocation3], 0 }
   0x3   :  { %18 = vsyncpa [#allocation3 + $0x1], 0  ;;  %s3447_s17 = smov 0   ;;  %s3449_s18 = smov 0  }
   0x4   :  { %s3451_s19 = smov 0   ;;  %s3453_s20 = smov 0  }
   0x5 LB: > { %s3468_s21 = sadd.s32 4294967295, %s3382_s20   ;;  %s3006_s22 = sadd.s32 4294967294, %s3382_s20   ;;  %s3382_s20 = sphi %s3453_s20, %s5843_s20   ;;  %s3378_s19 = sphi %s3451_s19, %s5842_s19   ;;  %s3374_s18 = sphi %s3449_s18, %s5841_s18   ;;  %s3370_s17 = sphi %s3447_s17, %s5840_s17  }
   0x6   : > { %s3472_s23 = sadd.s32 1, %s3382_s20   ;;  %s267_s24 = sadd.s32 1, %s3378_s19 }
   0x7   : > { %s264_s25 = ssub.s32 %s3382_s20, %s3472_s23  ;;  %p277_p0 = scmp.ne.s32.totalorder %s3378_s19, %s3374_s18 }
   0x8   : > { %p265_p1 = scmp.eq.s32.totalorder %s264_s25, 0  ;;  %p278_p2 = scmp.eq.s32.totalorder %s3468_s21, 1 }
   0x9   : > { %p283_p3 = scmp.ne.s32.totalorder %s3374_s18, %s3370_s17  ;;  %p284_p4 = scmp.eq.s32.totalorder %s3006_s22, 1 }
   0xa   : > { %s3483_s26 = scalar_select %p265_p1, %s3378_s19, %s267_s24  }
   0xb   : > { %p3485_p5 = por %p278_p2, %p277_p0  ;;  %p3489_p6 = por %p284_p4, %p283_p3 }
   0xc   : > { %p3009_p7 = scmp.ge.s32.totalorder %s3382_s20, 1  ;;  %p341_p8 = scmp.lt.s32.totalorder %s3382_s20, 3 }
   0xe   : > { %p342_p9 = pnand %p3009_p7, %p341_p8 }
   0xf   : > { %s3011_s14 = sshll.u32 (!%p342_p9), %s3468_s21, 5  ;;  %s5779_s0 = sld [smem:[#allocation5_spill]] (!%p342_p9) }
  0x10   : > { %345 = sbr.rel (%p342_p9) target bundleno = 1016 (0x3f8), region = 64  ;;  %p382_p10 = scmp.lt.s32.totalorder (!%p342_p9), %s3011_s14, 63 }
  0x11   : > { %s378_s15 = sand.u32 (!%p342_p9), 1, %s3374_s18   ;;  %s3340_s22 = scalar_lea.hbm (!%p342_p9), %s5775_s11, 512 }
  0x12   : > { %s3010_s16 = sshll.u32 (!%p342_p9), %s378_s15, 8 }
  0x15   : > { %v423_v0 = vld [vmem:[%s5765_s1 + $0x18] sm:$0xff]  ;;  %v422_v1 = vld [vmem:[%s5765_s1 + $0x10] sm:$0xff]  ;;  %v421_v2 = vld [vmem:[%s5765_s1 + $0x8] sm:$0xff]  ;;  %s5845_s14 = smov (!%p382_p10, %s3011_s14), 63  ;;  %vm428_vm0 = vcmask 261120   ;;  %vm638_vm1 = vcmask 523264  }
  0x16   : > { %537 = vmatpush.msra.mxu0 %v423_v0  ;;  %3115 = vmatpush.msra.mxu3 %v423_v0  ;;  %v420_v3 = vld [vmem:[%s5765_s1] sm:$0xff]  ;;  %s3012_s25 = sshll.u32 %s5845_s14, 3  ;;  %s3114_s14 = sshll.u32 %s3468_s21, 8 }
  0x17   : > { %s3511_s12 = scalar_lea.vmem %s5779_s0, %s3012_s25  ;;  %v3555_v24 = vld [vmem:[%s5766_s2] ss:$0 sm:$0xff]  ;;  %s5322_s25 = scalar_lea.vmem [#allocation2], %s3010_s16 }
  0x18   : > { %538 = vmatpush.msra.mxu0 %v422_v1  ;;  %3116 = vmatpush.msra.mxu3 %v422_v1  ;;  %v388_v4 = vld [vmem:[%s3511_s12] sm:$0xff]  ;;  %v389_v5 = vld [vmem:[%s3511_s12 + $0x8] sm:$0xff]  ;;  %v390_v6 = vld [vmem:[%s3511_s12 + $0x10] sm:$0xff]  ;;  %s2940_s24 = scalar_lea.hbm %s5775_s11, %s3114_s14  ;;  %s2941_s29 = sshll.u32 %s5322_s25, 4  ;;  %s2942_s29 = int_to_ptr.vmem [resolvable:$true] %s2941_s29 }
  0x19   : > { %v391_v7 = vld [vmem:[%s3511_s12 + $0x18] sm:$0xff]  ;;  %v392_v8 = vld [vmem:[%s3511_s12 + $0x20] sm:$0xff]  ;;  %v413_v9 = vld [vmem:[%s3511_s12 + $0xc8] sm:$0xff]  ;;  %s2943_s30 = sshll.u32 %s2940_s24, 4  ;;  %s2929_s21 = scalar_lea.sflag [#allocation3], %s378_s15  ;;  %s2944_s30 = int_to_ptr.hbm [resolvable:$true] %s2943_s30 }
  0x1a   : > { %539 = vmatpush.msra.mxu0 %v421_v2  ;;  %3117 = vmatpush.msra.mxu3 %v421_v2  ;;  %v393_v10 = vld [vmem:[%s3511_s12 + $0x28] sm:$0xff]  ;;  %v414_v11 = vld [vmem:[%s3511_s12 + $0xd0] sm:$0xff]  ;;  %v395_v13 = vld [vmem:[%s3511_s12 + $0x38] sm:$0xff] }
  0x1b   : > { %v394_v12 = vld [vmem:[%s3511_s12 + $0x30] sm:$0xff]  ;;  %v396_v14 = vld [vmem:[%s3511_s12 + $0x40] sm:$0xff]  ;;  %v397_v15 = vld [vmem:[%s3511_s12 + $0x48] sm:$0xff] }
  0x1c   : > { %540 = vmatpush.msra.mxu0 %v420_v3  ;;  %3118 = vmatpush.msra.mxu3 %v420_v3  ;;  %v398_v16 = vld [vmem:[%s3511_s12 + $0x50] sm:$0xff]  ;;  %v399_v17 = vld [vmem:[%s3511_s12 + $0x58] sm:$0xff]  ;;  %v400_v18 = vld [vmem:[%s3511_s12 + $0x60] sm:$0xff] }
  0x1d   : > { %3013 = vmatmul.msk.f32.vlgmr.msra.gmra.mxu0 %vm428_vm0, %v388_v4  ;;  %3038 = vmatmul.msk.f32.vlgmr.msra.gmra.mxu3 %vm428_vm0, %v413_v9  ;;  %v401_v19 = vld [vmem:[%s3511_s12 + $0x68] sm:$0xff]  ;;  %v402_v20 = vld [vmem:[%s3511_s12 + $0x70] sm:$0xff]  ;;  %v415_v21 = vld [vmem:[%s3511_s12 + $0xd8] sm:$0xff] }
  0x1e   : > { %v403_v22 = vld [vmem:[%s3511_s12 + $0x78] sm:$0xff]  ;;  %v416_v23 = vld [vmem:[%s3511_s12 + $0xe0] sm:$0xff]  ;;  %v405_v31 = vld [vmem:[%s3511_s12 + $0x88] sm:$0xff] }
  0x1f   : > { %v404_v26 = vld [vmem:[%s3511_s12 + $0x80] sm:$0xff]  ;;  %v417_v33 = vld [vmem:[%s3511_s12 + $0xe8] sm:$0xff]  ;;  %v406_v38 = vld [vmem:[%s3511_s12 + $0x90] sm:$0xff] }
  0x20   : > { %v418_v42 = vld [vmem:[%s3511_s12 + $0xf0] sm:$0xff]  ;;  %v407_v45 = vld [vmem:[%s3511_s12 + $0x98] sm:$0xff]  ;;  %v408_v53 = vld [vmem:[%s3511_s12 + $0xa0] sm:$0xff] }
  0x21   : > { %v419_v50 = vld [vmem:[%s3511_s12 + $0xf8] sm:$0xff]  ;;  %v409_v59 = vld [vmem:[%s3511_s12 + $0xa8] sm:$0xff]  ;;  %v410_v1 = vld [vmem:[%s3511_s12 + $0xb0] sm:$0xff] }
  0x25   : > { %3014 = vmatmul.msk.f32.gmra.mxu0 %vm428_vm0, %v389_v5  ;;  %3039 = vmatmul.msk.f32.gmra.mxu3 %vm428_vm0, %v414_v11 }
  0x2d   : > { %3015 = vmatmul.msk.f32.gmra.mxu0 %vm428_vm0, %v390_v6  ;;  %3040 = vmatmul.msk.f32.gmra.mxu3 %vm428_vm0, %v415_v21 }
  0x35   : > { %3016 = vmatmul.msk.f32.gmra.mxu0 %vm428_vm0, %v391_v7  ;;  %3041 = vmatmul.msk.f32.gmra.mxu3 %vm428_vm0, %v416_v23  ;;  %v411_v7 = vld [vmem:[%s3511_s12 + $0xb8] sm:$0xff] }
  0x3d   : > { %3017 = vmatmul.msk.f32.gmra.mxu0 %vm428_vm0, %v392_v8  ;;  %3042 = vmatmul.msk.f32.gmra.mxu3 %vm428_vm0, %v417_v33 }
  0x45   : > { %3018 = vmatmul.msk.f32.gmra.mxu0 %vm428_vm0, %v393_v10  ;;  %3043 = vmatmul.msk.f32.gmra.mxu3 %vm428_vm0, %v418_v42 }
  0x4d   : > { %3019 = vmatmul.msk.f32.gmra.mxu0 %vm428_vm0, %v394_v12  ;;  %3044 = vmatmul.msk.f32.gmra.mxu3 %vm428_vm0, %v419_v50 }
  0x55   : > { %3020 = vmatmul.msk.f32.gmra.mxu0 %vm428_vm0, %v395_v13  ;;  %v412_v13 = vld [vmem:[%s3511_s12 + $0xc0] sm:$0xff]  ;;  %s3334_s12 = sshra.s32 %s2944_s30, 4  ;;  %s3335_s12 = int_to_ptr.hbm [resolvable:$true] %s3334_s12 }
  0x56   : > { %s3336_s13 = scalar_lea.hbm %s3335_s12, 256  ;;  %p3341_p0 = scmp.lt.s32.totalorder %s3335_s12, %s5775_s11 }
  0x57   : > { %p3337_p11 = scmp.ne.s32.totalorder %s3335_s12, %s3336_s13  ;;  %p3342_p1 = scmp.lt.s32.totalorder %s3340_s22, %s3336_s13 }
  0x59   : > { %p3338_p12 = pnand %p3337_p11, %p3485_p5  ;;  %p3343_p2 = por %p3342_p1, %p3341_p0 }
  0x5b   : > { %p3339_p13 = pneg %p3338_p12 }
  0x5d   : > { %3021 = vmatmul.msk.f32.gmra.mxu0 %vm428_vm0, %v396_v14  ;;  %p3344_p3 = pnand %p3343_p2, %p3339_p13 }
  0x65   : > { %3022 = vmatmul.msk.f32.gmra.mxu0 %vm428_vm0, %v397_v15 }
  0x6d   : > { %3023 = vmatmul.msk.f32.gmra.mxu0 %vm428_vm0, %v398_v16 }
  0x75   : > { %3024 = vmatmul.msk.f32.gmra.mxu0 %vm428_vm0, %v399_v17 }
  0x7d   : > { %3025 = vmatmul.msk.f32.gmra.mxu0 %vm428_vm0, %v400_v18 }
  0x85   : > { %3026 = vmatmul.msk.f32.gmra.mxu0 %vm428_vm0, %v401_v19 }
  0x8d   : > { %3027 = vmatmul.msk.f32.gmra.mxu0 %vm428_vm0, %v402_v20 }
  0x95   : > { %3028 = vmatmul.msk.f32.gmra.mxu0 %vm428_vm0, %v403_v22 }
  0x9a   : > { %v542_v25 = vpop.f32.mrf.mxu0 }
  0x9b   : > { %v3560_v27 = vadd.f32 %v3555_v24, %v542_v25 }
  0x9d   : > { %3029 = vmatmul.msk.f32.gmra.mxu0 %vm428_vm0, %v404_v26  ;;  %v639_v28 = vsel %vm638_vm1, %v3560_v27, 0.0  ;;  %v774_v29 = vmul.f32 %v3560_v27, %v3560_v27 }
  0x9e   : > { %640 = vadd.xlane.f32.xlu0 %v639_v28 }
  0x9f   : > { %v806_v35 = vsel %vm638_vm1, %v774_v29, 0.0 }
  0xa0   : > { %v617_v14 = vpop.f32.mrf.mxu3 }
  0xa1   : > { %v3655_v19 = vadd.f32 %v3555_v24, %v617_v14 }
  0xa2   : > { %v545_v30 = vpop.f32.mrf.mxu0 }
  0xa3   : > { %v3569_v32 = vadd.f32 %v3555_v24, %v545_v30  ;;  %v714_v25 = vsel %vm638_vm1, %v3655_v19, 0.0  ;;  %v799_v30 = vmul.f32 %v3655_v19, %v3655_v19 }
  0xa5   : > { %3030 = vmatmul.msk.f32.gmra.mxu0 %vm428_vm0, %v405_v31  ;;  %v642_v34 = vsel %vm638_vm1, %v3569_v32, 0.0  ;;  %v775_v36 = vmul.f32 %v3569_v32, %v3569_v32 }
  0xa6   : > { %643 = vadd.xlane.f32.xlu1 %v642_v34  ;;  %807 = vadd.xlane.f32.xlu0 %v806_v35  ;;  %v881_v35 = vsel %vm638_vm1, %v799_v30, 0.0 }
  0xa7   : > { %v809_v41 = vsel %vm638_vm1, %v775_v36, 0.0 }
  0xa8   : > { %v620_v22 = vpop.f32.mrf.mxu3 }
  0xa9   : > { %v3668_v29 = vadd.f32 %v3555_v24, %v620_v22 }
  0xaa   : > { %v548_v37 = vpop.f32.mrf.mxu0 }
  0xab   : > { %v3581_v39 = vadd.f32 %v3555_v24, %v548_v37  ;;  %v717_v34 = vsel %vm638_vm1, %v3668_v29, 0.0 }
  0xad   : > { %3031 = vmatmul.msk.f32.gmra.mxu0 %vm428_vm0, %v406_v38  ;;  %v645_v40 = vsel %vm638_vm1, %v3581_v39, 0.0  ;;  %v776_v43 = vmul.f32 %v3581_v39, %v3581_v39 }
  0xae   : > { %646 = vadd.xlane.f32.xlu2 %v645_v40  ;;  %810 = vadd.xlane.f32.xlu1 %v809_v41 }
  0xaf   : > { %v812_v47 = vsel %vm638_vm1, %v776_v43, 0.0 }
  0xb2   : > { %v551_v44 = vpop.f32.mrf.mxu0 }
  0xb3   : > { %v3593_v46 = vadd.f32 %v3555_v24, %v551_v44 }
  0xb5   : > { %3032 = vmatmul.msk.f32.gmra.mxu0 %vm428_vm0, %v407_v45  ;;  %v648_v48 = vsel %vm638_vm1, %v3593_v46, 0.0  ;;  %v777_v49 = vmul.f32 %v3593_v46, %v3593_v46 }
  0xb6   : > { %813 = vadd.xlane.f32.xlu2 %v812_v47  ;;  %649 = vadd.xlane.f32.xlu0 %v648_v48  ;;  %v3384_v47 = vmov 64.0  }
  0xb7   : > { %v815_v51 = vsel %vm638_vm1, %v777_v49, 0.0  ;;  %3184 = vrcp.f32 %v3384_v47 }
  0xb8   : > { %816 = vadd.xlane.f32.xlu1 %v815_v51 }
  0xba   : > { %v554_v52 = vpop.f32.mrf.mxu0 }
  0xbb   : > { %v3606_v54 = vadd.f32 %v3555_v24, %v554_v52 }
  0xbd   : > { %3033 = vmatmul.msk.f32.gmra.mxu0 %vm428_vm0, %v408_v53  ;;  %v651_v55 = vsel %vm638_vm1, %v3606_v54, 0.0  ;;  %v778_v56 = vmul.f32 %v3606_v54, %v3606_v54  ;;  %v3185_v52 = vpop.eup %3184 }
  0xbe   : > { %652 = vadd.xlane.f32.xlu2 %v651_v55  ;;  %vm740_vm2 = vweird.f32 %v3185_v52 }
  0xbf   : > { %v818_v57 = vsel %vm638_vm1, %v778_v56, 0.0  ;;  %v736_v56 = vmul.f32 64.0, %v3185_v52 }
  0xc0   : > { %819 = vadd.xlane.f32.xlu0 %v818_v57 }
  0xc2   : > { %v557_v58 = vpop.f32.mrf.mxu0 }
  0xc3   : > { %v3616_v60 = vadd.f32 %v3555_v24, %v557_v58 }
  0xc5   : > { %3034 = vmatmul.msk.f32.gmra.mxu0 %vm428_vm0, %v409_v59  ;;  %v654_v61 = vsel %vm638_vm1, %v3616_v60, 0.0  ;;  %v779_v62 = vmul.f32 %v3616_v60, %v3616_v60 }
  0xc6   : > { %655 = vadd.xlane.f32.xlu1 %v654_v61  ;;  %v737_v61 = vsub.f32 1.0, %v736_v56 }
  0xc7   : > { %v821_v63 = vsel %vm638_vm1, %v779_v62, 0.0 }
  0xc8   : > { %822 = vadd.xlane.f32.xlu2 %v821_v63 }
  0xca   : > { %v560_v0 = vpop.f32.mrf.mxu0 }
  0xcb   : > { %v3626_v2 = vadd.f32 %v3555_v24, %v560_v0  ;;  %v738_v0 = vmul.f32 %v3185_v52, %v737_v61  ;;  %v800_v61 = vmul.f32 %v3668_v29, %v3668_v29 }
  0xcd   : > { %3035 = vmatmul.msk.f32.gmra.mxu0 %vm428_vm0, %v410_v1  ;;  %v657_v3 = vsel %vm638_vm1, %v3626_v2, 0.0  ;;  %v780_v4 = vmul.f32 %v3626_v2, %v3626_v2  ;;  %v1557_v1 = vld [vmem:[%s5769_s5 + $0x38] sm:$0xff] }
  0xce   : > { %658 = vadd.xlane.f32.xlu0 %v657_v3  ;;  %1666 = vmatpush.msra.mxu1 %v1557_v1 }
  0xcf   : > { %v824_v5 = vsel %vm638_vm1, %v780_v4, 0.0  ;;  %3119 = vmatpush.msrb.mxu3 %v1557_v1 }
  0xd0   : > { %825 = vadd.xlane.f32.xlu1 %v824_v5  ;;  %v1556_v5 = vld [vmem:[%s5769_s5 + $0x30] sm:$0xff] }
  0xd1   : > { %1667 = vmatpush.msra.mxu1 %v1556_v5  ;;  %3120 = vmatpush.msrb.mxu3 %v1556_v5 }
  0xd2   : > { %v563_v6 = vpop.f32.mrf.mxu0 }
  0xd3   : > { %v3636_v8 = vadd.f32 %v3555_v24, %v563_v6 }
  0xd5   : > { %3036 = vmatmul.msk.f32.gmra.mxu0 %vm428_vm0, %v411_v7  ;;  %v660_v9 = vsel %vm638_vm1, %v3636_v8, 0.0  ;;  %v781_v10 = vmul.f32 %v3636_v8, %v3636_v8  ;;  %v739_v7 = vadd.f32 %v3185_v52, %v738_v0 }
  0xd6   : > { %661 = vadd.xlane.f32.xlu2 %v660_v9  ;;  %v1555_v9 = vld [vmem:[%s5769_s5 + $0x28] sm:$0xff] }
  0xd7   : > { %v827_v11 = vsel %vm638_vm1, %v781_v10, 0.0  ;;  %1668 = vmatpush.msra.mxu1 %v1555_v9  ;;  %3121 = vmatpush.msrb.mxu3 %v1555_v9 }
  0xd8   : > { %828 = vadd.xlane.f32.xlu0 %v827_v11 }
  0xda   : > { %v566_v12 = vpop.f32.mrf.mxu0 }
  0xdb   : > { %v3646_v15 = vadd.f32 %v3555_v24, %v566_v12  ;;  %v1554_v12 = vld [vmem:[%s5769_s5 + $0x20] sm:$0xff] }
  0xdc   : > { %1669 = vmatpush.msra.mxu1 %v1554_v12  ;;  %3122 = vmatpush.msrb.mxu3 %v1554_v12 }
  0xdd   : > { %3037 = vmatmul.msk.f32.gmra.mxu0 %vm428_vm0, %v412_v13  ;;  %v663_v16 = vsel %vm638_vm1, %v3646_v15, 0.0  ;;  %v782_v17 = vmul.f32 %v3646_v15, %v3646_v15  ;;  %v3727_v13 = vsel %vm740_vm2, %v3185_v52, %v739_v7 }
  0xde   : > { %664 = vadd.xlane.f32.xlu1 %v663_v16 }
  0xdf   : > { %v830_v18 = vsel %vm638_vm1, %v782_v17, 0.0 }
  0xe0   : > { %831 = vadd.xlane.f32.xlu2 %v830_v18  ;;  %v1553_v18 = vld [vmem:[%s5769_s5 + $0x18] sm:$0xff] }
  0xe1   : > { %1670 = vmatpush.msra.mxu1 %v1553_v18  ;;  %3123 = vmatpush.msrb.mxu3 %v1553_v18 }
  0xe2   : > { %v569_v20 = vpop.f32.mrf.mxu0 }
  0xe3   : > { %v3658_v21 = vadd.f32 %v3555_v24, %v569_v20 }
  0xe5   : > { %v666_v23 = vsel %vm638_vm1, %v3658_v21, 0.0  ;;  %v783_v26 = vmul.f32 %v3658_v21, %v3658_v21 }
  0xe6   : > { %667 = vadd.xlane.f32.xlu0 %v666_v23  ;;  %v1552_v23 = vld [vmem:[%s5769_s5 + $0x10] sm:$0xff] }
  0xe7   : > { %v833_v28 = vsel %vm638_vm1, %v783_v26, 0.0  ;;  %1671 = vmatpush.msra.mxu1 %v1552_v23  ;;  %3124 = vmatpush.msrb.mxu3 %v1552_v23 }
  0xe8   : > { %715 = vadd.xlane.f32.xlu2 %v714_v25  ;;  %834 = vadd.xlane.f32.xlu1 %v833_v28  ;;  %v1551_v28 = vld [vmem:[%s5769_s5 + $0x8] sm:$0xff] }
  0xe9   : > { %1672 = vmatpush.msra.mxu1 %v1551_v28  ;;  %3125 = vmatpush.msrb.mxu3 %v1551_v28 }
  0xea   : > { %v572_v31 = vpop.f32.mrf.mxu0 }
  0xeb   : > { %v3673_v33 = vadd.f32 %v3555_v24, %v572_v31 }
  0xed   : > { %v669_v36 = vsel %vm638_vm1, %v3673_v33, 0.0  ;;  %v784_v37 = vmul.f32 %v3673_v33, %v3673_v33 }
  0xee   : > { %718 = vadd.xlane.f32.xlu0 %v717_v34 }
  0xef   : > { %v836_v41 = vsel %vm638_vm1, %v784_v37, 0.0 }
  0xf0   : > { %670 = vadd.xlane.f32.xlu2 %v669_v36  ;;  %882 = vadd.xlane.f32.xlu1 %v881_v35  ;;  %v1550_v36 = vld [vmem:[%s5769_s5] sm:$0xff] }
  0xf1   : > { %1673 = vmatpush.msra.mxu1 %v1550_v36  ;;  %3126 = vmatpush.msrb.mxu3 %v1550_v36 }
  0xf2   : > { %v575_v38 = vpop.f32.mrf.mxu0 }
  0xf3   : > { %v3683_v40 = vadd.f32 %v3555_v24, %v575_v38 }
  0xf5   : > { %v785_v42 = vmul.f32 %v3683_v40, %v3683_v40  ;;  %v672_v44 = vsel %vm638_vm1, %v3683_v40, 0.0 }
  0xf6   : > { %837 = vadd.xlane.f32.xlu0 %v836_v41 }
  0xf7   : > { %v839_v43 = vsel %vm638_vm1, %v785_v42, 0.0 }
  0xf8   : > { %840 = vadd.xlane.f32.xlu2 %v839_v43  ;;  %673 = vadd.xlane.f32.xlu1 %v672_v44 }
  0xfa   : > { %v578_v45 = vpop.f32.mrf.mxu0 }
  0xfb   : > { %v3692_v48 = vadd.f32 %v3555_v24, %v578_v45 }
  0xfd   : > { %v675_v49 = vsel %vm638_vm1, %v3692_v48, 0.0  ;;  %v786_v50 = vmul.f32 %v3692_v48, %v3692_v48 }
  0xfe   : > { %676 = vadd.xlane.f32.xlu0 %v675_v49 }
  0xff   : > { %v842_v51 = vsel %vm638_vm1, %v786_v50, 0.0 }
 0x100   : > { %843 = vadd.xlane.f32.xlu1 %v842_v51 }
 0x102   : > { %v581_v53 = vpop.f32.mrf.mxu0 }
 0x103   : > { %v3700_v55 = vadd.f32 %v3555_v24, %v581_v53 }
 0x105   : > { %v678_v57 = vsel %vm638_vm1, %v3700_v55, 0.0  ;;  %v787_v58 = vmul.f32 %v3700_v55, %v3700_v55 }
 0x106   : > { %679 = vadd.xlane.f32.xlu2 %v678_v57 }
 0x107   : > { %v845_v59 = vsel %vm638_vm1, %v787_v58, 0.0 }
 0x108   : > { %846 = vadd.xlane.f32.xlu0 %v845_v59 }
 0x10a   : > { %v584_v62 = vpop.f32.mrf.mxu0 }
 0x10b   : > { %v3708_v63 = vadd.f32 %v3555_v24, %v584_v62 }
 0x10d   : > { %v681_v3 = vsel %vm638_vm1, %v3708_v63, 0.0  ;;  %v788_v4 = vmul.f32 %v3708_v63, %v3708_v63 }
 0x10e   : > { %682 = vadd.xlane.f32.xlu1 %v681_v3 }
 0x10f   : > { %v848_v6 = vsel %vm638_vm1, %v788_v4, 0.0 }
 0x110   : > { %849 = vadd.xlane.f32.xlu2 %v848_v6 }
 0x111   : > { %v641_v10 = vpop.xlane.xlu0 %640 }
 0x112   : > { %v587_v11 = vpop.f32.mrf.mxu0  ;;  %v3740_v20 = vmul.f32 %v3727_v13, %v641_v10  ;;  %v3788_v10 = vpop.f32.mrf.mxu3 }
 0x113   : > { %v3730_v14 = vadd.f32 %v3555_v24, %v587_v11 }
 0x114   : > { %v934_v30 = vmul.f32 %v3740_v20, %v3740_v20 }
 0x115   : > { %v684_v16 = vsel %vm638_vm1, %v3730_v14, 0.0  ;;  %v789_v17 = vmul.f32 %v3730_v14, %v3730_v14 }
 0x116   : > { %685 = vadd.xlane.f32.xlu0 %v684_v16  ;;  %v884_v16 = vsel %vm638_vm1, %v800_v61, 0.0 }
 0x117   : > { %v851_v22 = vsel %vm638_vm1, %v789_v17, 0.0 }
 0x118   : > { %852 = vadd.xlane.f32.xlu2 %v851_v22 }
 0x119   : > { %v644_v25 = vpop.xlane.xlu1 %643  ;;  %v808_v26 = vpop.xlane.xlu0 %807 }
 0x11a   : > { %v902_v31 = vmul.f32 %v808_v26, %v3727_v13  ;;  %v590_v34 = vpop.f32.mrf.mxu0  ;;  %v3763_v42 = vmul.f32 %v3727_v13, %v644_v25  ;;  %v626_v61 = vpop.f32.mrf.mxu3 }
 0x11b   : > { %v3753_v35 = vadd.f32 %v3555_v24, %v590_v34 }
 0x11c   : > { %v966_v37 = vsub.f32 %v902_v31, %v934_v30  ;;  %v935_v50 = vmul.f32 %v3763_v42, %v3763_v42 }
 0x11d   : > { %v687_v38 = vsel %vm638_vm1, %v3753_v35, 0.0  ;;  %v790_v41 = vmul.f32 %v3753_v35, %v3753_v35 }
 0x11e   : > { %v998_v43 = vmax.f32 %v966_v37, 0.0  ;;  %688 = vadd.xlane.f32.xlu1 %v687_v38 }
 0x11f   : > { %v854_v44 = vsel %vm638_vm1, %v790_v41, 0.0 }
 0x120   : > { %v1030_v45 = vadd.f32 1e-05, %v998_v43  ;;  %855 = vadd.xlane.f32.xlu0 %v854_v44 }
 0x121   : > { %v647_v47 = vpop.xlane.xlu2 %646  ;;  %v811_v49 = vpop.xlane.xlu1 %810 }
 0x122   : > { %3186 = vrsqrt.f32 %v1030_v45  ;;  %v903_v51 = vmul.f32 %v811_v49, %v3727_v13  ;;  %v593_v52 = vpop.f32.mrf.mxu0  ;;  %v3775_v58 = vmul.f32 %v3727_v13, %v647_v47  ;;  %vm1068_vm4 = vweird.f32 %v1030_v45 }
 0x123   : > { %v3770_v53 = vadd.f32 %v3555_v24, %v593_v52 }
 0x124   : > { %v967_v56 = vsub.f32 %v903_v51, %v935_v50  ;;  %v936_v5 = vmul.f32 %v3775_v58, %v3775_v58 }
 0x125   : > { %v690_v57 = vsel %vm638_vm1, %v3770_v53, 0.0 }
 0x126   : > { %v999_v59 = vmax.f32 %v967_v56, 0.0  ;;  %691 = vadd.xlane.f32.xlu2 %v690_v57  ;;  %v3821_v57 = vld [vmem:[%s5767_s3] ss:$0 sm:$0xff] }
 0x128   : > { %v3187_v62 = vpop.eup %3186  ;;  %v3779_v0 = vadd.f32 1e-05, %v999_v59 }
 0x129   : > { %v1063_v1 = vmul.f32 %v3187_v62, %v1030_v45  ;;  %v814_v3 = vpop.xlane.xlu2 %813  ;;  %v650_v4 = vpop.xlane.xlu0 %649  ;;  %vm1069_vm3 = vweird.f32 %v3187_v62  ;;  %v1382_v45 = vsub.f32 %v3560_v27, %v3740_v20 }
 0x12a   : > { %3188 = vrsqrt.f32 %v3779_v0  ;;  %v904_v6 = vmul.f32 %v814_v3, %v3727_v13  ;;  %v3786_v7 = vmul.f32 %v3727_v13, %v650_v4  ;;  %v596_v9 = vpop.f32.mrf.mxu0  ;;  %vm3802_vm5 = vmor %vm1068_vm4, %vm1069_vm3  ;;  %vm1078_vm7 = vweird.f32 %v3779_v0 }
 0x12b   : > { %v1064_v11 = vmul.f32 %v3187_v62, %v1063_v1  ;;  %v817_v12 = vpop.xlane.xlu1 %816  ;;  %v3795_v25 = vadd.f32 %v3555_v24, %v596_v9 }
 0x12c   : > { %v968_v17 = vsub.f32 %v904_v6, %v936_v5  ;;  %v937_v18 = vmul.f32 %v3786_v7, %v3786_v7  ;;  %v905_v22 = vmul.f32 %v817_v12, %v3727_v13  ;;  %v3834_v6 = vadd.f32 %v3555_v24, %v626_v61 }
 0x12d   : > { %v1065_v23 = vmul.f32 0.5, %v1064_v11  ;;  %v792_v43 = vmul.f32 %v3795_v25, %v3795_v25 }
 0x12e   : > { %v1000_v26 = vmax.f32 %v968_v17, 0.0  ;;  %v969_v28 = vsub.f32 %v905_v22, %v937_v18  ;;  %885 = vadd.xlane.f32.xlu2 %v884_v16 }
 0x12f   : > { %v1066_v30 = vsub.f32 1.5, %v1065_v23  ;;  %v860_v27 = vsel %vm638_vm1, %v792_v43, 0.0 }
 0x130   : > { %v3189_v31 = vpop.eup %3188  ;;  %v3797_v34 = vadd.f32 1e-05, %v1000_v26  ;;  %v1001_v36 = vmax.f32 %v969_v28, 0.0 }
 0x131   : > { %v1067_v37 = vmul.f32 %v3187_v62, %v1066_v30  ;;  %v1073_v38 = vmul.f32 %v3189_v31, %v3779_v0  ;;  %v653_v41 = vpop.xlane.xlu2 %652  ;;  %vm1079_vm6 = vweird.f32 %v3189_v31 }
 0x132   : > { %3190 = vrsqrt.f32 %v3797_v34  ;;  %v3807_v47 = vadd.f32 1e-05, %v1001_v36  ;;  %v3810_v49 = vmul.f32 %v3727_v13, %v653_v41  ;;  %v3812_v50 = vpop.f32.mrf.mxu0  ;;  %v723_v41 = vsel %vm638_vm1, %v3834_v6, 0.0  ;;  %vm1080_vm8 = vmor %vm1078_vm7, %vm1079_vm6 }
 0x133   : > { %v1074_v51 = vmul.f32 %v3189_v31, %v1073_v38  ;;  %v820_v52 = vpop.xlane.xlu0 %819  ;;  %v1071_v56 = vsel %vm3802_vm5, %v3187_v62, %v1067_v37  ;;  %v3831_v62 = vld [vmem:[%s5768_s4] ss:$0 sm:$0xff]  ;;  %vm1088_vm10 = vweird.f32 %v3797_v34 }
 0x134   : > { %3192 = vrsqrt.f32 %v3807_v47  ;;  %v938_v59 = vmul.f32 %v3810_v49, %v3810_v49  ;;  %v906_v3 = vmul.f32 %v820_v52, %v3727_v13  ;;  %v1414_v20 = vmul.f32 %v1382_v45, %v1071_v56 }
 0x135   : > { %v1075_v1 = vmul.f32 0.5, %v1074_v51  ;;  %v1383_v45 = vsub.f32 %v3569_v32, %v3763_v42  ;;  %vm1098_vm13 = vweird.f32 %v3807_v47 }
 0x136   : > { %861 = vadd.xlane.f32.xlu2 %v860_v27  ;;  %v970_v5 = vsub.f32 %v906_v3, %v938_v59  ;;  %v1450_v9 = vmul.f32 %v3821_v57, %v1414_v20  ;;  %v629_v27 = vpop.f32.mrf.mxu3 }
 0x137   : > { %v1076_v4 = vsub.f32 1.5, %v1075_v1 }
 0x138   : > { %v3837_v11 = vpop.eup %3190  ;;  %v1002_v16 = vmax.f32 %v970_v5, 0.0  ;;  %v1486_v28 = vadd.f32 %v3831_v62, %v1450_v9 }
 0x139   : > { %v1083_v12 = vmul.f32 %v3837_v11, %v3797_v34  ;;  %v656_v17 = vpop.xlane.xlu1 %655  ;;  %v1077_v22 = vmul.f32 %v3189_v31, %v1076_v4  ;;  %vm1089_vm9 = vweird.f32 %v3837_v11 }
 0x13a   : > { %v3841_v18 = vpop.eup %3192  ;;  %v3844_v23 = vmul.f32 %v3727_v13, %v656_v17  ;;  %v602_v26 = vpop.f32.mrf.mxu0  ;;  %v3850_v37 = vadd.f32 1e-05, %v1002_v16  ;;  %v1518_v59 = vmax.f32 %v1486_v28, 0.0  ;;  %vm3870_vm11 = vmor %vm1088_vm10, %vm1089_vm9  ;;  %v3880_v17 = vadd.f32 %v3555_v24, %v629_v27 }
 0x13b   : > { %v1084_v30 = vmul.f32 %v3837_v11, %v1083_v12  ;;  %v1093_v36 = vmul.f32 %v3841_v18, %v3807_v47  ;;  %v823_v38 = vpop.xlane.xlu2 %822  ;;  %v1081_v61 = vsel %vm1080_vm8, %v3189_v31, %v1077_v22  ;;  %v3867_v4 = vadd.f32 %v3555_v24, %v602_v26 }
 0x13c   : > { %v939_v43 = vmul.f32 %v3844_v23, %v3844_v23  ;;  %v907_v44 = vmul.f32 %v823_v38, %v3727_v13  ;;  %3194 = vrsqrt.f32 %v3850_v37  ;;  %v1415_v3 = vmul.f32 %v1383_v45, %v1081_v61  ;;  %3045 = vmatmul.msk.f32.vlgmr.msra.gmra.mxu1 %vm638_vm1, %v1518_v59 }
 0x13d   : > { %v1085_v51 = vmul.f32 0.5, %v1084_v30  ;;  %v1094_v52 = vmul.f32 %v3841_v18, %v1093_v36  ;;  %vm1099_vm12 = vweird.f32 %v3841_v18  ;;  %v1384_v38 = vsub.f32 %v3581_v39, %v3775_v58 }
 0x13e   : > { %v971_v56 = vsub.f32 %v907_v44, %v939_v43  ;;  %724 = vadd.xlane.f32.xlu2 %v723_v41  ;;  %v1451_v31 = vmul.f32 %v3821_v57, %v1415_v3  ;;  %vm3901_vm14 = vmor %vm1098_vm13, %vm1099_vm12  ;;  %v1385_v61 = vsub.f32 %v3593_v46, %v3786_v7  ;;  %vm1108_vm0 = vweird.f32 %v3850_v37 }
 0x13f   : > { %v1086_v1 = vsub.f32 1.5, %v1085_v51  ;;  %v1095_v0 = vmul.f32 0.5, %v1094_v52  ;;  %v699_v51 = vsel %vm638_vm1, %v3867_v4, 0.0  ;;  %v803_v52 = vmul.f32 %v3880_v17, %v3880_v17 }
 0x140   : > { %v1003_v20 = vmax.f32 %v971_v56, 0.0  ;;  %v1487_v30 = vadd.f32 %v3831_v62, %v1451_v31  ;;  %v3908_v56 = vpop.f32.mrf.mxu3 }
 0x141   : > { %v1087_v32 = vmul.f32 %v3837_v11, %v1086_v1  ;;  %v1096_v42 = vsub.f32 1.5, %v1095_v0  ;;  %v659_v5 = vpop.xlane.xlu0 %658 }
 0x142   : > { %v3874_v12 = vadd.f32 1e-05, %v1003_v20  ;;  %v3877_v34 = vmul.f32 %v3727_v13, %v659_v5  ;;  %v605_v16 = vpop.f32.mrf.mxu0  ;;  %v3882_v22 = vpop.eup %3194  ;;  %v1519_v45 = vmax.f32 %v1487_v30, 0.0 }
 0x143   : > { %v1097_v26 = vmul.f32 %v3841_v18, %v1096_v42  ;;  %v826_v28 = vpop.xlane.xlu1 %825  ;;  %v1091_v36 = vsel %vm3870_vm11, %v3837_v11, %v1087_v32  ;;  %v1103_v41 = vmul.f32 %v3882_v22, %v3850_v37  ;;  %vm1109_vm15 = vweird.f32 %v3882_v22 }
 0x144   : > { %3196 = vrsqrt.f32 %v3874_v12  ;;  %v940_v43 = vmul.f32 %v3877_v34, %v3877_v34  ;;  %v908_v44 = vmul.f32 %v826_v28, %v3727_v13  ;;  %v1416_v58 = vmul.f32 %v1384_v38, %v1091_v36  ;;  %3046 = vmatmul.msk.f32.gmra.mxu1 %vm638_vm1, %v1519_v45  ;;  %vm3941_vm2 = vmor %vm1108_vm0, %vm1109_vm15 }
 0x145   : > { %v1104_v39 = vmul.f32 %v3882_v22, %v1103_v41  ;;  %v1101_v59 = vsel %vm3901_vm14, %v3841_v18, %v1097_v26  ;;  %v893_v26 = vsel %vm638_vm1, %v803_v52, 0.0  ;;  %v3938_v41 = vadd.f32 %v3555_v24, %v605_v16 }
 0x146   : > { %700 = vadd.xlane.f32.xlu2 %v699_v51  ;;  %v972_v47 = vsub.f32 %v908_v44, %v940_v43  ;;  %v1452_v0 = vmul.f32 %v3821_v57, %v1416_v58  ;;  %v1417_v31 = vmul.f32 %v1385_v61, %v1101_v59  ;;  %v1386_v16 = vsub.f32 %v3606_v54, %v3810_v49 }
 0x147   : > { %v1105_v1 = vmul.f32 0.5, %v1104_v39  ;;  %v795_v52 = vmul.f32 %v3938_v41, %v3938_v41  ;;  %vm1118_vm4 = vweird.f32 %v3874_v12 }
 0x148   : > { %v1004_v3 = vmax.f32 %v972_v47, 0.0  ;;  %v1488_v18 = vadd.f32 %v3831_v62, %v1452_v0  ;;  %v1453_v37 = vmul.f32 %v3821_v57, %v1417_v31  ;;  %v635_v59 = vpop.f32.mrf.mxu3 }
 0x149   : > { %v662_v27 = vpop.xlane.xlu2 %661  ;;  %v1106_v32 = vsub.f32 1.5, %v1105_v1 }
 0x14a   : > { %v3917_v20 = vpop.eup %3196  ;;  %v3920_v42 = vmul.f32 %v3727_v13, %v662_v27  ;;  %v3922_v5 = vpop.f32.mrf.mxu0  ;;  %v3928_v7 = vadd.f32 1e-05, %v1004_v3  ;;  %v1520_v43 = vmax.f32 %v1488_v18, 0.0  ;;  %v3965_v18 = vadd.f32 %v3555_v24, %v635_v59 }
 0x14b   : > { %v1113_v46 = vmul.f32 %v3917_v20, %v3874_v12  ;;  %v829_v9 = vpop.xlane.xlu0 %828  ;;  %v1107_v28 = vmul.f32 %v3882_v22, %v1106_v32  ;;  %vm1119_vm3 = vweird.f32 %v3917_v20 }
 0x14c   : > { %v941_v30 = vmul.f32 %v3920_v42, %v3920_v42  ;;  %v909_v36 = vmul.f32 %v829_v9, %v3727_v13  ;;  %3198 = vrsqrt.f32 %v3928_v7  ;;  %3047 = vmatmul.msk.f32.gmra.mxu1 %vm638_vm1, %v1520_v43  ;;  %v869_v9 = vsel %vm638_vm1, %v795_v52, 0.0  ;;  %vm3972_vm5 = vmor %vm1118_vm4, %vm1119_vm3 }
 0x14d   : > { %v1114_v38 = vmul.f32 %v3917_v20, %v1113_v46  ;;  %v1111_v11 = vsel %vm3941_vm2, %v3882_v22, %v1107_v28  ;;  %v1489_v22 = vadd.f32 %v3831_v62, %v1453_v37  ;;  %v1387_v43 = vsub.f32 %v3616_v60, %v3844_v23 }
 0x14e   : > { %v973_v45 = vsub.f32 %v909_v36, %v941_v30  ;;  %894 = vadd.xlane.f32.xlu2 %v893_v26  ;;  %v1418_v3 = vmul.f32 %v1386_v16, %v1111_v11  ;;  %vm1128_vm7 = vweird.f32 %v3928_v7 }
 0x14f   : > { %v1115_v51 = vmul.f32 0.5, %v1114_v38  ;;  %v1521_v30 = vmax.f32 %v1489_v22, 0.0 }
 0x150   : > { %v1005_v39 = vmax.f32 %v973_v45, 0.0  ;;  %v1454_v36 = vmul.f32 %v3821_v57, %v1418_v3 }
 0x151   : > { %v1116_v58 = vsub.f32 1.5, %v1115_v51  ;;  %v665_v47 = vpop.xlane.xlu1 %664  ;;  %v732_v51 = vsel %vm638_vm1, %v3965_v18, 0.0 }
 0x152   : > { %v3954_v61 = vadd.f32 1e-05, %v1005_v39  ;;  %v3957_v1 = vmul.f32 %v3727_v13, %v665_v47  ;;  %v611_v0 = vpop.f32.mrf.mxu0  ;;  %v3199_v27 = vpop.eup %3198 }
 0x153   : > { %v1117_v54 = vmul.f32 %v3917_v20, %v1116_v58  ;;  %v832_v49 = vpop.xlane.xlu2 %831  ;;  %v1123_v32 = vmul.f32 %v3199_v27, %v3928_v7  ;;  %vm1129_vm6 = vweird.f32 %v3199_v27 }
 0x154   : > { %3200 = vrsqrt.f32 %v3954_v61  ;;  %v942_v31 = vmul.f32 %v3957_v1, %v3957_v1  ;;  %v910_v46 = vmul.f32 %v832_v49, %v3727_v13  ;;  %3048 = vmatmul.msk.f32.gmra.mxu1 %vm638_vm1, %v1521_v30  ;;  %vm4004_vm8 = vmor %vm1128_vm7, %vm1129_vm6  ;;  %vm1138_vm10 = vweird.f32 %v3954_v61 }
 0x155   : > { %v1124_v28 = vmul.f32 %v3199_v27, %v1123_v32  ;;  %v1121_v12 = vsel %vm3972_vm5, %v3917_v20, %v1117_v54  ;;  %v1490_v20 = vadd.f32 %v3831_v62, %v1454_v36 }
 0x156   : > { %870 = vadd.xlane.f32.xlu2 %v869_v9  ;;  %v974_v38 = vsub.f32 %v910_v46, %v942_v31  ;;  %v1419_v47 = vmul.f32 %v1387_v43, %v1121_v12  ;;  %v4018_v12 = vadd.f32 %v3555_v24, %v611_v0 }
 0x157   : > { %v1125_v44 = vmul.f32 0.5, %v1124_v28  ;;  %v1522_v46 = vmax.f32 %v1490_v20, 0.0  ;;  %v1388_v28 = vsub.f32 %v3626_v2, %v3877_v34 }
 0x158   : > { %v1006_v45 = vmax.f32 %v974_v38, 0.0  ;;  %v1455_v7 = vmul.f32 %v3821_v57, %v1419_v47 }
 0x159   : > { %v668_v37 = vpop.xlane.xlu0 %667  ;;  %v1126_v16 = vsub.f32 1.5, %v1125_v44 }
 0x15a   : > { %v3985_v11 = vpop.eup %3200  ;;  %v3988_v39 = vmul.f32 %v3727_v13, %v668_v37  ;;  %v614_v58 = vpop.f32.mrf.mxu0  ;;  %v3993_v23 = vadd.f32 1e-05, %v1006_v45 }
 0x15b   : > { %v1133_v60 = vmul.f32 %v3985_v11, %v3954_v61  ;;  %v3996_v52 = vadd.f32 %v3555_v24, %v614_v58  ;;  %v716_v59 = vpop.xlane.xlu2 %715  ;;  %v835_v22 = vpop.xlane.xlu1 %834  ;;  %v1127_v3 = vmul.f32 %v3199_v27, %v1126_v16  ;;  %vm1139_vm9 = vweird.f32 %v3985_v11 }
 0x15c   : > { %v943_v54 = vmul.f32 %v3988_v39, %v3988_v39  ;;  %3202 = vrsqrt.f32 %v3993_v23  ;;  %v911_v32 = vmul.f32 %v835_v22, %v3727_v13  ;;  %3049 = vmatmul.msk.f32.gmra.mxu1 %vm638_vm1, %v1522_v46  ;;  %v4023_v45 = vmul.f32 %v3727_v13, %v716_v59  ;;  %vm4050_vm11 = vmor %vm1138_vm10, %vm1139_vm9 }
 0x15d   : > { %v1134_v49 = vmul.f32 %v3985_v11, %v1133_v60  ;;  %v711_v9 = vsel %vm638_vm1, %v3996_v52, 0.0  ;;  %v798_v26 = vmul.f32 %v3996_v52, %v3996_v52  ;;  %v1131_v38 = vsel %vm4004_vm8, %v3199_v27, %v1127_v3 }
 0x15e   : > { %733 = vadd.xlane.f32.xlu2 %v732_v51  ;;  %v975_v36 = vsub.f32 %v911_v32, %v943_v54  ;;  %712 = vadd.xlane.f32.xlu1 %v711_v9  ;;  %v1420_v34 = vmul.f32 %v1388_v28, %v1131_v38  ;;  %v1491_v51 = vadd.f32 %v3831_v62, %v1455_v7  ;;  %v708_v54 = vsel %vm638_vm1, %v4018_v12, 0.0 }
 0x15f   : > { %v1135_v30 = vmul.f32 0.5, %v1134_v49  ;;  %v878_v43 = vsel %vm638_vm1, %v798_v26, 0.0  ;;  %v791_v27 = vmul.f32 %v3770_v53, %v3770_v53  ;;  %v959_v58 = vmul.f32 %v4023_v45, %v4023_v45 }
 0x160   : > { %v1007_v37 = vmax.f32 %v975_v36, 0.0  ;;  %879 = vadd.xlane.f32.xlu0 %v878_v43  ;;  %v4040_v59 = vadd.f32 %v3555_v24, %v3788_v10  ;;  %v1456_v49 = vmul.f32 %v3821_v57, %v1420_v34  ;;  %v1523_v31 = vmax.f32 %v1491_v51, 0.0 }
 0x161   : > { %v1136_v44 = vsub.f32 1.5, %v1135_v30  ;;  %v4025_v2 = vpop.xlane.xlu0 %718  ;;  %v857_v46 = vsel %vm638_vm1, %v791_v27, 0.0  ;;  %v1389_v7 = vsub.f32 %v3636_v8, %v3920_v42  ;;  %v693_v30 = vsel %vm638_vm1, %v3795_v25, 0.0 }
 0x162   : > { %v4030_v0 = vpop.eup %3202  ;;  %v4036_v20 = vadd.f32 1e-05, %v1007_v37  ;;  %v1492_v43 = vadd.f32 %v3831_v62, %v1456_v49  ;;  %v4078_v51 = vadd.f32 %v3555_v24, %v3812_v50  ;;  %vm1148_vm13 = vweird.f32 %v3993_v23 }
 0x163   : > { %v1137_v16 = vmul.f32 %v3985_v11, %v1136_v44  ;;  %v671_v47 = vpop.xlane.xlu2 %670  ;;  %v883_v60 = vpop.xlane.xlu1 %882  ;;  %v1143_v22 = vmul.f32 %v4030_v0, %v3993_v23  ;;  %vm1149_vm12 = vweird.f32 %v4030_v0  ;;  %v801_v44 = vmul.f32 %v4040_v59, %v4040_v59 }
 0x164   : > { %3204 = vrsqrt.f32 %v4036_v20  ;;  %v927_v3 = vmul.f32 %v883_v60, %v3727_v13  ;;  %v4056_v61 = vmul.f32 %v3727_v13, %v671_v47  ;;  %3050 = vmatmul.msk.f32.gmra.mxu1 %vm638_vm1, %v1523_v31  ;;  %vm4090_vm14 = vmor %vm1148_vm13, %vm1149_vm12  ;;  %vm1158_vm0 = vweird.f32 %v4036_v20 }
 0x165   : > { %v1144_v10 = vmul.f32 %v4030_v0, %v1143_v22  ;;  %v1141_v26 = vsel %vm4050_vm11, %v3985_v11, %v1137_v16  ;;  %v887_v49 = vsel %vm638_vm1, %v801_v44, 0.0 }
 0x166   : > { %709 = vadd.xlane.f32.xlu2 %v708_v54  ;;  %v991_v9 = vsub.f32 %v927_v3, %v959_v58  ;;  %858 = vadd.xlane.f32.xlu1 %v857_v46  ;;  %v944_v8 = vmul.f32 %v4056_v61, %v4056_v61  ;;  %v1421_v37 = vmul.f32 %v1389_v7, %v1141_v26  ;;  %v720_v58 = vsel %vm638_vm1, %v4040_v59, 0.0 }
 0x167   : > { %v1145_v28 = vmul.f32 0.5, %v1144_v10  ;;  %v1524_v54 = vmax.f32 %v1492_v43, 0.0  ;;  %v1390_v46 = vsub.f32 %v3646_v15, %v3957_v1 }
 0x168   : > { %v1023_v36 = vmax.f32 %v991_v9, 0.0  ;;  %694 = vadd.xlane.f32.xlu0 %v693_v30  ;;  %v1457_v10 = vmul.f32 %v3821_v57, %v1421_v37 }
 0x169   : > { %v838_v38 = vpop.xlane.xlu0 %837  ;;  %v1146_v11 = vsub.f32 1.5, %v1145_v28 }
 0x16a   : > { %v912_v42 = vmul.f32 %v838_v38, %v3727_v13  ;;  %v4074_v34 = vpop.eup %3204  ;;  %v4080_v27 = vadd.f32 1e-05, %v1023_v36  ;;  %v1493_v1 = vadd.f32 %v3831_v62, %v1457_v10 }
 0x16b   : > { %v674_v16 = vpop.xlane.xlu1 %673  ;;  %v1147_v47 = vmul.f32 %v4030_v0, %v1146_v11  ;;  %v1153_v60 = vmul.f32 %v4074_v34, %v4036_v20  ;;  %v841_v3 = vpop.xlane.xlu2 %840  ;;  %vm1159_vm15 = vweird.f32 %v4074_v34  ;;  %v1391_v20 = vsub.f32 %v3658_v21, %v3988_v39 }
 0x16c   : > { %v976_v22 = vsub.f32 %v912_v42, %v944_v8  ;;  %3206 = vrsqrt.f32 %v4080_v27  ;;  %v4096_v50 = vmul.f32 %v3727_v13, %v674_v16  ;;  %v913_v9 = vmul.f32 %v841_v3, %v3727_v13  ;;  %3051 = vmatmul.msk.f32.gmra.mxu1 %vm638_vm1, %v1524_v54  ;;  %vm4129_vm2 = vmor %vm1158_vm0, %vm1159_vm15 }
 0x16d   : > { %v1154_v23 = vmul.f32 %v4074_v34, %v1153_v60  ;;  %v1151_v31 = vsel %vm4090_vm14, %v4030_v0, %v1147_v47  ;;  %v793_v0 = vmul.f32 %v4078_v51, %v4078_v51  ;;  %v1525_v24 = vmax.f32 %v1493_v1, 0.0 }
 0x16e   : > { %v1008_v32 = vmax.f32 %v976_v22, 0.0  ;;  %v945_v26 = vmul.f32 %v4096_v50, %v4096_v50  ;;  %721 = vadd.xlane.f32.xlu1 %v720_v58  ;;  %v1422_v38 = vmul.f32 %v1390_v46, %v1151_v31  ;;  %v696_v54 = vsel %vm638_vm1, %v4078_v51, 0.0 }
 0x16f   : > { %v1155_v7 = vmul.f32 0.5, %v1154_v23  ;;  %vm1318_vm3 = vweird.f32 %v4080_v27  ;;  %v802_v46 = vmul.f32 %v3834_v6, %v3834_v6 }
 0x170   : > { %v4109_v28 = vadd.f32 1e-05, %v1008_v32  ;;  %v977_v30 = vsub.f32 %v913_v9, %v945_v26  ;;  %888 = vadd.xlane.f32.xlu0 %v887_v49  ;;  %v1458_v60 = vmul.f32 %v3821_v57, %v1422_v38  ;;  %v863_v49 = vsel %vm638_vm1, %v793_v0, 0.0 }
 0x171   : > { %v677_v36 = vpop.xlane.xlu0 %676  ;;  %v1156_v43 = vsub.f32 1.5, %v1155_v7 }
 0x172   : > { %3208 = vrsqrt.f32 %v4109_v28  ;;  %v4116_v15 = vmul.f32 %v3727_v13, %v677_v36  ;;  %v3207_v44 = vpop.eup %3206  ;;  %v1009_v11 = vmax.f32 %v977_v30, 0.0  ;;  %v1494_v26 = vadd.f32 %v3831_v62, %v1458_v60 }
 0x173   : > { %v844_v8 = vpop.xlane.xlu1 %843  ;;  %v1157_v42 = vmul.f32 %v4074_v34, %v1156_v43  ;;  %v1313_v37 = vmul.f32 %v3207_v44, %v4080_v27  ;;  %vm1319_vm4 = vweird.f32 %v3207_v44  ;;  %v1407_v27 = vsub.f32 %v3655_v19, %v4023_v45 }
 0x174   : > { %v946_v16 = vmul.f32 %v4116_v15, %v4116_v15  ;;  %v4125_v58 = vadd.f32 1e-05, %v1009_v11  ;;  %v914_v47 = vmul.f32 %v844_v8, %v3727_v13  ;;  %3052 = vmatmul.msk.f32.gmra.mxu1 %vm638_vm1, %v1525_v24  ;;  %vm4156_vm5 = vmor %vm1318_vm3, %vm1319_vm4  ;;  %v1526_v19 = vmax.f32 %v1494_v26, 0.0 }
 0x175   : > { %v1314_v3 = vmul.f32 %v3207_v44, %v1313_v37  ;;  %v1161_v32 = vsel %vm4129_vm2, %v4074_v34, %v1157_v42  ;;  %v890_v42 = vsel %vm638_vm1, %v802_v46, 0.0  ;;  %v726_v45 = vsel %vm638_vm1, %v3880_v17, 0.0 }
 0x176   : > { %3210 = vrsqrt.f32 %v4125_v58  ;;  %v978_v23 = vsub.f32 %v914_v47, %v946_v16  ;;  %697 = vadd.xlane.f32.xlu1 %v696_v54  ;;  %v1423_v30 = vmul.f32 %v1391_v20, %v1161_v32  ;;  %v794_v54 = vmul.f32 %v3867_v4, %v3867_v4 }
 0x177   : > { %v1315_v31 = vmul.f32 0.5, %v1314_v3  ;;  %vm1168_vm7 = vweird.f32 %v4109_v28  ;;  %vm1178_vm10 = vweird.f32 %v4125_v58 }
 0x178   : > { %v4142_v10 = vpop.eup %3208  ;;  %v1010_v39 = vmax.f32 %v978_v23, 0.0  ;;  %864 = vadd.xlane.f32.xlu0 %v863_v49  ;;  %v1459_v22 = vmul.f32 %v3821_v57, %v1423_v30  ;;  %v866_v30 = vsel %vm638_vm1, %v794_v54, 0.0 }
 0x179   : > { %v1163_v21 = vmul.f32 %v4142_v10, %v4109_v28  ;;  %v680_v9 = vpop.xlane.xlu2 %679  ;;  %v1316_v34 = vsub.f32 1.5, %v1315_v31  ;;  %vm1169_vm6 = vweird.f32 %v4142_v10 }
 0x17a   : > { %v4152_v7 = vmul.f32 %v3727_v13, %v680_v9  ;;  %v4161_v38 = vadd.f32 1e-05, %v1010_v39  ;;  %vm4182_vm8 = vmor %vm1168_vm7, %vm1169_vm6  ;;  %v1495_v9 = vadd.f32 %v3831_v62, %v1459_v22 }
 0x17b   : > { %v1164_v0 = vmul.f32 %v4142_v10, %v1163_v21  ;;  %v847_v43 = vpop.xlane.xlu0 %846  ;;  %v1317_v1 = vmul.f32 %v3207_v44, %v1316_v34  ;;  %v1392_v34 = vsub.f32 %v3673_v33, %v4056_v61 }
 0x17c   : > { %v947_v11 = vmul.f32 %v4152_v7, %v4152_v7  ;;  %v915_v8 = vmul.f32 %v847_v43, %v3727_v13  ;;  %v3211_v37 = vpop.eup %3210  ;;  %3212 = vrsqrt.f32 %v4161_v38  ;;  %3053 = vmatmul.msk.f32.gmra.mxu1 %vm638_vm1, %v1526_v19  ;;  %v3314_v43 = vld [vmem:[%s5766_s2] ss:$0 sm:$0xff]  ;;  %v702_v19 = vsel %vm638_vm1, %v3938_v41, 0.0 }
 0x17d   : > { %v1165_v16 = vmul.f32 0.5, %v1164_v0  ;;  %v1173_v47 = vmul.f32 %v3211_v37, %v4125_v58  ;;  %v1321_v3 = vsel %vm4156_vm5, %v3207_v44, %v1317_v1  ;;  %vm1179_vm9 = vweird.f32 %v3211_v37 }
 0x17e   : > { %v979_v60 = vsub.f32 %v915_v8, %v947_v11  ;;  %891 = vadd.xlane.f32.xlu1 %v890_v42  ;;  %v4177_v49 = vmul.f32 %v1407_v27, %v1321_v3  ;;  %v4207_v33 = vadd.f32 %v3314_v43, %v3908_v56  ;;  %v1527_v8 = vmax.f32 %v1495_v9, 0.0  ;;  %vm1180_vm11 = vmor %vm1178_vm10, %vm1179_vm9 }
 0x17f   : > { %v1166_v24 = vsub.f32 1.5, %v1165_v16  ;;  %v1174_v20 = vmul.f32 %v3211_v37, %v1173_v47  ;;  %v1393_v58 = vsub.f32 %v3683_v40, %v4096_v50  ;;  %vm1188_vm13 = vweird.f32 %v4161_v38 }
 0x180   : > { %v1011_v23 = vmax.f32 %v979_v60, 0.0  ;;  %727 = vadd.xlane.f32.xlu0 %v726_v45  ;;  %v804_v3 = vmul.f32 %v4207_v33, %v4207_v33  ;;  %v729_v9 = vsel %vm638_vm1, %v4207_v33, 0.0 }
 0x181   : > { %v1167_v32 = vmul.f32 %v4142_v10, %v1166_v24  ;;  %v683_v31 = vpop.xlane.xlu1 %682  ;;  %v1175_v46 = vmul.f32 0.5, %v1174_v20 }
 0x182   : > { %v4186_v21 = vadd.f32 1e-05, %v1011_v23  ;;  %v4189_v39 = vmul.f32 %v3727_v13, %v683_v31  ;;  %v4192_v26 = vpop.eup %3212 }
 0x183   : > { %v850_v28 = vpop.xlane.xlu2 %849  ;;  %v1171_v27 = vsel %vm4182_vm8, %v4142_v10, %v1167_v32  ;;  %v1176_v36 = vsub.f32 1.5, %v1175_v46  ;;  %v1183_v0 = vmul.f32 %v4192_v26, %v4161_v38  ;;  %vm1189_vm12 = vweird.f32 %v4192_v26 }
 0x184   : > { %3214 = vrsqrt.f32 %v4186_v21  ;;  %v948_v61 = vmul.f32 %v4189_v39, %v4189_v39  ;;  %v916_v10 = vmul.f32 %v850_v28, %v3727_v13  ;;  %v1424_v42 = vmul.f32 %v1392_v34, %v1171_v27  ;;  %3054 = vmatmul.msk.f32.gmra.mxu1 %vm638_vm1, %v1527_v8  ;;  %vm4242_vm14 = vmor %vm1188_vm13, %vm1189_vm12 }
 0x185   : > { %v1177_v1 = vmul.f32 %v3211_v37, %v1176_v36  ;;  %v1184_v11 = vmul.f32 %v4192_v26, %v1183_v0  ;;  %v896_v36 = vsel %vm638_vm1, %v804_v3, 0.0  ;;  %vm1198_vm0 = vweird.f32 %v4186_v21 }
 0x186   : > { %v980_v16 = vsub.f32 %v916_v10, %v948_v61  ;;  %867 = vadd.xlane.f32.xlu1 %v866_v30  ;;  %v1460_v47 = vmul.f32 %v3821_v57, %v1424_v42  ;;  %v4252_v10 = vadd.f32 %v3314_v43, %v3922_v5 }
 0x187   : > { %v1181_v56 = vsel %vm1180_vm11, %v3211_v37, %v1177_v1  ;;  %v1185_v45 = vmul.f32 0.5, %v1184_v11  ;;  %v1394_v1 = vsub.f32 %v3692_v48, %v4116_v15 }
 0x188   : > { %v1012_v60 = vmax.f32 %v980_v16, 0.0  ;;  %703 = vadd.xlane.f32.xlu0 %v702_v19  ;;  %v1425_v54 = vmul.f32 %v1393_v58, %v1181_v56  ;;  %v1496_v40 = vadd.f32 %v3831_v62, %v1460_v47  ;;  %v796_v15 = vmul.f32 %v4252_v10, %v4252_v10 }
 0x189   : > { %v686_v22 = vpop.xlane.xlu0 %685  ;;  %v1186_v20 = vsub.f32 1.5, %v1185_v45 }
 0x18a   : > { %v4222_v24 = vpop.eup %3214  ;;  %v4225_v37 = vmul.f32 %v3727_v13, %v686_v22  ;;  %v4231_v23 = vadd.f32 1e-05, %v1012_v60  ;;  %v1528_v28 = vmax.f32 %v1496_v40, 0.0  ;;  %v1461_v0 = vmul.f32 %v3821_v57, %v1425_v54 }
 0x18b   : > { %v1193_v50 = vmul.f32 %v4222_v24, %v4186_v21  ;;  %v853_v32 = vpop.xlane.xlu2 %852  ;;  %v1187_v31 = vmul.f32 %v4192_v26, %v1186_v20  ;;  %vm1199_vm15 = vweird.f32 %v4222_v24  ;;  %v705_v54 = vsel %vm638_vm1, %v4252_v10, 0.0 }
 0x18c   : > { %v949_v44 = vmul.f32 %v4225_v37, %v4225_v37  ;;  %v917_v46 = vmul.f32 %v853_v32, %v3727_v13  ;;  %3216 = vrsqrt.f32 %v4231_v23  ;;  %3055 = vmatmul.msk.f32.gmra.mxu1 %vm638_vm1, %v1528_v28  ;;  %v1497_v56 = vadd.f32 %v3831_v62, %v1461_v0  ;;  %vm4270_vm2 = vmor %vm1198_vm0, %vm1199_vm15 }
 0x18d   : > { %v1194_v34 = vmul.f32 %v4222_v24, %v1193_v50  ;;  %v1191_v38 = vsel %vm4242_vm14, %v4192_v26, %v1187_v31  ;;  %v1395_v50 = vsub.f32 %v3700_v55, %v4152_v7  ;;  %v872_v31 = vsel %vm638_vm1, %v796_v15, 0.0 }
 0x18e   : > { %v981_v27 = vsub.f32 %v917_v46, %v949_v44  ;;  %730 = vadd.xlane.f32.xlu1 %v729_v9  ;;  %v1426_v58 = vmul.f32 %v1394_v1, %v1191_v38  ;;  %v1529_v3 = vmax.f32 %v1497_v56, 0.0  ;;  %v805_v44 = vmul.f32 %v3965_v18, %v3965_v18 }
 0x18f   : > { %v1195_v61 = vmul.f32 0.5, %v1194_v34  ;;  %v797_v7 = vmul.f32 %v4018_v12, %v4018_v12  ;;  %vm1208_vm4 = vweird.f32 %v4231_v23 }
 0x190   : > { %v1013_v11 = vmax.f32 %v981_v27, 0.0  ;;  %897 = vadd.xlane.f32.xlu0 %v896_v36  ;;  %v1462_v20 = vmul.f32 %v3821_v57, %v1426_v58  ;;  %v899_v55 = vsel %vm638_vm1, %v805_v44, 0.0 }
 0x191   : > { %v1196_v8 = vsub.f32 1.5, %v1195_v61  ;;  %v689_v42 = vpop.xlane.xlu1 %688 }
 0x192   : > { %v1045_v16 = vadd.f32 1e-05, %v1013_v11  ;;  %v4258_v19 = vmul.f32 %v3727_v13, %v689_v42  ;;  %v3217_v26 = vpop.eup %3216  ;;  %v1498_v28 = vadd.f32 %v3831_v62, %v1462_v20  ;;  %v875_v42 = vsel %vm638_vm1, %v797_v7, 0.0 }
 0x193   : > { %v1197_v5 = vmul.f32 %v4222_v24, %v1196_v8  ;;  %v856_v43 = vpop.xlane.xlu0 %855  ;;  %v1203_v48 = vmul.f32 %v3217_v26, %v4231_v23  ;;  %vm1209_vm3 = vweird.f32 %v3217_v26  ;;  %v1396_v8 = vsub.f32 %v3708_v63, %v4189_v39 }
 0x194   : > { %3218 = vrsqrt.f32 %v1045_v16  ;;  %v950_v45 = vmul.f32 %v4258_v19, %v4258_v19  ;;  %v918_v47 = vmul.f32 %v856_v43, %v3727_v13  ;;  %3056 = vmatmul.msk.f32.gmra.mxu1 %vm638_vm1, %v1529_v3  ;;  %vm1210_vm5 = vmor %vm1208_vm4, %vm1209_vm3  ;;  %v1530_v61 = vmax.f32 %v1498_v28, 0.0 }
 0x195   : > { %v1204_v22 = vmul.f32 %v3217_v26, %v1203_v48  ;;  %v1201_v21 = vsel %vm4270_vm2, %v4222_v24, %v1197_v5  ;;  %vm1218_vm7 = vweird.f32 %v1045_v16 }
 0x196   : > { %v982_v40 = vsub.f32 %v918_v47, %v950_v45  ;;  %706 = vadd.xlane.f32.xlu1 %v705_v54  ;;  %v1427_v30 = vmul.f32 %v1395_v50, %v1201_v21  ;;  %v1397_v47 = vsub.f32 %v3730_v14, %v4225_v37 }
 0x197   : > { %v1205_v32 = vmul.f32 0.5, %v1204_v22 }
 0x198   : > { %v1014_v46 = vmax.f32 %v982_v40, 0.0  ;;  %873 = vadd.xlane.f32.xlu0 %v872_v31  ;;  %v1463_v38 = vmul.f32 %v3821_v57, %v1427_v30  ;;  %v4311_v31 = vmul.f32 %v3727_v13, %v4025_v2 }
 0x199   : > { %v1206_v34 = vsub.f32 1.5, %v1205_v32  ;;  %v4297_v15 = vpop.xlane.xlu2 %691  ;;  %v1398_v32 = vsub.f32 %v3753_v35, %v4258_v19  ;;  %v4323_v19 = vld [vmem:[%s5770_s6] ss:$0 sm:$0xff] }
 0x19a   : > { %v3219_v9 = vpop.eup %3218  ;;  %v1046_v27 = vadd.f32 1e-05, %v1014_v46  ;;  %v1499_v23 = vadd.f32 %v3831_v62, %v1463_v38 }
 0x19b   : > { %v1213_v24 = vmul.f32 %v3219_v9, %v1045_v16  ;;  %v1207_v36 = vmul.f32 %v3217_v26, %v1206_v34  ;;  %vm1219_vm6 = vweird.f32 %v3219_v9 }
 0x19c   : > { %3220 = vrsqrt.f32 %v1046_v27  ;;  %3057 = vmatmul.msk.f32.gmra.mxu1 %vm638_vm1, %v1530_v61  ;;  %vm1220_vm8 = vmor %vm1218_vm7, %vm1219_vm6  ;;  %v1531_v45 = vmax.f32 %v1499_v23, 0.0  ;;  %vm1228_vm10 = vweird.f32 %v1046_v27 }
 0x19d   : > { %v1214_v0 = vmul.f32 %v3219_v9, %v1213_v24  ;;  %v1211_v11 = vsel %vm1210_vm5, %v3217_v26, %v1207_v36 }
 0x19e   : > { %900 = vadd.xlane.f32.xlu1 %v899_v55  ;;  %v1428_v58 = vmul.f32 %v1396_v8, %v1211_v11 }
 0x19f   : > { %v1215_v1 = vmul.f32 0.5, %v1214_v0 }
 0x1a0   : > { %876 = vadd.xlane.f32.xlu0 %v875_v42  ;;  %v1464_v63 = vmul.f32 %v3821_v57, %v1428_v58 }
 0x1a1   : > { %v1216_v56 = vsub.f32 1.5, %v1215_v1  ;;  %v886_v21 = vpop.xlane.xlu2 %885 }
 0x1a2   : > { %v3221_v5 = vpop.eup %3220  ;;  %v1500_v3 = vadd.f32 %v3831_v62, %v1464_v63  ;;  %v928_v34 = vmul.f32 %v886_v21, %v3727_v13 }
 0x1a3   : > { %v1217_v43 = vmul.f32 %v3219_v9, %v1216_v56  ;;  %v1223_v48 = vmul.f32 %v3221_v5, %v1046_v27  ;;  %vm1229_vm9 = vweird.f32 %v3221_v5 }
 0x1a4   : > { %3058 = vmatmul.msk.f32.gmra.mxu1 %vm638_vm1, %v1531_v45  ;;  %vm1230_vm11 = vmor %vm1228_vm10, %vm1229_vm9  ;;  %v1532_v20 = vmax.f32 %v1500_v3, 0.0 }
 0x1a5   : > { %v1224_v26 = vmul.f32 %v3221_v5, %v1223_v48  ;;  %v1221_v39 = vsel %vm1220_vm8, %v3219_v9, %v1217_v43  ;;  %v960_v9 = vmul.f32 %v4311_v31, %v4311_v31 }
 0x1a6   : > { %v1429_v54 = vmul.f32 %v1397_v47, %v1221_v39 }
 0x1a7   : > { %v1225_v60 = vmul.f32 0.5, %v1224_v26  ;;  %v992_v28 = vsub.f32 %v928_v34, %v960_v9 }
 0x1a8   : > { %v1465_v40 = vmul.f32 %v3821_v57, %v1429_v54 }
 0x1a9   : > { %v1226_v22 = vsub.f32 1.5, %v1225_v60  ;;  %v4318_v35 = vpop.xlane.xlu2 %861  ;;  %v1024_v27 = vmax.f32 %v992_v28, 0.0 }
 0x1aa   : > { %v1501_v14 = vadd.f32 %v3831_v62, %v1465_v40 }
 0x1ab   : > { %v1227_v16 = vmul.f32 %v3221_v5, %v1226_v22  ;;  %v4335_v0 = vadd.f32 1e-05, %v1024_v27 }
 0x1ac   : > { %3059 = vmatmul.msk.f32.gmra.mxu1 %vm638_vm1, %v1532_v20  ;;  %v1533_v44 = vmax.f32 %v1501_v14, 0.0 }
 0x1ad   : > { %v1231_v50 = vsel %vm1230_vm11, %v3221_v5, %v1227_v16  ;;  %3222 = vrsqrt.f32 %v4335_v0  ;;  %v4374_v16 = vmul.f32 %v3727_v13, %v4297_v15  ;;  %vm1328_vm13 = vweird.f32 %v4335_v0 }
 0x1ae   : > { %v1430_v37 = vmul.f32 %v1398_v32, %v1231_v50 }
 0x1b0   : > { %v1466_v46 = vmul.f32 %v3821_v57, %v1430_v37 }
 0x1b2   : > { %v1502_v2 = vadd.f32 %v3831_v62, %v1466_v46  ;;  %v4337_v62 = vpop.xlane.xlu2 %724  ;;  %v951_v46 = vmul.f32 %v4374_v16, %v4374_v16 }
 0x1b3   : > { %v4348_v42 = vpop.eup %3222 }
 0x1b4   : > { %3060 = vmatmul.msk.f32.gmra.mxu1 %vm638_vm1, %v1533_v44  ;;  %v1534_v24 = vmax.f32 %v1502_v2, 0.0  ;;  %v1323_v5 = vmul.f32 %v4348_v42, %v4335_v0  ;;  %vm1329_vm12 = vweird.f32 %v4348_v42 }
 0x1b5   : > { %vm4418_vm14 = vmor %vm1328_vm13, %vm1329_vm12 }
 0x1b6   : > { %v1324_v39 = vmul.f32 %v4348_v42, %v1323_v5 }
 0x1b8   : > { %v1325_v21 = vmul.f32 0.5, %v1324_v39 }
 0x1b9   : > { %v1675_v30 = vpop.f32.mrf.mxu1 }
 0x1ba   : > { %v4327_v57 = vadd.f32 %v4323_v19, %v1675_v30  ;;  %v4350_v56 = vpop.xlane.xlu2 %700  ;;  %v1326_v34 = vsub.f32 1.5, %v1325_v21 }
 0x1bc   : > { %3061 = vmatmul.msk.f32.gmra.mxu1 %vm638_vm1, %v1534_v24  ;;  %v1771_v36 = vsel %vm638_vm1, %v4327_v57, 0.0  ;;  %v1899_v55 = vmul.f32 %v4327_v57, %v4327_v57 }
 0x1bd   : > { %1772 = vadd.xlane.f32.xlu1 %v1771_v36  ;;  %v920_v36 = vmul.f32 %v4318_v35, %v3727_v13  ;;  %v4412_v35 = vld [vmem:[%s5767_s3] ss:$0 sm:$0xff] }
 0x1be   : > { %v1931_v7 = vsel %vm638_vm1, %v1899_v55, 0.0 }
 0x1bf   : > { %1932 = vadd.xlane.f32.xlu2 %v1931_v7 }
 0x1c1   : > { %v1678_v61 = vpop.f32.mrf.mxu1 }
 0x1c2   : > { %v4340_v38 = vadd.f32 %v4323_v19, %v1678_v61  ;;  %v4376_v20 = vpop.xlane.xlu2 %894  ;;  %v1327_v61 = vmul.f32 %v4348_v42, %v1326_v34 }
 0x1c4   : > { %v1774_v1 = vsel %vm638_vm1, %v4340_v38, 0.0  ;;  %v1900_v11 = vmul.f32 %v4340_v38, %v4340_v38 }
 0x1c5   : > { %1775 = vadd.xlane.f32.xlu0 %v1774_v1 }
 0x1c6   : > { %v1934_v8 = vsel %vm638_vm1, %v1900_v11, 0.0 }
 0x1c7   : > { %1935 = vadd.xlane.f32.xlu1 %v1934_v8 }
 0x1c9   : > { %v1681_v23 = vpop.f32.mrf.mxu1 }
 0x1ca   : > { %v4353_v58 = vadd.f32 %v4323_v19, %v1681_v23  ;;  %v4405_v8 = vpop.xlane.xlu2 %870 }
 0x1cc   : > { %v1777_v43 = vsel %vm638_vm1, %v4353_v58, 0.0  ;;  %v1901_v48 = vmul.f32 %v4353_v58, %v4353_v58 }
 0x1cd   : > { %1778 = vadd.xlane.f32.xlu2 %v1777_v43  ;;  %v1475_v43 = vmul.f32 %v4412_v35, %v4177_v49  ;;  %v1408_v49 = vsub.f32 %v3668_v29, %v4311_v31 }
 0x1ce   : > { %v1937_v26 = vsel %vm638_vm1, %v1901_v48, 0.0 }
 0x1cf   : > { %1938 = vadd.xlane.f32.xlu0 %v1937_v26 }
 0x1d1   : > { %v713_v45 = vpop.xlane.xlu1 %712  ;;  %v1684_v22 = vpop.f32.mrf.mxu1 }
 0x1d2   : > { %v4363_v63 = vmul.f32 %v3727_v13, %v713_v45  ;;  %v4370_v54 = vadd.f32 %v4323_v19, %v1684_v22 }
 0x1d3   : > { %v880_v47 = vpop.xlane.xlu0 %879 }
 0x1d4   : > { %v958_v60 = vmul.f32 %v4363_v63, %v4363_v63  ;;  %v926_v3 = vmul.f32 %v880_v47, %v3727_v13  ;;  %v1780_v50 = vsel %vm638_vm1, %v4370_v54, 0.0  ;;  %v1902_v32 = vmul.f32 %v4370_v54, %v4370_v54 }
 0x1d5   : > { %1781 = vadd.xlane.f32.xlu1 %v1780_v50 }
 0x1d6   : > { %v990_v40 = vsub.f32 %v926_v3, %v958_v60  ;;  %v1940_v37 = vsel %vm638_vm1, %v1902_v32, 0.0  ;;  %v1331_v3 = vsel %vm4418_vm14, %v4348_v42, %v1327_v61 }
 0x1d7   : > { %1941 = vadd.xlane.f32.xlu2 %v1940_v37 }
 0x1d8   : > { %v1022_v14 = vmax.f32 %v990_v40, 0.0 }
 0x1d9   : > { %v859_v44 = vpop.xlane.xlu1 %858  ;;  %v1687_v30 = vpop.f32.mrf.mxu1 }
 0x1da   : > { %v4385_v15 = vadd.f32 1e-05, %v1022_v14  ;;  %v919_v9 = vmul.f32 %v859_v44, %v3727_v13  ;;  %v4393_v27 = vadd.f32 %v4323_v19, %v1687_v30  ;;  %v4440_v14 = vld [vmem:[%s5768_s4] ss:$0 sm:$0xff]  ;;  %v1440_v44 = vmul.f32 %v1408_v49, %v1331_v3 }
 0x1db   : > { %v695_v2 = vpop.xlane.xlu0 %694  ;;  %v4443_v29 = vadd.f32 %v4440_v14, %v1475_v43  ;;  %v1399_v30 = vsub.f32 %v3770_v53, %v4374_v16  ;;  %v734_v43 = vpop.xlane.xlu2 %733 }
 0x1dc   : > { %3224 = vrsqrt.f32 %v4385_v15  ;;  %v983_v28 = vsub.f32 %v919_v9, %v951_v46  ;;  %v4390_v24 = vmul.f32 %v3727_v13, %v695_v2  ;;  %v1783_v1 = vsel %vm638_vm1, %v4393_v27, 0.0 }
 0x1dd   : > { %v1903_v11 = vmul.f32 %v4393_v27, %v4393_v27  ;;  %1784 = vadd.xlane.f32.xlu0 %v1783_v1  ;;  %v4451_v46 = vmul.f32 %v3727_v13, %v4337_v62  ;;  %v1543_v62 = vmax.f32 %v4443_v29, 0.0  ;;  %vm1308_vm0 = vweird.f32 %v4385_v15 }
 0x1de   : > { %v1015_v55 = vmax.f32 %v983_v28, 0.0  ;;  %v952_v7 = vmul.f32 %v4390_v24, %v4390_v24 }
 0x1df   : > { %v1943_v48 = vsel %vm638_vm1, %v1903_v11, 0.0  ;;  %v1410_v39 = vsub.f32 %v3834_v6, %v4451_v46 }
 0x1e0   : > { %v4407_v23 = vadd.f32 1e-05, %v1015_v55  ;;  %v984_v5 = vsub.f32 %v920_v36, %v952_v7  ;;  %1944 = vadd.xlane.f32.xlu1 %v1943_v48  ;;  %v4463_v36 = vmul.f32 %v3727_v13, %v4350_v56 }
 0x1e1   : > { %v722_v26 = vpop.xlane.xlu1 %721  ;;  %v1690_v50 = vpop.f32.mrf.mxu1 }
 0x1e2   : > { %v3225_v45 = vpop.eup %3224  ;;  %3226 = vrsqrt.f32 %v4407_v23  ;;  %v1016_v47 = vmax.f32 %v984_v5, 0.0  ;;  %v4424_v60 = vmul.f32 %v3727_v13, %v722_v26  ;;  %v4446_v37 = vadd.f32 %v4323_v19, %v1690_v50 }
 0x1e3   : > { %v1303_v0 = vmul.f32 %v3225_v45, %v4385_v15  ;;  %v889_v22 = vpop.xlane.xlu0 %888  ;;  %vm1309_vm15 = vweird.f32 %v3225_v45  ;;  %v4471_v5 = vmul.f32 %v4451_v46, %v4451_v46  ;;  %v1476_v26 = vmul.f32 %v4412_v35, %v1440_v44 }
 0x1e4   : > { %v4432_v40 = vadd.f32 1e-05, %v1016_v47  ;;  %v961_v21 = vmul.f32 %v4424_v60, %v4424_v60  ;;  %v929_v32 = vmul.f32 %v889_v22, %v3727_v13  ;;  %v1786_v34 = vsel %vm638_vm1, %v4446_v37, 0.0  ;;  %vm1310_vm2 = vmor %vm1308_vm0, %vm1309_vm15 }
 0x1e5   : > { %v1304_v31 = vmul.f32 %v3225_v45, %v1303_v0  ;;  %v1904_v2 = vmul.f32 %v4446_v37, %v4446_v37  ;;  %1787 = vadd.xlane.f32.xlu2 %v1786_v34  ;;  %v4487_v3 = vmul.f32 %v4463_v36, %v4463_v36  ;;  %v4504_v34 = vadd.f32 %v4440_v14, %v1476_v26 }
 0x1e6   : > { %3228 = vrsqrt.f32 %v4432_v40  ;;  %v993_v42 = vsub.f32 %v929_v32, %v961_v21  ;;  %v1406_v21 = vsub.f32 %v3996_v52, %v4363_v63  ;;  %v1402_v32 = vsub.f32 %v3867_v4, %v4463_v36 }
 0x1e7   : > { %v1305_v9 = vmul.f32 0.5, %v1304_v31  ;;  %v1946_v1 = vsel %vm638_vm1, %v1904_v2, 0.0  ;;  %v931_v2 = vmul.f32 %v4376_v20, %v3727_v13  ;;  %vm1238_vm4 = vweird.f32 %v4407_v23 }
 0x1e8   : > { %v4457_v28 = vpop.eup %3226  ;;  %v1025_v55 = vmax.f32 %v993_v42, 0.0  ;;  %1947 = vadd.xlane.f32.xlu0 %v1946_v1  ;;  %vm1248_vm5 = vweird.f32 %v4432_v40 }
 0x1e9   : > { %v1306_v7 = vsub.f32 1.5, %v1305_v9  ;;  %v1233_v61 = vmul.f32 %v4457_v28, %v4407_v23  ;;  %v698_v11 = vpop.xlane.xlu1 %697  ;;  %v1693_v15 = vpop.f32.mrf.mxu1  ;;  %vm1239_vm3 = vweird.f32 %v4457_v28 }
 0x1ea   : > { %v4473_v48 = vadd.f32 1e-05, %v1025_v55  ;;  %v4476_v56 = vmul.f32 %v3727_v13, %v698_v11  ;;  %v4500_v9 = vadd.f32 %v4323_v19, %v1693_v15  ;;  %vm4520_vm6 = vmor %vm1238_vm4, %vm1239_vm3 }
 0x1eb   : > { %v1307_v47 = vmul.f32 %v3225_v45, %v1306_v7  ;;  %v1234_v49 = vmul.f32 %v4457_v28, %v1233_v61  ;;  %v865_v0 = vpop.xlane.xlu0 %864 }
 0x1ec   : > { %v4483_v22 = vpop.eup %3228  ;;  %3230 = vrsqrt.f32 %v4473_v48  ;;  %v953_v50 = vmul.f32 %v4476_v56, %v4476_v56  ;;  %v921_v52 = vmul.f32 %v865_v0, %v3727_v13  ;;  %v1789_v61 = vsel %vm638_vm1, %v4500_v9, 0.0 }
 0x1ed   : > { %v1311_v31 = vsel %vm1310_vm2, %v3225_v45, %v1307_v47  ;;  %v1235_v42 = vmul.f32 0.5, %v1234_v49  ;;  %v1243_v44 = vmul.f32 %v4483_v22, %v4432_v40  ;;  %v1905_v1 = vmul.f32 %v4500_v9, %v4500_v9  ;;  %1790 = vadd.xlane.f32.xlu1 %v1789_v61 }
 0x1ee   : > { %v1438_v63 = vmul.f32 %v1406_v21, %v1311_v31  ;;  %v985_v7 = vsub.f32 %v921_v52, %v953_v50  ;;  %vm1249_vm7 = vweird.f32 %v4483_v22  ;;  %v1400_v40 = vsub.f32 %v3795_v25, %v4390_v24 }
 0x1ef   : > { %v1236_v55 = vsub.f32 1.5, %v1235_v42  ;;  %v1244_v45 = vmul.f32 %v4483_v22, %v1243_v44  ;;  %v1949_v50 = vsel %vm638_vm1, %v1905_v1, 0.0  ;;  %vm4554_vm8 = vmor %vm1248_vm5, %vm1249_vm7  ;;  %v1544_v24 = vmax.f32 %v4504_v34, 0.0 }
 0x1f0   : > { %v1474_v11 = vmul.f32 %v4412_v35, %v1438_v63  ;;  %v1017_v21 = vmax.f32 %v985_v7, 0.0  ;;  %1950 = vadd.xlane.f32.xlu2 %v1949_v50  ;;  %v710_v63 = vpop.xlane.xlu2 %709  ;;  %vm1338_vm9 = vweird.f32 %v4473_v48 }
 0x1f1   : > { %v1237_v26 = vmul.f32 %v4457_v28, %v1236_v55  ;;  %v1245_v47 = vmul.f32 0.5, %v1244_v45  ;;  %v892_v20 = vpop.xlane.xlu1 %891  ;;  %v1696_v7 = vpop.f32.mrf.mxu1  ;;  %v4563_v53 = vmul.f32 %v3727_v13, %v710_v63 }
 0x1f2   : > { %v4518_v49 = vpop.eup %3230  ;;  %v930_v15 = vmul.f32 %v892_v20, %v3727_v13  ;;  %v1510_v31 = vadd.f32 %v4440_v14, %v1474_v11  ;;  %v4533_v55 = vadd.f32 1e-05, %v1017_v21  ;;  %v4542_v20 = vadd.f32 %v4323_v19, %v1696_v7 }
 0x1f3   : > { %v1246_v42 = vsub.f32 1.5, %v1245_v47  ;;  %v1333_v23 = vmul.f32 %v4518_v49, %v4473_v48  ;;  %v728_v44 = vpop.xlane.xlu0 %727  ;;  %v1241_v52 = vsel %vm4520_vm6, %v4457_v28, %v1237_v26  ;;  %v4548_v26 = vmul.f32 %v3727_v13, %v734_v43 }
 0x1f4   : > { %v994_v45 = vsub.f32 %v930_v15, %v4471_v5  ;;  %v4537_v61 = vmul.f32 %v3727_v13, %v728_v44  ;;  %v1542_v1 = vmax.f32 %v1510_v31, 0.0  ;;  %v1431_v28 = vmul.f32 %v1399_v30, %v1241_v52 }
 0x1f5   : > { %v1247_v11 = vmul.f32 %v4483_v22, %v1246_v42  ;;  %v1334_v47 = vmul.f32 %v4518_v49, %v1333_v23  ;;  %3232 = vrsqrt.f32 %v4533_v55  ;;  %v1792_v30 = vsel %vm638_vm1, %v4542_v20, 0.0 }
 0x1f6   : > { %v1026_v0 = vmax.f32 %v994_v45, 0.0  ;;  %v963_v21 = vmul.f32 %v4537_v61, %v4537_v61  ;;  %3069 = vmatmul.msk.f32.vlgmr.msrb.gmra.mxu3 %vm638_vm1, %v1542_v1  ;;  %1793 = vadd.xlane.f32.xlu0 %v1792_v30  ;;  %v1906_v31 = vmul.f32 %v4542_v20, %v4542_v20  ;;  %v923_v42 = vmul.f32 %v4405_v8, %v3727_v13 }
 0x1f7   : > { %v1251_v16 = vsel %vm4554_vm8, %v4483_v22, %v1247_v11  ;;  %v1335_v43 = vmul.f32 0.5, %v1334_v47  ;;  %v4580_v22 = vmul.f32 %v4548_v26, %v4548_v26  ;;  %v1467_v25 = vmul.f32 %v4412_v35, %v1431_v28 }
 0x1f8   : > { %v4572_v50 = vadd.f32 1e-05, %v1026_v0  ;;  %v995_v15 = vsub.f32 %v931_v2, %v963_v21  ;;  %v1432_v44 = vmul.f32 %v1400_v40, %v1251_v16  ;;  %v1952_v52 = vsel %vm638_vm1, %v1906_v31, 0.0 }
 0x1f9   : > { %v868_v23 = vpop.xlane.xlu1 %867  ;;  %v4588_v63 = vmul.f32 %v4563_v53, %v4563_v53  ;;  %v1409_v8 = vsub.f32 %v4040_v59, %v4424_v60  ;;  %1953 = vadd.xlane.f32.xlu1 %v1952_v52  ;;  %v1503_v1 = vadd.f32 %v4440_v14, %v1467_v25  ;;  %v1336_v47 = vsub.f32 1.5, %v1335_v43  ;;  %v1699_v5 = vpop.f32.mrf.mxu1 }
 0x1fa   : > { %3234 = vrsqrt.f32 %v4572_v50  ;;  %v1027_v2 = vmax.f32 %v995_v15, 0.0  ;;  %v922_v45 = vmul.f32 %v868_v23, %v3727_v13  ;;  %v1401_v21 = vsub.f32 %v4078_v51, %v4476_v56 }
 0x1fb   : > { %v704_v7 = vpop.xlane.xlu0 %703  ;;  %v4594_v11 = vpop.eup %3232  ;;  %v4608_v30 = vadd.f32 %v4323_v19, %v1699_v5  ;;  %vm1339_vm10 = vweird.f32 %v4518_v49  ;;  %v1468_v51 = vmul.f32 %v4412_v35, %v1432_v44  ;;  %v1337_v25 = vmul.f32 %v4518_v49, %v1336_v47 }
 0x1fc   : > { %v4597_v28 = vadd.f32 1e-05, %v1027_v2  ;;  %v4600_v0 = vmul.f32 %v3727_v13, %v704_v7  ;;  %v1253_v16 = vmul.f32 %v4594_v11, %v4533_v55  ;;  %v986_v40 = vsub.f32 %v922_v45, %v4487_v3  ;;  %vm4643_vm13 = vmor %vm1338_vm9, %vm1339_vm10 }
 0x1fd   : > { %v1535_v3 = vmax.f32 %v1503_v1, 0.0  ;;  %v1795_v31 = vsel %vm638_vm1, %v4608_v30, 0.0  ;;  %vm1258_vm11 = vweird.f32 %v4533_v55  ;;  %v1907_v29 = vmul.f32 %v4608_v30, %v4608_v30 }
 0x1fe   : > { %3236 = vrsqrt.f32 %v4597_v28  ;;  %v955_v43 = vmul.f32 %v4600_v0, %v4600_v0  ;;  %3070 = vmatmul.msk.f32.gmra.mxu3 %vm638_vm1, %v1543_v62  ;;  %v1254_v56 = vmul.f32 %v4594_v11, %v1253_v16  ;;  %v1018_v15 = vmax.f32 %v986_v40, 0.0  ;;  %1796 = vadd.xlane.f32.xlu2 %v1795_v31 }
 0x1ff   : > { %v1411_v52 = vsub.f32 %v3880_v17, %v4537_v61  ;;  %3062 = vmatmul.msk.f32.gmra.mxu1 %vm638_vm1, %v1535_v3  ;;  %vm1259_vm12 = vweird.f32 %v4594_v11  ;;  %vm1358_vm14 = vweird.f32 %v4597_v28  ;;  %vm1348_vm0 = vweird.f32 %v4572_v50 }
 0x200   : > { %v4621_v23 = vpop.eup %3234  ;;  %v987_v2 = vsub.f32 %v923_v42, %v955_v43  ;;  %v1255_v62 = vmul.f32 0.5, %v1254_v56  ;;  %v4631_v45 = vadd.f32 1e-05, %v1018_v15  ;;  %v1955_v42 = vsel %vm638_vm1, %v1907_v29, 0.0  ;;  %vm1260_vm15 = vmor %vm1258_vm11, %vm1259_vm12 }
 0x201   : > { %v1343_v44 = vmul.f32 %v4621_v23, %v4572_v50  ;;  %v731_v7 = vpop.xlane.xlu1 %730  ;;  %1956 = vadd.xlane.f32.xlu0 %v1955_v42  ;;  %v1504_v56 = vadd.f32 %v4440_v14, %v1468_v51  ;;  %v1702_v31 = vpop.f32.mrf.mxu1  ;;  %v1341_v29 = vsel %vm4643_vm13, %v4518_v49, %v1337_v25  ;;  %vm1349_vm3 = vweird.f32 %v4621_v23 }
 0x202   : > { %v1019_v1 = vmax.f32 %v987_v2, 0.0  ;;  %v4637_v47 = vmul.f32 %v3727_v13, %v731_v7  ;;  %v1256_v16 = vsub.f32 1.5, %v1255_v62  ;;  %3238 = vrsqrt.f32 %v4631_v45  ;;  %vm4736_vm7 = vmor %vm1348_vm0, %vm1349_vm3 }
 0x203   : > { %v1344_v40 = vmul.f32 %v4621_v23, %v1343_v44  ;;  %v898_v43 = vpop.xlane.xlu0 %897  ;;  %v1403_v7 = vsub.f32 %v3938_v41, %v4600_v0  ;;  %v4672_v49 = vadd.f32 %v4323_v19, %v1702_v31  ;;  %v1536_v42 = vmax.f32 %v1504_v56, 0.0 }
 0x204   : > { %v4650_v15 = vpop.eup %3236  ;;  %v4652_v3 = vadd.f32 1e-05, %v1019_v1  ;;  %v964_v48 = vmul.f32 %v4637_v47, %v4637_v47  ;;  %v932_v2 = vmul.f32 %v898_v43, %v3727_v13  ;;  %v1257_v62 = vmul.f32 %v4594_v11, %v1256_v16 }
 0x205   : > { %v1345_v44 = vmul.f32 0.5, %v1344_v40  ;;  %v1353_v51 = vmul.f32 %v4650_v15, %v4597_v28  ;;  %v1441_v5 = vmul.f32 %v1409_v8, %v1341_v29  ;;  %v1798_v40 = vsel %vm638_vm1, %v4672_v49, 0.0 }
 0x206   : > { %3240 = vrsqrt.f32 %v4652_v3  ;;  %v996_v25 = vsub.f32 %v932_v2, %v964_v48  ;;  %3071 = vmatmul.msk.f32.gmra.mxu3 %vm638_vm1, %v1544_v24  ;;  %v1261_v55 = vsel %vm1260_vm15, %v4594_v11, %v1257_v62  ;;  %v1908_v34 = vmul.f32 %v4672_v49, %v4672_v49  ;;  %1799 = vadd.xlane.f32.xlu1 %v1798_v40 }
 0x207   : > { %v1354_v1 = vmul.f32 %v4650_v15, %v1353_v51  ;;  %v1433_v43 = vmul.f32 %v1401_v21, %v1261_v55  ;;  %v1346_v48 = vsub.f32 1.5, %v1345_v44  ;;  %vm1359_vm2 = vweird.f32 %v4650_v15  ;;  %3063 = vmatmul.msk.f32.gmra.mxu1 %vm638_vm1, %v1536_v42 }
 0x208   : > { %v1028_v16 = vmax.f32 %v996_v25, 0.0  ;;  %v4687_v24 = vpop.eup %3238  ;;  %v1477_v59 = vmul.f32 %v4412_v35, %v1441_v5  ;;  %v1958_v21 = vsel %vm638_vm1, %v1908_v34, 0.0  ;;  %vm4709_vm4 = vmor %vm1358_vm14, %vm1359_vm2  ;;  %vm1268_vm5 = vweird.f32 %v4631_v45 }
 0x209   : > { %v1355_v31 = vmul.f32 0.5, %v1354_v1  ;;  %v707_v11 = vpop.xlane.xlu1 %706  ;;  %v1263_v60 = vmul.f32 %v4687_v24, %v4631_v45  ;;  %1959 = vadd.xlane.f32.xlu2 %v1958_v21  ;;  %v1469_v62 = vmul.f32 %v4412_v35, %v1433_v43  ;;  %v1705_v42 = vpop.f32.mrf.mxu1  ;;  %v1347_v5 = vmul.f32 %v4621_v23, %v1346_v48 }
 0x20a   : > { %v4695_v8 = vadd.f32 1e-05, %v1028_v16  ;;  %v4699_v2 = vmul.f32 %v3727_v13, %v707_v11  ;;  %v1513_v44 = vadd.f32 %v4440_v14, %v1477_v59  ;;  %vm1278_vm6 = vweird.f32 %v4652_v3 }
 0x20b   : > { %v1356_v56 = vsub.f32 1.5, %v1355_v31  ;;  %v874_v29 = vpop.xlane.xlu0 %873  ;;  %v1264_v1 = vmul.f32 %v4687_v24, %v1263_v60  ;;  %v4725_v43 = vadd.f32 %v4323_v19, %v1705_v42  ;;  %v1505_v31 = vadd.f32 %v4440_v14, %v1469_v62 }
 0x20c   : > { %v4703_v51 = vpop.eup %3240  ;;  %3242 = vrsqrt.f32 %v4695_v8  ;;  %v924_v55 = vmul.f32 %v874_v29, %v3727_v13  ;;  %v956_v40 = vmul.f32 %v4699_v2, %v4699_v2  ;;  %v1545_v60 = vmax.f32 %v1513_v44, 0.0 }
 0x20d   : > { %v1357_v16 = vmul.f32 %v4650_v15, %v1356_v56  ;;  %v1273_v28 = vmul.f32 %v4703_v51, %v4652_v3  ;;  %v1265_v34 = vmul.f32 0.5, %v1264_v1  ;;  %vm1269_vm8 = vweird.f32 %v4687_v24 }
 0x20e   : > { %v988_v59 = vsub.f32 %v924_v55, %v956_v40  ;;  %v1801_v29 = vsel %vm638_vm1, %v4725_v43, 0.0  ;;  %v1537_v62 = vmax.f32 %v1505_v31, 0.0  ;;  %3072 = vmatmul.msk.f32.gmra.mxu3 %vm638_vm1, %v1545_v60  ;;  %v1909_v44 = vmul.f32 %v4725_v43, %v4725_v43  ;;  %vm4770_vm10 = vmor %vm1268_vm5, %vm1269_vm8 }
 0x20f   : > { %v1361_v48 = vsel %vm4709_vm4, %v4650_v15, %v1357_v16  ;;  %v1274_v11 = vmul.f32 %v4703_v51, %v1273_v28  ;;  %v1266_v56 = vsub.f32 1.5, %v1265_v34  ;;  %1802 = vadd.xlane.f32.xlu0 %v1801_v29  ;;  %v1351_v1 = vsel %vm4736_vm7, %v4621_v23, %v1347_v5 }
 0x210   : > { %v1020_v25 = vmax.f32 %v988_v59, 0.0  ;;  %v1443_v55 = vmul.f32 %v1411_v52, %v1361_v48  ;;  %vm1279_vm9 = vweird.f32 %v4703_v51  ;;  %3064 = vmatmul.msk.f32.gmra.mxu1 %vm638_vm1, %v1537_v62  ;;  %v1442_v28 = vmul.f32 %v1410_v39, %v1351_v1 }
 0x211   : > { %v1275_v15 = vmul.f32 0.5, %v1274_v11  ;;  %v901_v50 = vpop.xlane.xlu1 %900  ;;  %v1267_v40 = vmul.f32 %v4687_v24, %v1266_v56  ;;  %v1961_v17 = vsel %vm638_vm1, %v1909_v44, 0.0  ;;  %v1708_v52 = vpop.f32.mrf.mxu1  ;;  %vm1368_vm11 = vweird.f32 %v4695_v8  ;;  %vm4781_vm12 = vmor %vm1278_vm6, %vm1279_vm9 }
 0x212   : > { %v3243_v42 = vpop.eup %3242  ;;  %v933_v16 = vmul.f32 %v901_v50, %v3727_v13  ;;  %v4760_v5 = vadd.f32 1e-05, %v1020_v25  ;;  %v1478_v11 = vmul.f32 %v4412_v35, %v1442_v28  ;;  %1962 = vadd.xlane.f32.xlu1 %v1961_v17  ;;  %v4786_v59 = vadd.f32 %v4323_v19, %v1708_v52 }
 0x213   : > { %v1276_v34 = vsub.f32 1.5, %v1275_v15  ;;  %v1363_v23 = vmul.f32 %v3243_v42, %v4695_v8  ;;  %v877_v31 = vpop.xlane.xlu0 %876  ;;  %vm1369_vm13 = vweird.f32 %v3243_v42  ;;  %v1271_v3 = vsel %vm4770_vm10, %v4687_v24, %v1267_v40 }
 0x214   : > { %v997_v61 = vsub.f32 %v933_v16, %v4580_v22  ;;  %v925_v48 = vmul.f32 %v877_v31, %v3727_v13  ;;  %3244 = vrsqrt.f32 %v4760_v5  ;;  %v1514_v21 = vadd.f32 %v4440_v14, %v1478_v11  ;;  %vm4811_vm14 = vmor %vm1368_vm11, %vm1369_vm13 }
 0x215   : > { %v1277_v46 = vmul.f32 %v4703_v51, %v1276_v34  ;;  %v1364_v39 = vmul.f32 %v3243_v42, %v1363_v23  ;;  %v1804_v25 = vsel %vm638_vm1, %v4786_v59, 0.0  ;;  %v1434_v1 = vmul.f32 %v1402_v32, %v1271_v3 }
 0x216   : > { %v1029_v45 = vmax.f32 %v997_v61, 0.0  ;;  %v989_v60 = vsub.f32 %v925_v48, %v4588_v63  ;;  %v1479_v63 = vmul.f32 %v4412_v35, %v1443_v55  ;;  %1805 = vadd.xlane.f32.xlu2 %v1804_v25  ;;  %v1546_v50 = vmax.f32 %v1514_v21, 0.0 }
 0x217   : > { %v1281_v56 = vsel %vm4781_vm12, %v4703_v51, %v1277_v46  ;;  %v1365_v29 = vmul.f32 0.5, %v1364_v39  ;;  %v1910_v51 = vmul.f32 %v4786_v59, %v4786_v59  ;;  %v1470_v36 = vmul.f32 %v4412_v35, %v1434_v1 }
 0x218   : > { %v4796_v62 = vadd.f32 1e-05, %v1029_v45  ;;  %v1021_v15 = vmax.f32 %v989_v60, 0.0  ;;  %v1435_v24 = vmul.f32 %v1403_v7, %v1281_v56  ;;  %3073 = vmatmul.msk.f32.gmra.mxu3 %vm638_vm1, %v1546_v50  ;;  %v1412_v41 = vsub.f32 %v4207_v33, %v4637_v47 }
 0x219   : > { %v1366_v44 = vsub.f32 1.5, %v1365_v29  ;;  %v1964_v4 = vsel %vm638_vm1, %v1910_v51, 0.0  ;;  %v1711_v0 = vpop.f32.mrf.mxu1  ;;  %v1506_v8 = vadd.f32 %v4440_v14, %v1470_v36  ;;  %v1515_v34 = vadd.f32 %v4440_v14, %v1479_v63  ;;  %v2676_v36 = vld [vmem:[%s5773_s9 + $0x8] sm:$0xff] }
 0x21a   : > { %3246 = vrsqrt.f32 %v4796_v62  ;;  %v4816_v55 = vadd.f32 1e-05, %v1021_v15  ;;  %v3245_v28 = vpop.eup %3244  ;;  %1965 = vadd.xlane.f32.xlu0 %v1964_v4  ;;  %v4826_v7 = vadd.f32 %v4323_v19, %v1711_v0  ;;  %v1471_v17 = vmul.f32 %v4412_v35, %v1435_v24 }
 0x21b   : > { %v1367_v40 = vmul.f32 %v3243_v42, %v1366_v44  ;;  %v1283_v32 = vmul.f32 %v3245_v28, %v4760_v5  ;;  %v1538_v47 = vmax.f32 %v1506_v8, 0.0  ;;  %vm1289_vm15 = vweird.f32 %v3245_v28 }
 0x21c   : > { %3248 = vrsqrt.f32 %v4816_v55  ;;  %v1807_v61 = vsel %vm638_vm1, %v4826_v7, 0.0  ;;  %v1911_v52 = vmul.f32 %v4826_v7, %v4826_v7  ;;  %v1507_v60 = vadd.f32 %v4440_v14, %v1471_v17 }
 0x21d   : > { %v1371_v23 = vsel %vm4811_vm14, %v3243_v42, %v1367_v40  ;;  %v1284_v31 = vmul.f32 %v3245_v28, %v1283_v32  ;;  %1808 = vadd.xlane.f32.xlu1 %v1807_v61  ;;  %3065 = vmatmul.msk.f32.gmra.mxu1 %vm638_vm1, %v1538_v47  ;;  %v1547_v42 = vmax.f32 %v1515_v34, 0.0  ;;  %vm1288_vm0 = vweird.f32 %v4760_v5 }
 0x21e   : > { %v1444_v33 = vmul.f32 %v1412_v41, %v1371_v23  ;;  %v1967_v39 = vsel %vm638_vm1, %v1911_v52, 0.0  ;;  %vm1378_vm2 = vweird.f32 %v4796_v62  ;;  %vm1290_vm3 = vmor %vm1288_vm0, %vm1289_vm15  ;;  %v1404_v50 = vsub.f32 %v4252_v10, %v4699_v2 }
 0x21f   : > { %v1285_v11 = vmul.f32 0.5, %v1284_v31  ;;  %1968 = vadd.xlane.f32.xlu2 %v1967_v39  ;;  %v1539_v51 = vmax.f32 %v1507_v60, 0.0  ;;  %v1413_v32 = vsub.f32 %v3965_v18, %v4548_v26  ;;  %vm1298_vm7 = vweird.f32 %v4816_v55 }
 0x220   : > { %v3247_v48 = vpop.eup %3246  ;;  %v1480_v6 = vmul.f32 %v4412_v35, %v1444_v33  ;;  %3074 = vmatmul.msk.f32.gmra.mxu3 %vm638_vm1, %v1547_v42  ;;  %v1405_v34 = vsub.f32 %v4018_v12, %v4563_v53  ;;  %v2681_v42 = vld [vmem:[%s5773_s9 + $0x30] sm:$0xff] }
 0x221   : > { %v1373_v46 = vmul.f32 %v3247_v48, %v4796_v62  ;;  %v1286_v45 = vsub.f32 1.5, %v1285_v11  ;;  %v1714_v15 = vpop.f32.mrf.mxu1  ;;  %vm1379_vm4 = vweird.f32 %v3247_v48 }
 0x222   : > { %v3249_v22 = vpop.eup %3248  ;;  %v1516_v21 = vadd.f32 %v4440_v14, %v1480_v6  ;;  %v4848_v44 = vadd.f32 %v4323_v19, %v1714_v15  ;;  %vm4858_vm5 = vmor %vm1378_vm2, %vm1379_vm4 }
 0x223   : > { %v1374_v56 = vmul.f32 %v3247_v48, %v1373_v46  ;;  %v1293_v29 = vmul.f32 %v3249_v22, %v4816_v55  ;;  %v1287_v3 = vmul.f32 %v3245_v28, %v1286_v45  ;;  %vm1299_vm6 = vweird.f32 %v3249_v22  ;;  %v2680_v45 = vld [vmem:[%s5773_s9 + $0x28] sm:$0xff] }
 0x224   : > { %v1548_v1 = vmax.f32 %v1516_v21, 0.0  ;;  %v1810_v5 = vsel %vm638_vm1, %v4848_v44, 0.0  ;;  %v1912_v4 = vmul.f32 %v4848_v44, %v4848_v44  ;;  %vm1300_vm8 = vmor %vm1298_vm7, %vm1299_vm6 }
 0x225   : > { %v1375_v25 = vmul.f32 0.5, %v1374_v56  ;;  %v1294_v63 = vmul.f32 %v3249_v22, %v1293_v29  ;;  %v1291_v24 = vsel %vm1290_vm3, %v3245_v28, %v1287_v3  ;;  %1811 = vadd.xlane.f32.xlu0 %v1810_v5  ;;  %3066 = vmatmul.msk.f32.gmra.mxu1 %vm638_vm1, %v1539_v51  ;;  %v2679_v3 = vld [vmem:[%s5773_s9 + $0x20] sm:$0xff] }
 0x226   : > { %v1436_v41 = vmul.f32 %v1404_v50, %v1291_v24  ;;  %v1970_v28 = vsel %vm638_vm1, %v1912_v4, 0.0  ;;  %v2678_v50 = vld [vmem:[%s5773_s9 + $0x18] sm:$0xff]  ;;  %v2677_v24 = vld [vmem:[%s5773_s9 + $0x10] sm:$0xff] }
 0x227   : > { %v1376_v16 = vsub.f32 1.5, %v1375_v25  ;;  %v1295_v40 = vmul.f32 0.5, %v1294_v63  ;;  %1971 = vadd.xlane.f32.xlu1 %v1970_v28  ;;  %v2675_v28 = vld [vmem:[%s5773_s9] sm:$0xff] }
 0x228   : > { %v1472_v0 = vmul.f32 %v4412_v35, %v1436_v41  ;;  %3075 = vmatmul.msk.f32.gmra.mxu3 %vm638_vm1, %v1548_v1 }
 0x229   : > { %v1377_v10 = vmul.f32 %v3247_v48, %v1376_v16  ;;  %v1296_v2 = vsub.f32 1.5, %v1295_v40  ;;  %v1717_v23 = vpop.f32.mrf.mxu1 }
 0x22a   : > { %v1508_v31 = vadd.f32 %v4440_v14, %v1472_v0  ;;  %v4875_v18 = vadd.f32 %v4323_v19, %v1717_v23 }
 0x22b   : > { %v1297_v62 = vmul.f32 %v3249_v22, %v1296_v2  ;;  %v1381_v8 = vsel %vm4858_vm5, %v3247_v48, %v1377_v10  ;;  %v2682_v48 = vld [vmem:[%s5773_s9 + $0x38] sm:$0xff] }
 0x22c   : > { %v1445_v17 = vmul.f32 %v1413_v32, %v1381_v8  ;;  %v1540_v33 = vmax.f32 %v1508_v31, 0.0  ;;  %v1813_v61 = vsel %vm638_vm1, %v4875_v18, 0.0  ;;  %v1913_v52 = vmul.f32 %v4875_v18, %v4875_v18  ;;  %2791 = vmatpush.msra.mxu2 %v2682_v48  ;;  %3127 = vmatpush.msra.mxu3 %v2682_v48 }
 0x22d   : > { %v1301_v26 = vsel %vm1300_vm8, %v3249_v22, %v1297_v62  ;;  %1814 = vadd.xlane.f32.xlu2 %v1813_v61 }
 0x22e   : > { %v1481_v55 = vmul.f32 %v4412_v35, %v1445_v17  ;;  %v1437_v47 = vmul.f32 %v1405_v34, %v1301_v26  ;;  %3067 = vmatmul.msk.f32.gmra.mxu1 %vm638_vm1, %v1540_v33  ;;  %v1973_v11 = vsel %vm638_vm1, %v1913_v52, 0.0  ;;  %2792 = vmatpush.msra.mxu2 %v2681_v42 }
 0x22f   : > { %1974 = vadd.xlane.f32.xlu0 %v1973_v11  ;;  %3128 = vmatpush.msra.mxu3 %v2681_v42 }
 0x230   : > { %v1517_v12 = vadd.f32 %v4440_v14, %v1481_v55  ;;  %v1473_v53 = vmul.f32 %v4412_v35, %v1437_v47  ;;  %v1773_v39 = vpop.xlane.xlu1 %1772  ;;  %2793 = vmatpush.msra.mxu2 %v2680_v45 }
 0x231   : > { %v4894_v35 = vmul.f32 %v1773_v39, %v3727_v13  ;;  %v1720_v22 = vpop.f32.mrf.mxu1  ;;  %3129 = vmatpush.msra.mxu3 %v2680_v45 }
 0x232   : > { %v1549_v6 = vmax.f32 %v1517_v12, 0.0  ;;  %v1509_v46 = vadd.f32 %v4440_v14, %v1473_v53  ;;  %v4901_v60 = vadd.f32 %v4323_v19, %v1720_v22  ;;  %v1933_v14 = vpop.xlane.xlu2 %1932  ;;  %2794 = vmatpush.msra.mxu2 %v2679_v3 }
 0x233   : > { %v2059_v56 = vmul.f32 %v4894_v35, %v4894_v35  ;;  %v2027_v29 = vmul.f32 %v1933_v14, %v3727_v13  ;;  %3130 = vmatpush.msra.mxu3 %v2679_v3  ;;  %v2507_v14 = vsub.f32 %v4327_v57, %v4894_v35  ;;  %v4963_v57 = vld [vmem:[%s5772_s8] ss:$0 sm:$0xff] }
 0x234   : > { %3076 = vmatmul.msk.f32.gmra.mxu3 %vm638_vm1, %v1549_v6  ;;  %v1541_v21 = vmax.f32 %v1509_v46, 0.0  ;;  %v1816_v15 = vsel %vm638_vm1, %v4901_v60, 0.0  ;;  %v1914_v25 = vmul.f32 %v4901_v60, %v4901_v60  ;;  %2795 = vmatpush.msra.mxu2 %v2678_v50 }
 0x235   : > { %v2091_v63 = vsub.f32 %v2027_v29, %v2059_v56  ;;  %1817 = vadd.xlane.f32.xlu1 %v1816_v15  ;;  %3131 = vmatpush.msra.mxu3 %v2678_v50  ;;  %v4955_v56 = vld [vmem:[%s5771_s7] ss:$0 sm:$0xff] }
 0x236   : > { %3068 = vmatmul.msk.f32.gmra.mxu1 %vm638_vm1, %v1541_v21  ;;  %v1976_v51 = vsel %vm638_vm1, %v1914_v25, 0.0  ;;  %2796 = vmatpush.msra.mxu2 %v2677_v24 }
 0x237   : > { %v2123_v1 = vmax.f32 %v2091_v63, 0.0  ;;  %1977 = vadd.xlane.f32.xlu2 %v1976_v51  ;;  %3132 = vmatpush.msra.mxu3 %v2677_v24 }
 0x238   : > { %v1776_v16 = vpop.xlane.xlu0 %1775  ;;  %2797 = vmatpush.msra.mxu2 %v2676_v36 }
 0x239   : > { %v2155_v40 = vadd.f32 1e-05, %v2123_v1  ;;  %v4922_v5 = vmul.f32 %v1776_v16, %v3727_v13  ;;  %v1723_v4 = vpop.f32.mrf.mxu1  ;;  %3133 = vmatpush.msra.mxu3 %v2676_v36 }
 0x23a   : > { %v4928_v41 = vadd.f32 %v4323_v19, %v1723_v4  ;;  %v1936_v10 = vpop.xlane.xlu1 %1935  ;;  %2798 = vmatpush.msra.mxu2 %v2675_v28 }
 0x23b   : > { %3250 = vrsqrt.f32 %v2155_v40  ;;  %v2060_v2 = vmul.f32 %v4922_v5, %v4922_v5  ;;  %v2028_v32 = vmul.f32 %v1936_v10, %v3727_v13  ;;  %3134 = vmatpush.msra.mxu3 %v2675_v28  ;;  %vm2193_vm10 = vweird.f32 %v2155_v40 }
 0x23c   : > { %v1819_v0 = vsel %vm638_vm1, %v4928_v41, 0.0  ;;  %v1915_v19 = vmul.f32 %v4928_v41, %v4928_v41 }
 0x23d   : > { %1820 = vadd.xlane.f32.xlu0 %v1819_v0  ;;  %v2092_v62 = vsub.f32 %v2028_v32, %v2060_v2 }
 0x23e   : > { %v1979_v8 = vsel %vm638_vm1, %v1915_v19, 0.0 }
 0x23f   : > { %1980 = vadd.xlane.f32.xlu2 %v1979_v8  ;;  %v2124_v34 = vmax.f32 %v2092_v62, 0.0  ;;  %v2508_v62 = vsub.f32 %v4340_v38, %v4922_v5 }
 0x240   : > { %v1779_v23 = vpop.xlane.xlu2 %1778 }
 0x241   : > { %v3251_v31 = vpop.eup %3250  ;;  %v4942_v17 = vmul.f32 %v1779_v23, %v3727_v13  ;;  %v2156_v33 = vadd.f32 1e-05, %v2124_v34 }
 0x242   : > { %v2188_v26 = vmul.f32 %v3251_v31, %v2155_v40  ;;  %v1939_v55 = vpop.xlane.xlu0 %1938  ;;  %vm2194_vm9 = vweird.f32 %v3251_v31 }
 0x243   : > { %v2061_v47 = vmul.f32 %v4942_v17, %v4942_v17  ;;  %v2029_v61 = vmul.f32 %v1939_v55, %v3727_v13  ;;  %3252 = vrsqrt.f32 %v2156_v33  ;;  %vm2195_vm11 = vmor %vm2193_vm10, %vm2194_vm9  ;;  %vm2203_vm13 = vweird.f32 %v2156_v33 }
 0x244   : > { %v2189_v52 = vmul.f32 %v3251_v31, %v2188_v26 }
 0x245   : > { %v2093_v12 = vsub.f32 %v2029_v61, %v2061_v47 }
 0x246   : > { %v2190_v53 = vmul.f32 0.5, %v2189_v52 }
 0x247   : > { %v2125_v48 = vmax.f32 %v2093_v12, 0.0 }
 0x248   : > { %v2191_v11 = vsub.f32 1.5, %v2190_v53  ;;  %v1782_v6 = vpop.xlane.xlu1 %1781 }
 0x249   : > { %v2157_v46 = vadd.f32 1e-05, %v2125_v48  ;;  %v4948_v42 = vmul.f32 %v1782_v6, %v3727_v13  ;;  %v3253_v39 = vpop.eup %3252 }
 0x24a   : > { %v2192_v22 = vmul.f32 %v3251_v31, %v2191_v11  ;;  %v1942_v45 = vpop.xlane.xlu2 %1941  ;;  %v2198_v21 = vmul.f32 %v3253_v39, %v2156_v33  ;;  %vm2204_vm12 = vweird.f32 %v3253_v39 }
 0x24b   : > { %3254 = vrsqrt.f32 %v2157_v46  ;;  %v2062_v29 = vmul.f32 %v4948_v42, %v4948_v42  ;;  %v2030_v3 = vmul.f32 %v1942_v45, %v3727_v13  ;;  %vm2205_vm14 = vmor %vm2203_vm13, %vm2204_vm12  ;;  %vm2213_vm0 = vweird.f32 %v2157_v46 }
 0x24c   : > { %v2196_v15 = vsel %vm2195_vm11, %v3251_v31, %v2192_v22  ;;  %v2199_v25 = vmul.f32 %v3253_v39, %v2198_v21 }
 0x24d   : > { %v2539_v63 = vmul.f32 %v2507_v14, %v2196_v15  ;;  %v2094_v35 = vsub.f32 %v2030_v3, %v2062_v29 }
 0x24e   : > { %v2200_v50 = vmul.f32 0.5, %v2199_v25 }
 0x24f   : > { %v2575_v51 = vmul.f32 %v4955_v56, %v2539_v63  ;;  %v2126_v1 = vmax.f32 %v2094_v35, 0.0 }
 0x250   : > { %v1785_v24 = vpop.xlane.xlu0 %1784  ;;  %v2201_v40 = vsub.f32 1.5, %v2200_v50 }
 0x251   : > { %v3255_v16 = vpop.eup %3254  ;;  %v4967_v4 = vmul.f32 %v1785_v24, %v3727_v13  ;;  %v2611_v36 = vadd.f32 %v4963_v57, %v2575_v51  ;;  %v2158_v2 = vadd.f32 1e-05, %v2126_v1 }
 0x252   : > { %v2208_v10 = vmul.f32 %v3255_v16, %v2157_v46  ;;  %v2202_v32 = vmul.f32 %v3253_v39, %v2201_v40  ;;  %vm2214_vm15 = vweird.f32 %v3255_v16 }
 0x253   : > { %v1945_v28 = vpop.xlane.xlu1 %1944  ;;  %v2063_v0 = vmul.f32 %v4967_v4, %v4967_v4  ;;  %3256 = vrsqrt.f32 %v2158_v2  ;;  %v2643_v34 = vmax.f32 %v2611_v36, 0.0  ;;  %vm2215_vm2 = vmor %vm2213_vm0, %vm2214_vm15  ;;  %vm2223_vm4 = vweird.f32 %v2158_v2 }
 0x254   : > { %v2031_v19 = vmul.f32 %v1945_v28, %v3727_v13  ;;  %v2209_v8 = vmul.f32 %v3255_v16, %v2208_v10  ;;  %v2206_v31 = vsel %vm2205_vm14, %v3253_v39, %v2202_v32  ;;  %v2509_v39 = vsub.f32 %v4353_v58, %v4942_v17 }
 0x255   : > { %3077 = vmatmul.msk.f32.vlgmr.msra.gmra.mxu2 %vm638_vm1, %v2643_v34  ;;  %v2540_v55 = vmul.f32 %v2508_v62, %v2206_v31  ;;  %v2510_v36 = vsub.f32 %v4370_v54, %v4948_v42 }
 0x256   : > { %v2095_v23 = vsub.f32 %v2031_v19, %v2063_v0  ;;  %v2210_v26 = vmul.f32 0.5, %v2209_v8 }
 0x257   : > { %v2576_v52 = vmul.f32 %v4955_v56, %v2540_v55 }
 0x258   : > { %v2127_v47 = vmax.f32 %v2095_v23, 0.0  ;;  %v2211_v33 = vsub.f32 1.5, %v2210_v26  ;;  %v1788_v61 = vpop.xlane.xlu2 %1787 }
 0x259   : > { %v4978_v53 = vmul.f32 %v1788_v61, %v3727_v13  ;;  %v3257_v38 = vpop.eup %3256  ;;  %v2612_v11 = vadd.f32 %v4963_v57, %v2576_v52 }
 0x25a   : > { %v2159_v12 = vadd.f32 1e-05, %v2127_v47  ;;  %v2212_v5 = vmul.f32 %v3255_v16, %v2211_v33  ;;  %v2218_v6 = vmul.f32 %v3257_v38, %v2158_v2  ;;  %vm2224_vm3 = vweird.f32 %v3257_v38 }
 0x25b   : > { %v1948_v48 = vpop.xlane.xlu0 %1947  ;;  %v2064_v22 = vmul.f32 %v4978_v53, %v4978_v53  ;;  %v2644_v14 = vmax.f32 %v2612_v11, 0.0  ;;  %vm2225_vm5 = vmor %vm2223_vm4, %vm2224_vm3  ;;  %v2511_v33 = vsub.f32 %v4393_v27, %v4967_v4 }
 0x25c   : > { %3258 = vrsqrt.f32 %v2159_v12  ;;  %v2032_v45 = vmul.f32 %v1948_v48, %v3727_v13  ;;  %v2219_v21 = vmul.f32 %v3257_v38, %v2218_v6  ;;  %v2216_v29 = vsel %vm2215_vm2, %v3255_v16, %v2212_v5 }
 0x25d   : > { %3078 = vmatmul.msk.f32.gmra.mxu2 %vm638_vm1, %v2644_v14  ;;  %v2541_v15 = vmul.f32 %v2509_v39, %v2216_v29  ;;  %vm2233_vm7 = vweird.f32 %v2159_v12 }
 0x25e   : > { %v2096_v3 = vsub.f32 %v2032_v45, %v2064_v22  ;;  %v2220_v25 = vmul.f32 0.5, %v2219_v21 }
 0x25f   : > { %v2577_v63 = vmul.f32 %v4955_v56, %v2541_v15 }
 0x260   : > { %v2128_v46 = vmax.f32 %v2096_v3, 0.0  ;;  %v2221_v50 = vsub.f32 1.5, %v2220_v25  ;;  %v1791_v58 = vpop.xlane.xlu1 %1790 }
 0x261   : > { %v4989_v1 = vmul.f32 %v1791_v58, %v3727_v13  ;;  %v2613_v40 = vadd.f32 %v4963_v57, %v2577_v63  ;;  %v2512_v58 = vsub.f32 %v4446_v37, %v4978_v53 }
 0x262   : > { %v3259_v35 = vpop.eup %3258  ;;  %v2160_v51 = vadd.f32 1e-05, %v2128_v46  ;;  %v2222_v24 = vmul.f32 %v3257_v38, %v2221_v50 }
 0x263   : > { %v2228_v17 = vmul.f32 %v3259_v35, %v2159_v12  ;;  %v1951_v16 = vpop.xlane.xlu2 %1950  ;;  %v2065_v28 = vmul.f32 %v4989_v1, %v4989_v1  ;;  %v2645_v0 = vmax.f32 %v2613_v40, 0.0  ;;  %vm2234_vm6 = vweird.f32 %v3259_v35 }
 0x264   : > { %3260 = vrsqrt.f32 %v2160_v51  ;;  %v2033_v32 = vmul.f32 %v1951_v16, %v3727_v13  ;;  %v2226_v19 = vsel %vm2225_vm5, %v3257_v38, %v2222_v24  ;;  %vm2235_vm8 = vmor %vm2233_vm7, %vm2234_vm6  ;;  %vm2243_vm10 = vweird.f32 %v2160_v51 }
 0x265   : > { %v2229_v10 = vmul.f32 %v3259_v35, %v2228_v17  ;;  %v2542_v8 = vmul.f32 %v2510_v36, %v2226_v19  ;;  %3079 = vmatmul.msk.f32.gmra.mxu2 %vm638_vm1, %v2645_v0 }
 0x266   : > { %v2097_v34 = vsub.f32 %v2033_v32, %v2065_v28 }
 0x267   : > { %v2230_v62 = vmul.f32 0.5, %v2229_v10  ;;  %v2578_v54 = vmul.f32 %v4955_v56, %v2542_v8 }
 0x268   : > { %v2129_v42 = vmax.f32 %v2097_v34, 0.0 }
 0x269   : > { %v2231_v2 = vsub.f32 1.5, %v2230_v62  ;;  %v1794_v23 = vpop.xlane.xlu0 %1793  ;;  %v2614_v47 = vadd.f32 %v4963_v57, %v2578_v54 }
 0x26a   : > { %v5000_v31 = vmul.f32 %v1794_v23, %v3727_v13  ;;  %v3261_v26 = vpop.eup %3260  ;;  %v2161_v52 = vadd.f32 1e-05, %v2129_v42 }
 0x26b   : > { %v2232_v55 = vmul.f32 %v3259_v35, %v2231_v2  ;;  %v2238_v61 = vmul.f32 %v3261_v26, %v2160_v51  ;;  %v2646_v11 = vmax.f32 %v2614_v47, 0.0  ;;  %vm2244_vm9 = vweird.f32 %v3261_v26 }
 0x26c   : > { %v2066_v38 = vmul.f32 %v5000_v31, %v5000_v31  ;;  %v1954_v5 = vpop.xlane.xlu1 %1953  ;;  %3262 = vrsqrt.f32 %v2161_v52  ;;  %vm2245_vm11 = vmor %vm2243_vm10, %vm2244_vm9  ;;  %vm2253_vm13 = vweird.f32 %v2161_v52 }
 0x26d   : > { %v2034_v48 = vmul.f32 %v1954_v5, %v3727_v13  ;;  %v2236_v6 = vsel %vm2235_vm8, %v3259_v35, %v2232_v55  ;;  %v2239_v39 = vmul.f32 %v3261_v26, %v2238_v61  ;;  %3080 = vmatmul.msk.f32.gmra.mxu2 %vm638_vm1, %v2646_v11 }
 0x26e   : > { %v2543_v22 = vmul.f32 %v2511_v33, %v2236_v6  ;;  %v2513_v33 = vsub.f32 %v4500_v9, %v4989_v1 }
 0x26f   : > { %v2098_v12 = vsub.f32 %v2034_v48, %v2066_v38  ;;  %v2240_v45 = vmul.f32 0.5, %v2239_v39 }
 0x270   : > { %v2579_v27 = vmul.f32 %v4955_v56, %v2543_v22 }
 0x271   : > { %v2130_v4 = vmax.f32 %v2098_v12, 0.0  ;;  %v1797_v14 = vpop.xlane.xlu2 %1796  ;;  %v2241_v21 = vsub.f32 1.5, %v2240_v45 }
 0x272   : > { %v5011_v29 = vmul.f32 %v1797_v14, %v3727_v13  ;;  %v2615_v3 = vadd.f32 %v4963_v57, %v2579_v27  ;;  %v3263_v25 = vpop.eup %3262 }
 0x273   : > { %v5014_v15 = vadd.f32 1e-05, %v2130_v4  ;;  %v2242_v46 = vmul.f32 %v3261_v26, %v2241_v21  ;;  %v2248_v17 = vmul.f32 %v3263_v25, %v2161_v52  ;;  %vm2254_vm12 = vweird.f32 %v3263_v25 }
 0x274   : > { %v2067_v63 = vmul.f32 %v5011_v29, %v5011_v29  ;;  %v1957_v35 = vpop.xlane.xlu0 %1956  ;;  %v2647_v50 = vmax.f32 %v2615_v3, 0.0  ;;  %vm2255_vm14 = vmor %vm2253_vm13, %vm2254_vm12 }
 0x275   : > { %3264 = vrsqrt.f32 %v5014_v15  ;;  %v2035_v24 = vmul.f32 %v1957_v35, %v3727_v13  ;;  %v2246_v16 = vsel %vm2245_vm11, %v3261_v26, %v2242_v46  ;;  %v2249_v40 = vmul.f32 %v3263_v25, %v2248_v17  ;;  %v5036_v26 = vld [vmem:[%s5770_s6] ss:$0 sm:$0xff] }
 0x276   : > { %v2544_v36 = vmul.f32 %v2512_v58, %v2246_v16  ;;  %3081 = vmatmul.msk.f32.gmra.mxu2 %vm638_vm1, %v2647_v50  ;;  %vm2263_vm0 = vweird.f32 %v5014_v15  ;;  %v2514_v50 = vsub.f32 %v4542_v20, %v5000_v31 }
 0x277   : > { %v2099_v10 = vsub.f32 %v2035_v24, %v2067_v63  ;;  %v2250_v51 = vmul.f32 0.5, %v2249_v40 }
 0x278   : > { %v2580_v28 = vmul.f32 %v4955_v56, %v2544_v36 }
 0x279   : > { %v2131_v32 = vmax.f32 %v2099_v10, 0.0  ;;  %v1800_v0 = vpop.xlane.xlu1 %1799  ;;  %v2251_v62 = vsub.f32 1.5, %v2250_v51  ;;  %v1747_v47 = vpop.f32.mrf.mxu3 }
 0x27a   : > { %v5025_v37 = vmul.f32 %v1800_v0, %v3727_v13  ;;  %v2616_v53 = vadd.f32 %v4963_v57, %v2580_v28 }
 0x27b   : > { %v3265_v19 = vpop.eup %3264  ;;  %v5029_v34 = vadd.f32 1e-05, %v2131_v32  ;;  %v2252_v54 = vmul.f32 %v3263_v25, %v2251_v62 }
 0x27c   : > { %v2258_v8 = vmul.f32 %v3265_v19, %v5014_v15  ;;  %v1726_v2 = vpop.f32.mrf.mxu1  ;;  %v1960_v23 = vpop.xlane.xlu2 %1959  ;;  %v2068_v42 = vmul.f32 %v5025_v37, %v5025_v37  ;;  %v2648_v5 = vmax.f32 %v2616_v53, 0.0  ;;  %vm2264_vm15 = vweird.f32 %v3265_v19 }
 0x27d   : > { %v5039_v55 = vadd.f32 %v5036_v26, %v1726_v2  ;;  %3266 = vrsqrt.f32 %v5029_v34  ;;  %v2036_v52 = vmul.f32 %v1960_v23, %v3727_v13  ;;  %v2256_v11 = vsel %vm2255_vm14, %v3263_v25, %v2252_v54  ;;  %vm2265_vm2 = vmor %vm2263_vm0, %vm2264_vm15 }
 0x27e   : > { %v2259_v61 = vmul.f32 %v3265_v19, %v2258_v8  ;;  %v2545_v22 = vmul.f32 %v2513_v33, %v2256_v11  ;;  %3082 = vmatmul.msk.f32.gmra.mxu2 %vm638_vm1, %v2648_v5  ;;  %vm2273_vm4 = vweird.f32 %v5029_v34 }
 0x27f   : > { %v1822_v38 = vsel %vm638_vm1, %v5039_v55, 0.0  ;;  %v1916_v48 = vmul.f32 %v5039_v55, %v5039_v55  ;;  %v2100_v39 = vsub.f32 %v2036_v52, %v2068_v42  ;;  %v5083_v42 = vadd.f32 %v5036_v26, %v1747_v47 }
 0x280   : > { %v2260_v6 = vmul.f32 0.5, %v2259_v61  ;;  %1823 = vadd.xlane.f32.xlu1 %v1822_v38  ;;  %v2581_v27 = vmul.f32 %v4955_v56, %v2545_v22  ;;  %v2515_v47 = vsub.f32 %v4608_v30, %v5011_v29 }
 0x281   : > { %v1982_v9 = vsel %vm638_vm1, %v1916_v48, 0.0  ;;  %v2132_v12 = vmax.f32 %v2100_v39, 0.0  ;;  %v5068_v40 = vpop.f32.mrf.mxu3 }
 0x282   : > { %v2261_v1 = vsub.f32 1.5, %v2260_v6  ;;  %1983 = vadd.xlane.f32.xlu0 %v1982_v9  ;;  %v1803_v45 = vpop.xlane.xlu0 %1802  ;;  %v2617_v46 = vadd.f32 %v4963_v57, %v2581_v27 }
 0x283   : > { %v5053_v4 = vmul.f32 %v1803_v45, %v3727_v13  ;;  %v3267_v14 = vpop.eup %3266  ;;  %v5055_v3 = vadd.f32 1e-05, %v2132_v12 }
 0x284   : > { %v2262_v21 = vmul.f32 %v3265_v19, %v2261_v1  ;;  %v1729_v25 = vpop.f32.mrf.mxu1  ;;  %v2268_v63 = vmul.f32 %v3267_v14, %v5029_v34  ;;  %v2649_v24 = vmax.f32 %v2617_v46, 0.0  ;;  %vm2274_vm3 = vweird.f32 %v3267_v14 }
 0x285   : > { %v2069_v35 = vmul.f32 %v5053_v4, %v5053_v4  ;;  %3268 = vrsqrt.f32 %v5055_v3  ;;  %v5066_v58 = vadd.f32 %v5036_v26, %v1729_v25  ;;  %v1963_v17 = vpop.xlane.xlu1 %1962  ;;  %vm2275_vm5 = vmor %vm2273_vm4, %vm2274_vm3  ;;  %vm2283_vm7 = vweird.f32 %v5055_v3 }
 0x286   : > { %v2269_v16 = vmul.f32 %v3267_v14, %v2268_v63  ;;  %v2037_v15 = vmul.f32 %v1963_v17, %v3727_v13  ;;  %v2266_v36 = vsel %vm2265_vm2, %v3265_v19, %v2262_v21  ;;  %3083 = vmatmul.msk.f32.gmra.mxu2 %vm638_vm1, %v2649_v24  ;;  %v1843_v21 = vsel %vm638_vm1, %v5083_v42, 0.0 }
 0x287   : > { %v1825_v10 = vsel %vm638_vm1, %v5066_v58, 0.0  ;;  %v1917_v20 = vmul.f32 %v5066_v58, %v5066_v58  ;;  %v2546_v31 = vmul.f32 %v2514_v50, %v2266_v36 }
 0x288   : > { %v2270_v51 = vmul.f32 0.5, %v2269_v16  ;;  %v2101_v28 = vsub.f32 %v2037_v15, %v2069_v35  ;;  %1826 = vadd.xlane.f32.xlu2 %v1825_v10  ;;  %v1923_v16 = vmul.f32 %v5083_v42, %v5083_v42 }
 0x289   : > { %v1985_v32 = vsel %vm638_vm1, %v1917_v20, 0.0  ;;  %v1806_v0 = vpop.xlane.xlu2 %1805  ;;  %v2582_v62 = vmul.f32 %v4955_v56, %v2546_v31  ;;  %v1753_v45 = vpop.f32.mrf.mxu3  ;;  %v2516_v20 = vsub.f32 %v4672_v49, %v5025_v37  ;;  %v5123_v31 = vadd.f32 %v5036_v26, %v5068_v40 }
 0x28a   : > { %v2271_v53 = vsub.f32 1.5, %v2270_v51  ;;  %v2133_v8 = vmax.f32 %v2101_v28, 0.0  ;;  %1986 = vadd.xlane.f32.xlu1 %v1985_v32  ;;  %v5079_v19 = vmul.f32 %v1806_v0, %v3727_v13 }
 0x28b   : > { %v3269_v2 = vpop.eup %3268  ;;  %v2618_v23 = vadd.f32 %v4963_v57, %v2582_v62 }
 0x28c   : > { %v2272_v54 = vmul.f32 %v3267_v14, %v2271_v53  ;;  %v2278_v33 = vmul.f32 %v3269_v2, %v5055_v3  ;;  %v5086_v61 = vadd.f32 1e-05, %v2133_v8  ;;  %v2070_v5 = vmul.f32 %v5079_v19, %v5079_v19 }
 0x28d   : > { %v1966_v52 = vpop.xlane.xlu0 %1965  ;;  %v1732_v38 = vpop.f32.mrf.mxu1  ;;  %v2650_v39 = vmax.f32 %v2618_v23, 0.0  ;;  %vm2284_vm6 = vweird.f32 %v3269_v2  ;;  %v2003_v3 = vsel %vm638_vm1, %v1923_v16, 0.0  ;;  %v5129_v8 = vadd.f32 %v5036_v26, %v1753_v45 }
 0x28e   : > { %v2038_v48 = vmul.f32 %v1966_v52, %v3727_v13  ;;  %v5093_v11 = vadd.f32 %v5036_v26, %v1732_v38  ;;  %v2279_v6 = vmul.f32 %v3269_v2, %v2278_v33  ;;  %3270 = vrsqrt.f32 %v5086_v61  ;;  %vm2285_vm8 = vmor %vm2283_vm7, %vm2284_vm6 }
 0x28f   : > { %v2276_v1 = vsel %vm2275_vm5, %v3267_v14, %v2272_v54  ;;  %3084 = vmatmul.msk.f32.gmra.mxu2 %vm638_vm1, %v2650_v39  ;;  %v1846_v54 = vsel %vm638_vm1, %v5123_v31, 0.0  ;;  %vm2293_vm10 = vweird.f32 %v5086_v61  ;;  %v2517_v45 = vsub.f32 %v4725_v43, %v5053_v4 }
 0x290   : > { %v2102_v22 = vsub.f32 %v2038_v48, %v2070_v5  ;;  %v1828_v34 = vsel %vm638_vm1, %v5093_v11, 0.0  ;;  %v1918_v9 = vmul.f32 %v5093_v11, %v5093_v11  ;;  %v2280_v12 = vmul.f32 0.5, %v2279_v6  ;;  %v1809_v27 = vpop.xlane.xlu1 %1808 }
 0x291   : > { %1829 = vadd.xlane.f32.xlu0 %v1828_v34  ;;  %v2547_v30 = vmul.f32 %v2515_v47, %v2276_v1  ;;  %v5106_v25 = vmul.f32 %v1809_v27, %v3727_v13  ;;  %v1925_v34 = vmul.f32 %v5129_v8, %v5129_v8  ;;  %v1924_v16 = vmul.f32 %v5123_v31, %v5123_v31 }
 0x292   : > { %v2134_v29 = vmax.f32 %v2102_v22, 0.0  ;;  %v1988_v46 = vsel %vm638_vm1, %v1918_v9, 0.0  ;;  %v2281_v63 = vsub.f32 1.5, %v2280_v12  ;;  %1844 = vadd.xlane.f32.xlu1 %v1843_v21  ;;  %v1969_v14 = vpop.xlane.xlu2 %1968 }
 0x293   : > { %1989 = vadd.xlane.f32.xlu2 %v1988_v46  ;;  %v2583_v35 = vmul.f32 %v4955_v56, %v2547_v30  ;;  %v2071_v17 = vmul.f32 %v5106_v25, %v5106_v25  ;;  %v2039_v24 = vmul.f32 %v1969_v14, %v3727_v13  ;;  %v1849_v46 = vsel %vm638_vm1, %v5129_v8, 0.0 }
 0x294   : > { %v5110_v50 = vadd.f32 1e-05, %v2134_v29  ;;  %v3271_v15 = vpop.eup %3270  ;;  %v2282_v36 = vmul.f32 %v3269_v2, %v2281_v63  ;;  %v2009_v4 = vsel %vm638_vm1, %v1925_v34, 0.0 }
 0x295   : > { %v2619_v10 = vadd.f32 %v4963_v57, %v2583_v35  ;;  %v2288_v51 = vmul.f32 %v3271_v15, %v5086_v61  ;;  %v2103_v28 = vsub.f32 %v2039_v24, %v2071_v17  ;;  %vm2294_vm9 = vweird.f32 %v3271_v15 }
 0x296   : > { %3272 = vrsqrt.f32 %v5110_v50  ;;  %v2286_v0 = vsel %vm2285_vm8, %v3269_v2, %v2282_v36  ;;  %v1756_v2 = vpop.f32.mrf.mxu3  ;;  %vm2295_vm11 = vmor %vm2293_vm10, %vm2294_vm9  ;;  %vm2303_vm13 = vweird.f32 %v5110_v50 }
 0x297   : > { %v2651_v32 = vmax.f32 %v2619_v10, 0.0  ;;  %v2289_v62 = vmul.f32 %v3271_v15, %v2288_v51  ;;  %v2548_v53 = vmul.f32 %v2516_v20, %v2286_v0  ;;  %v2135_v49 = vmax.f32 %v2103_v28, 0.0 }
 0x298   : > { %v1812_v37 = vpop.xlane.xlu0 %1811 }
 0x299   : > { %3085 = vmatmul.msk.f32.gmra.mxu2 %vm638_vm1, %v2651_v32  ;;  %2004 = vadd.xlane.f32.xlu0 %v2003_v3  ;;  %v2290_v40 = vmul.f32 0.5, %v2289_v62  ;;  %v5133_v23 = vmul.f32 %v1812_v37, %v3727_v13  ;;  %v5137_v33 = vadd.f32 1e-05, %v2135_v49  ;;  %v2584_v38 = vmul.f32 %v4955_v56, %v2548_v53 }
 0x29a   : > { %v1972_v52 = vpop.xlane.xlu1 %1971  ;;  %v1735_v6 = vpop.f32.mrf.mxu1  ;;  %v2518_v49 = vsub.f32 %v4786_v59, %v5079_v19 }
 0x29b   : > { %1847 = vadd.xlane.f32.xlu2 %v1846_v54  ;;  %v2291_v48 = vsub.f32 1.5, %v2290_v40  ;;  %v2072_v47 = vmul.f32 %v5133_v23, %v5133_v23  ;;  %v2040_v39 = vmul.f32 %v1972_v52, %v3727_v13  ;;  %3274 = vrsqrt.f32 %v5137_v33 }
 0x29c   : > { %v3273_v5 = vpop.eup %3272  ;;  %v5149_v1 = vadd.f32 %v5036_v26, %v1735_v6  ;;  %v2620_v30 = vadd.f32 %v4963_v57, %v2584_v38  ;;  %v5184_v52 = vadd.f32 %v5036_v26, %v1756_v2  ;;  %vm2313_vm0 = vweird.f32 %v5137_v33 }
 0x29d   : > { %v2298_v22 = vmul.f32 %v3273_v5, %v5110_v50  ;;  %v2292_v9 = vmul.f32 %v3271_v15, %v2291_v48  ;;  %v2104_v12 = vsub.f32 %v2040_v39, %v2072_v47  ;;  %vm2304_vm12 = vweird.f32 %v3273_v5 }
 0x29e   : > { %v1831_v21 = vsel %vm638_vm1, %v5149_v1, 0.0  ;;  %v2652_v14 = vmax.f32 %v2620_v30, 0.0  ;;  %v1919_v51 = vmul.f32 %v5149_v1, %v5149_v1  ;;  %v1759_v62 = vpop.f32.mrf.mxu3  ;;  %vm2305_vm14 = vmor %vm2303_vm13, %vm2304_vm12  ;;  %v2006_v50 = vsel %vm638_vm1, %v1924_v16, 0.0 }
 0x29f   : > { %v2299_v27 = vmul.f32 %v3273_v5, %v2298_v22  ;;  %v2136_v29 = vmax.f32 %v2104_v12, 0.0  ;;  %v2296_v63 = vsel %vm2295_vm11, %v3271_v15, %v2292_v9  ;;  %1832 = vadd.xlane.f32.xlu1 %v1831_v21  ;;  %v1926_v30 = vmul.f32 %v5184_v52, %v5184_v52 }
 0x2a0   : > { %v1815_v35 = vpop.xlane.xlu2 %1814  ;;  %v2549_v17 = vmul.f32 %v2517_v45, %v2296_v63  ;;  %v1991_v38 = vsel %vm638_vm1, %v1919_v51, 0.0  ;;  %v2519_v63 = vsub.f32 %v4826_v7, %v5106_v25  ;;  %v1852_v7 = vsel %vm638_vm1, %v5184_v52, 0.0 }
 0x2a1   : > { %v2300_v61 = vmul.f32 0.5, %v2299_v27  ;;  %1850 = vadd.xlane.f32.xlu0 %v1849_v46  ;;  %v5158_v24 = vadd.f32 1e-05, %v2136_v29  ;;  %v5161_v43 = vmul.f32 %v1815_v35, %v3727_v13  ;;  %v3275_v36 = vpop.eup %3274  ;;  %3086 = vmatmul.msk.f32.gmra.mxu2 %vm638_vm1, %v2652_v14  ;;  %v5212_v35 = vadd.f32 %v5036_v26, %v1759_v62 }
 0x2a2   : > { %v1975_v15 = vpop.xlane.xlu0 %1974  ;;  %v2585_v20 = vmul.f32 %v4955_v56, %v2549_v17  ;;  %v2308_v28 = vmul.f32 %v3275_v36, %v5137_v33  ;;  %v1738_v32 = vpop.f32.mrf.mxu1  ;;  %vm2314_vm15 = vweird.f32 %v3275_v36 }
 0x2a3   : > { %v2301_v10 = vsub.f32 1.5, %v2300_v61  ;;  %2010 = vadd.xlane.f32.xlu2 %v2009_v4  ;;  %3276 = vrsqrt.f32 %v5158_v24  ;;  %v2073_v3 = vmul.f32 %v5161_v43, %v5161_v43  ;;  %v5176_v53 = vadd.f32 %v5036_v26, %v1738_v32  ;;  %vm2315_vm2 = vmor %vm2313_vm0, %vm2314_vm15 }
 0x2a4   : > { %v2309_v37 = vmul.f32 %v3275_v36, %v2308_v28  ;;  %v2041_v40 = vmul.f32 %v1975_v15, %v3727_v13  ;;  %v2621_v54 = vadd.f32 %v4963_v57, %v2585_v20  ;;  %v2012_v20 = vsel %vm638_vm1, %v1926_v30, 0.0 }
 0x2a5   : > { %v2302_v0 = vmul.f32 %v3273_v5, %v2301_v10  ;;  %v1834_v19 = vsel %vm638_vm1, %v5176_v53, 0.0  ;;  %vm2323_vm4 = vweird.f32 %v5158_v24 }
 0x2a6   : > { %v2310_v47 = vmul.f32 0.5, %v2309_v37  ;;  %v2105_v6 = vsub.f32 %v2041_v40, %v2073_v3  ;;  %v2653_v39 = vmax.f32 %v2621_v54, 0.0  ;;  %v1762_v16 = vpop.f32.mrf.mxu3  ;;  %v1855_v3 = vsel %vm638_vm1, %v5212_v35, 0.0 }
 0x2a7   : > { %v2306_v48 = vsel %vm2305_vm14, %v3273_v5, %v2302_v0  ;;  %2007 = vadd.xlane.f32.xlu1 %v2006_v50  ;;  %v5221_v62 = vadd.f32 %v5036_v26, %v1762_v16 }
 0x2a8   : > { %v2550_v22 = vmul.f32 %v2518_v49, %v2306_v48  ;;  %v1818_v59 = vpop.xlane.xlu1 %1817  ;;  %v2311_v2 = vsub.f32 1.5, %v2310_v47  ;;  %v2137_v9 = vmax.f32 %v2105_v6, 0.0  ;;  %v1920_v47 = vmul.f32 %v5176_v53, %v5176_v53 }
 0x2a9   : > { %1992 = vadd.xlane.f32.xlu0 %v1991_v38  ;;  %v5190_v34 = vpop.eup %3276  ;;  %v5193_v12 = vmul.f32 %v1818_v59, %v3727_v13  ;;  %3087 = vmatmul.msk.f32.gmra.mxu2 %vm638_vm1, %v2653_v39  ;;  %v2520_v39 = vsub.f32 %v4848_v44, %v5133_v23  ;;  %v1928_v59 = vmul.f32 %v5221_v62, %v5221_v62 }
 0x2aa   : > { %v2586_v5 = vmul.f32 %v4955_v56, %v2550_v22  ;;  %v2318_v45 = vmul.f32 %v5190_v34, %v5158_v24  ;;  %v1978_v27 = vpop.xlane.xlu2 %1977  ;;  %v2312_v29 = vmul.f32 %v3275_v36, %v2311_v2  ;;  %v5202_v21 = vadd.f32 1e-05, %v2137_v9 }
 0x2ab   : > { %1835 = vadd.xlane.f32.xlu2 %v1834_v19  ;;  %v2074_v46 = vmul.f32 %v5193_v12, %v5193_v12  ;;  %v2042_v14 = vmul.f32 %v1978_v27, %v3727_v13  ;;  %vm2324_vm3 = vweird.f32 %v5190_v34  ;;  %v1741_v2 = vpop.f32.mrf.mxu1  ;;  %v1994_v24 = vsel %vm638_vm1, %v1920_v47, 0.0 }
 0x2ac   : > { %v2319_v61 = vmul.f32 %v5190_v34, %v2318_v45  ;;  %3278 = vrsqrt.f32 %v5202_v21  ;;  %v2622_v33 = vadd.f32 %v4963_v57, %v2586_v5  ;;  %v2316_v17 = vsel %vm2315_vm2, %v3275_v36, %v2312_v29  ;;  %vm2325_vm5 = vmor %vm2323_vm4, %vm2324_vm3 }
 0x2ad   : > { %v2106_v10 = vsub.f32 %v2042_v14, %v2074_v46  ;;  %v2551_v15 = vmul.f32 %v2519_v63, %v2316_v17  ;;  %v1858_v27 = vsel %vm638_vm1, %v5221_v62, 0.0  ;;  %v5251_v44 = vadd.f32 %v5036_v26, %v1741_v2 }
 0x2ae   : > { %v2320_v4 = vmul.f32 0.5, %v2319_v61  ;;  %v2654_v25 = vmax.f32 %v2622_v33, 0.0  ;;  %v2018_v46 = vsel %vm638_vm1, %v1928_v59, 0.0  ;;  %v1765_v14 = vpop.f32.mrf.mxu3  ;;  %v1927_v33 = vmul.f32 %v5212_v35, %v5212_v35 }
 0x2af   : > { %v2138_v28 = vmax.f32 %v2106_v10, 0.0  ;;  %1853 = vadd.xlane.f32.xlu1 %v1852_v7  ;;  %v2587_v0 = vmul.f32 %v4955_v56, %v2551_v15  ;;  %vm2333_vm7 = vweird.f32 %v5202_v21  ;;  %v2521_v10 = vsub.f32 %v4875_v18, %v5161_v43 }
 0x2b0   : > { %v2321_v51 = vsub.f32 1.5, %v2320_v4  ;;  %v1821_v32 = vpop.xlane.xlu0 %1820  ;;  %v1921_v7 = vmul.f32 %v5251_v44, %v5251_v44  ;;  %v2522_v47 = vsub.f32 %v4901_v60, %v5193_v12 }
 0x2b1   : > { %2013 = vadd.xlane.f32.xlu0 %v2012_v20  ;;  %v5224_v36 = vmul.f32 %v1821_v32, %v3727_v13  ;;  %v5230_v37 = vadd.f32 1e-05, %v2138_v28  ;;  %3088 = vmatmul.msk.f32.gmra.mxu2 %vm638_vm1, %v2654_v25  ;;  %v2623_v54 = vadd.f32 %v4963_v57, %v2587_v0  ;;  %v2015_v25 = vsel %vm638_vm1, %v1927_v33, 0.0 }
 0x2b2   : > { %v2322_v49 = vmul.f32 %v5190_v34, %v2321_v51  ;;  %v1981_v40 = vpop.xlane.xlu2 %1980  ;;  %v3279_v50 = vpop.eup %3278  ;;  %v5270_v28 = vadd.f32 %v5036_v26, %v1765_v14 }
 0x2b3   : > { %1856 = vadd.xlane.f32.xlu2 %v1855_v3  ;;  %v2075_v38 = vmul.f32 %v5224_v36, %v5224_v36  ;;  %v2043_v48 = vmul.f32 %v1981_v40, %v3727_v13  ;;  %v2328_v6 = vmul.f32 %v3279_v50, %v5202_v21  ;;  %3280 = vrsqrt.f32 %v5230_v37 }
 0x2b4   : > { %v2655_v9 = vmax.f32 %v2623_v54, 0.0  ;;  %v2326_v5 = vsel %vm2325_vm5, %v5190_v34, %v2322_v49  ;;  %vm2334_vm6 = vweird.f32 %v3279_v50  ;;  %v1837_v21 = vsel %vm638_vm1, %v5251_v44, 0.0 }
 0x2b5   : > { %v2107_v22 = vsub.f32 %v2043_v48, %v2075_v38  ;;  %v2329_v19 = vmul.f32 %v3279_v50, %v2328_v6  ;;  %v2552_v30 = vmul.f32 %v2520_v39, %v2326_v5  ;;  %vm2335_vm8 = vmor %vm2333_vm7, %vm2334_vm6  ;;  %v1997_v3 = vsel %vm638_vm1, %v1921_v7, 0.0  ;;  %v1744_v39 = vpop.f32.mrf.mxu1 }
 0x2b6   : > { %vm2343_vm10 = vweird.f32 %v5230_v37  ;;  %v1929_v48 = vmul.f32 %v5270_v28, %v5270_v28  ;;  %v1861_v5 = vsel %vm638_vm1, %v5270_v28, 0.0 }
 0x2b7   : > { %v2139_v45 = vmax.f32 %v2107_v22, 0.0  ;;  %v2330_v29 = vmul.f32 0.5, %v2329_v19  ;;  %1995 = vadd.xlane.f32.xlu1 %v1994_v24  ;;  %v2588_v63 = vmul.f32 %v4955_v56, %v2552_v30  ;;  %v1768_v54 = vpop.f32.mrf.mxu3  ;;  %v2523_v30 = vsub.f32 %v4928_v41, %v5224_v36 }
 0x2b8   : > { %v5285_v22 = vadd.f32 %v5036_v26, %v1768_v54 }
 0x2b9   : > { %1859 = vadd.xlane.f32.xlu0 %v1858_v27  ;;  %v5253_v23 = vadd.f32 1e-05, %v2139_v45  ;;  %v3281_v34 = vpop.eup %3280  ;;  %v2331_v61 = vsub.f32 1.5, %v2330_v29  ;;  %3089 = vmatmul.msk.f32.gmra.mxu2 %vm638_vm1, %v2655_v9  ;;  %v2624_v16 = vadd.f32 %v4963_v57, %v2588_v63  ;;  %v2021_v45 = vsel %vm638_vm1, %v1929_v48, 0.0 }
 0x2ba   : > { %v2338_v17 = vmul.f32 %v3281_v34, %v5230_v37  ;;  %vm2344_vm9 = vweird.f32 %v3281_v34  ;;  %v5288_v37 = vadd.f32 %v5036_v26, %v1744_v39  ;;  %v1864_v12 = vsel %vm638_vm1, %v5285_v22, 0.0 }
 0x2bb   : > { %2019 = vadd.xlane.f32.xlu2 %v2018_v46  ;;  %3282 = vrsqrt.f32 %v5253_v23  ;;  %v2332_v4 = vmul.f32 %v3279_v50, %v2331_v61  ;;  %v2656_v20 = vmax.f32 %v2624_v16, 0.0  ;;  %vm2345_vm11 = vmor %vm2343_vm10, %vm2344_vm9  ;;  %vm2353_vm13 = vweird.f32 %v5253_v23 }
 0x2bc   : > { %v2339_v15 = vmul.f32 %v3281_v34, %v2338_v17  ;;  %v1922_v29 = vmul.f32 %v5288_v37, %v5288_v37  ;;  %v1930_v36 = vmul.f32 %v5285_v22, %v5285_v22  ;;  %v5317_v17 = vld [vmem:[%s5774_s10] ss:$0 sm:$0xff] }
 0x2bd   : > { %v2336_v51 = vsel %vm2335_vm8, %v3279_v50, %v2332_v4 }
 0x2be   : > { %v2340_v32 = vmul.f32 0.5, %v2339_v15  ;;  %v2553_v0 = vmul.f32 %v2521_v10, %v2336_v51  ;;  %v2000_v61 = vsel %vm638_vm1, %v1922_v29, 0.0 }
 0x2bf   : > { %2016 = vadd.xlane.f32.xlu1 %v2015_v25 }
 0x2c0   : > { %v2341_v43 = vsub.f32 1.5, %v2340_v32  ;;  %v2589_v49 = vmul.f32 %v4955_v56, %v2553_v0 }
 0x2c1   : > { %1838 = vadd.xlane.f32.xlu0 %v1837_v21  ;;  %v3283_v18 = vpop.eup %3282  ;;  %3090 = vmatmul.msk.f32.gmra.mxu2 %vm638_vm1, %v2656_v20 }
 0x2c2   : > { %v2348_v40 = vmul.f32 %v3283_v18, %v5253_v23  ;;  %v2342_v50 = vmul.f32 %v3281_v34, %v2341_v43  ;;  %v2625_v38 = vadd.f32 %v4963_v57, %v2589_v49  ;;  %vm2354_vm12 = vweird.f32 %v3283_v18 }
 0x2c3   : > { %1998 = vadd.xlane.f32.xlu2 %v1997_v3  ;;  %vm2355_vm14 = vmor %vm2353_vm13, %vm2354_vm12  ;;  %v1840_v23 = vsel %vm638_vm1, %v5288_v37, 0.0 }
 0x2c4   : > { %v2349_v6 = vmul.f32 %v3283_v18, %v2348_v40  ;;  %v2346_v59 = vsel %vm2345_vm11, %v3281_v34, %v2342_v50  ;;  %v2657_v2 = vmax.f32 %v2625_v38, 0.0 }
 0x2c5   : > { %v2554_v9 = vmul.f32 %v2522_v47, %v2346_v59 }
 0x2c6   : > { %v2350_v19 = vmul.f32 0.5, %v2349_v6 }
 0x2c7   : > { %1862 = vadd.xlane.f32.xlu1 %v1861_v5  ;;  %v2590_v60 = vmul.f32 %v4955_v56, %v2554_v9 }
 0x2c8   : > { %v2351_v24 = vsub.f32 1.5, %v2350_v19 }
 0x2c9   : > { %2022 = vadd.xlane.f32.xlu0 %v2021_v45  ;;  %3091 = vmatmul.msk.f32.gmra.mxu2 %vm638_vm1, %v2657_v2  ;;  %v2626_v26 = vadd.f32 %v4963_v57, %v2590_v60 }
 0x2ca   : > { %v2352_v27 = vmul.f32 %v3283_v18, %v2351_v24 }
 0x2cb   : > { %1865 = vadd.xlane.f32.xlu2 %v1864_v12  ;;  %v2658_v34 = vmax.f32 %v2626_v26, 0.0 }
 0x2cc   : > { %v2356_v46 = vsel %vm2355_vm14, %v3283_v18, %v2352_v27 }
 0x2cd   : > { %v2555_v63 = vmul.f32 %v2523_v30, %v2356_v46 }
 0x2cf   : > { %v2591_v14 = vmul.f32 %v4955_v56, %v2555_v63  ;;  %1841 = vadd.xlane.f32.xlu1 %v1840_v23  ;;  %v2024_v56 = vsel %vm638_vm1, %v1930_v36, 0.0 }
 0x2d1   : > { %2001 = vadd.xlane.f32.xlu0 %v2000_v61  ;;  %3092 = vmatmul.msk.f32.gmra.mxu2 %vm638_vm1, %v2658_v34  ;;  %v2627_v41 = vadd.f32 %v4963_v57, %v2591_v14 }
 0x2d3   : > { %v2659_v33 = vmax.f32 %v2627_v41, 0.0 }
 0x2d7   : > { %2025 = vadd.xlane.f32.xlu1 %v2024_v56 }
 0x2d8   : > { %v2800_v4 = vpop.f32.mrf.mxu2 }
 0x2d9   : > { %3093 = vmatmul.msk.f32.gmra.mxu2 %vm638_vm1, %v2659_v33  ;;  %v2801_v57 = vadd.f32 %v5317_v17, %v2800_v4 }
 0x2db   : > { %2896 = vst [vmem:[%s5322_s25] sm:$0xff] %v2801_v57 }
 0x2e0   : > { %v2803_v16 = vpop.f32.mrf.mxu2 }
 0x2e1   : > { %v2804_v10 = vadd.f32 %v5317_v17, %v2803_v16 }
 0x2e3   : > { %2897 = vst [vmem:[%s5322_s25 + $0x8] sm:$0xff] %v2804_v10 }
 0x2e8   : > { %v2806_v15 = vpop.f32.mrf.mxu2 }
 0x2e9   : > { %v2807_v7 = vadd.f32 %v5317_v17, %v2806_v15 }
 0x2eb   : > { %2898 = vst [vmem:[%s5322_s25 + $0x10] sm:$0xff] %v2807_v7 }
 0x2f0   : > { %v2809_v20 = vpop.f32.mrf.mxu2 }
 0x2f1   : > { %v2810_v32 = vadd.f32 %v5317_v17, %v2809_v20 }
 0x2f3   : > { %v1824_v25 = vpop.xlane.xlu1 %1823  ;;  %2899 = vst [vmem:[%s5322_s25 + $0x18] sm:$0xff] %v2810_v32 }
 0x2f4   : > { %v1884_v51 = vmul.f32 %v1824_v25, %v3727_v13 }
 0x2f5   : > { %v1984_v21 = vpop.xlane.xlu0 %1983 }
 0x2f6   : > { %v2076_v0 = vmul.f32 %v1884_v51, %v1884_v51  ;;  %v2044_v18 = vmul.f32 %v1984_v21, %v3727_v13  ;;  %v2524_v16 = vsub.f32 %v5039_v55, %v1884_v51 }
 0x2f8   : > { %v2108_v43 = vsub.f32 %v2044_v18, %v2076_v0 }
 0x2f9   : > { %v2812_v49 = vpop.f32.mrf.mxu2 }
 0x2fa   : > { %v2140_v3 = vmax.f32 %v2108_v43, 0.0  ;;  %v2813_v50 = vadd.f32 %v5317_v17, %v2812_v49  ;;  %v5364_v43 = vld [vmem:[%s5771_s7] ss:$0 sm:$0xff] }
 0x2fb   : > { %v1827_v54 = vpop.xlane.xlu2 %1826 }
 0x2fc   : > { %v2172_v40 = vadd.f32 1e-05, %v2140_v3  ;;  %v5335_v38 = vmul.f32 %v1827_v54, %v3727_v13  ;;  %2900 = vst [vmem:[%s5322_s25 + $0x20] sm:$0xff] %v2813_v50  ;;  %v5372_v54 = vld [vmem:[%s5772_s8] ss:$0 sm:$0xff] }
 0x2fd   : > { %v1987_v48 = vpop.xlane.xlu1 %1986 }
 0x2fe   : > { %3284 = vrsqrt.f32 %v2172_v40  ;;  %v2077_v47 = vmul.f32 %v5335_v38, %v5335_v38  ;;  %v2045_v6 = vmul.f32 %v1987_v48, %v3727_v13  ;;  %vm2363_vm0 = vweird.f32 %v2172_v40 }
 0x300   : > { %v2109_v39 = vsub.f32 %v2045_v6, %v2077_v47 }
 0x301   : > { %v2815_v2 = vpop.f32.mrf.mxu2 }
 0x302   : > { %v2141_v59 = vmax.f32 %v2109_v39, 0.0  ;;  %v2816_v24 = vadd.f32 %v5317_v17, %v2815_v2 }
 0x304   : > { %v3285_v19 = vpop.eup %3284  ;;  %v1830_v9 = vpop.xlane.xlu0 %1829  ;;  %v2173_v45 = vadd.f32 1e-05, %v2141_v59  ;;  %2901 = vst [vmem:[%s5322_s25 + $0x28] sm:$0xff] %v2816_v24 }
 0x305   : > { %v2358_v5 = vmul.f32 %v3285_v19, %v2172_v40  ;;  %v1845_v60 = vpop.xlane.xlu1 %1844  ;;  %v5343_v12 = vmul.f32 %v1830_v9, %v3727_v13  ;;  %vm2364_vm15 = vweird.f32 %v3285_v19  ;;  %v2525_v9 = vsub.f32 %v5066_v58, %v5335_v38 }
 0x306   : > { %v1990_v27 = vpop.xlane.xlu2 %1989  ;;  %3286 = vrsqrt.f32 %v2173_v45  ;;  %v5350_v63 = vmul.f32 %v1845_v60, %v3727_v13  ;;  %vm2365_vm2 = vmor %vm2363_vm0, %vm2364_vm15  ;;  %vm2373_vm4 = vweird.f32 %v2173_v45 }
 0x307   : > { %v2359_v26 = vmul.f32 %v3285_v19, %v2358_v5  ;;  %v2078_v30 = vmul.f32 %v5343_v12, %v5343_v12  ;;  %v2046_v29 = vmul.f32 %v1990_v27, %v3727_v13 }
 0x308   : > { %v2083_v56 = vmul.f32 %v5350_v63, %v5350_v63 }
 0x309   : > { %v2360_v46 = vmul.f32 0.5, %v2359_v26  ;;  %v2110_v34 = vsub.f32 %v2046_v29, %v2078_v30  ;;  %v2818_v14 = vpop.f32.mrf.mxu2 }
 0x30a   : > { %v2819_v4 = vadd.f32 %v5317_v17, %v2818_v14 }
 0x30b   : > { %v2361_v23 = vsub.f32 1.5, %v2360_v46  ;;  %v2142_v61 = vmax.f32 %v2110_v34, 0.0 }
 0x30c   : > { %v2005_v41 = vpop.xlane.xlu0 %2004  ;;  %v3287_v36 = vpop.eup %3286  ;;  %2902 = vst [vmem:[%s5322_s25 + $0x30] sm:$0xff] %v2819_v4 }
 0x30d   : > { %v2362_v33 = vmul.f32 %v3285_v19, %v2361_v23  ;;  %v2051_v57 = vmul.f32 %v2005_v41, %v3727_v13  ;;  %v2368_v10 = vmul.f32 %v3287_v36, %v2173_v45  ;;  %v5357_v15 = vadd.f32 1e-05, %v2142_v61 }
 0x30e   : > { %v1848_v7 = vpop.xlane.xlu2 %1847  ;;  %vm2374_vm3 = vweird.f32 %v3287_v36 }
 0x30f   : > { %v2115_v25 = vsub.f32 %v2051_v57, %v2083_v56  ;;  %v2366_v20 = vsel %vm2365_vm2, %v3285_v19, %v2362_v33  ;;  %v2369_v32 = vmul.f32 %v3287_v36, %v2368_v10  ;;  %3288 = vrsqrt.f32 %v5357_v15  ;;  %vm2375_vm5 = vmor %vm2373_vm4, %vm2374_vm3 }
 0x310   : > { %v2556_v21 = vmul.f32 %v2524_v16, %v2366_v20  ;;  %v5386_v24 = vmul.f32 %v1848_v7, %v3727_v13  ;;  %vm2383_vm7 = vweird.f32 %v5357_v15 }
 0x311   : > { %v2147_v0 = vmax.f32 %v2115_v25, 0.0  ;;  %v2370_v18 = vmul.f32 0.5, %v2369_v32 }
 0x312   : > { %v2592_v55 = vmul.f32 %v5364_v43, %v2556_v21  ;;  %v1833_v49 = vpop.xlane.xlu1 %1832  ;;  %v2821_v40 = vpop.f32.mrf.mxu2  ;;  %v2084_v61 = vmul.f32 %v5386_v24, %v5386_v24 }
 0x313   : > { %v5367_v51 = vadd.f32 1e-05, %v2147_v0  ;;  %v2371_v3 = vsub.f32 1.5, %v2370_v18  ;;  %v2822_v48 = vadd.f32 %v5317_v17, %v2821_v40  ;;  %v5393_v58 = vmul.f32 %v1833_v49, %v3727_v13 }
 0x314   : > { %v2628_v50 = vadd.f32 %v5372_v54, %v2592_v55  ;;  %v1851_v47 = vpop.xlane.xlu0 %1850  ;;  %v2526_v55 = vsub.f32 %v5093_v11, %v5343_v12 }
 0x315   : > { %3290 = vrsqrt.f32 %v5367_v51  ;;  %v3289_v6 = vpop.eup %3288  ;;  %v2372_v39 = vmul.f32 %v3287_v36, %v2371_v3  ;;  %v5378_v59 = vmul.f32 %v1851_v47, %v3727_v13  ;;  %2903 = vst [vmem:[%s5322_s25 + $0x38] sm:$0xff] %v2822_v48  ;;  %v2079_v7 = vmul.f32 %v5393_v58, %v5393_v58 }
 0x316   : > { %v2011_v19 = vpop.xlane.xlu2 %2010  ;;  %v2660_v2 = vmax.f32 %v2628_v50, 0.0  ;;  %v2378_v5 = vmul.f32 %v3289_v6, %v5357_v15  ;;  %vm2384_vm6 = vweird.f32 %v3289_v6  ;;  %vm2433_vm10 = vweird.f32 %v5367_v51 }
 0x317   : > { %v2085_v60 = vmul.f32 %v5378_v59, %v5378_v59  ;;  %v2053_v45 = vmul.f32 %v2011_v19, %v3727_v13  ;;  %v2376_v27 = vsel %vm2375_vm5, %v3287_v36, %v2372_v39  ;;  %vm2385_vm8 = vmor %vm2383_vm7, %vm2384_vm6 }
 0x318   : > { %3094 = vmatmul.msk.f32.gmra.mxu2 %vm638_vm1, %v2660_v2  ;;  %v2379_v26 = vmul.f32 %v3289_v6, %v2378_v5  ;;  %v2557_v30 = vmul.f32 %v2525_v9, %v2376_v27  ;;  %v2531_v9 = vsub.f32 %v5083_v42, %v5350_v63 }
 0x319   : > { %v2117_v38 = vsub.f32 %v2053_v45, %v2085_v60 }
 0x31a   : > { %v2380_v46 = vmul.f32 0.5, %v2379_v26  ;;  %v2593_v34 = vmul.f32 %v5364_v43, %v2557_v30  ;;  %v2008_v41 = vpop.xlane.xlu1 %2007 }
 0x31b   : > { %v3291_v29 = vpop.eup %3290  ;;  %v2149_v14 = vmax.f32 %v2117_v38, 0.0  ;;  %v2052_v56 = vmul.f32 %v2008_v41, %v3727_v13 }
 0x31c   : > { %v2428_v23 = vmul.f32 %v3291_v29, %v5367_v51  ;;  %v2824_v36 = vpop.f32.mrf.mxu2  ;;  %v2381_v33 = vsub.f32 1.5, %v2380_v46  ;;  %v1993_v57 = vpop.xlane.xlu0 %1992  ;;  %v2629_v16 = vadd.f32 %v5372_v54, %v2593_v34  ;;  %vm2434_vm9 = vweird.f32 %v3291_v29 }
 0x31d   : > { %v2825_v4 = vadd.f32 %v5317_v17, %v2824_v36  ;;  %v5404_v25 = vadd.f32 1e-05, %v2149_v14  ;;  %v2047_v20 = vmul.f32 %v1993_v57, %v3727_v13  ;;  %v2116_v0 = vsub.f32 %v2052_v56, %v2084_v61  ;;  %vm2435_vm11 = vmor %vm2433_vm10, %vm2434_vm9 }
 0x31e   : > { %v2429_v10 = vmul.f32 %v3291_v29, %v2428_v23  ;;  %v1836_v32 = vpop.xlane.xlu2 %1835  ;;  %v2382_v21 = vmul.f32 %v3289_v6, %v2381_v33  ;;  %v2661_v18 = vmax.f32 %v2629_v16, 0.0 }
 0x31f   : > { %2904 = vst [vmem:[%s5322_s25 + $0x40] sm:$0xff] %v2825_v4  ;;  %3292 = vrsqrt.f32 %v5404_v25  ;;  %v2111_v49 = vsub.f32 %v2047_v20, %v2079_v7  ;;  %v2148_v40 = vmax.f32 %v2116_v0, 0.0  ;;  %v5439_v23 = vmul.f32 %v1836_v32, %v3727_v13 }
 0x320   : > { %v2430_v3 = vmul.f32 0.5, %v2429_v10  ;;  %3095 = vmatmul.msk.f32.gmra.mxu2 %vm638_vm1, %v2661_v18  ;;  %v2386_v50 = vsel %vm2385_vm8, %v3289_v6, %v2382_v21  ;;  %vm2453_vm12 = vweird.f32 %v5404_v25 }
 0x321   : > { %v2143_v47 = vmax.f32 %v2111_v49, 0.0  ;;  %v2558_v15 = vmul.f32 %v2526_v55, %v2386_v50  ;;  %v5414_v39 = vadd.f32 1e-05, %v2148_v40  ;;  %v2080_v7 = vmul.f32 %v5439_v23, %v5439_v23 }
 0x322   : > { %v2431_v48 = vsub.f32 1.5, %v2430_v3  ;;  %v1854_v12 = vpop.xlane.xlu1 %1853 }
 0x323   : > { %v5417_v11 = vadd.f32 1e-05, %v2143_v47  ;;  %v2594_v2 = vmul.f32 %v5364_v43, %v2558_v15  ;;  %3294 = vrsqrt.f32 %v5414_v39  ;;  %v5424_v6 = vmul.f32 %v1854_v12, %v3727_v13 }
 0x324   : > { %v2432_v19 = vmul.f32 %v3291_v29, %v2431_v48  ;;  %v2014_v5 = vpop.xlane.xlu0 %2013  ;;  %v2827_v51 = vpop.f32.mrf.mxu2  ;;  %vm2443_vm13 = vweird.f32 %v5414_v39 }
 0x325   : > { %v5426_v60 = vpop.eup %3292  ;;  %3296 = vrsqrt.f32 %v5417_v11  ;;  %v2054_v27 = vmul.f32 %v2014_v5, %v3727_v13  ;;  %v2086_v63 = vmul.f32 %v5424_v6, %v5424_v6  ;;  %v2828_v38 = vadd.f32 %v5317_v17, %v2827_v51 }
 0x326   : > { %v2436_v45 = vsel %vm2435_vm11, %v3291_v29, %v2432_v19  ;;  %v1857_v26 = vpop.xlane.xlu2 %1856  ;;  %v2448_v42 = vmul.f32 %v5426_v60, %v5404_v25  ;;  %v2630_v46 = vadd.f32 %v5372_v54, %v2594_v2  ;;  %v2532_v19 = vsub.f32 %v5123_v31, %v5386_v24 }
 0x327   : > { %v2563_v30 = vmul.f32 %v2531_v9, %v2436_v45  ;;  %v2118_v61 = vsub.f32 %v2054_v27, %v2086_v63  ;;  %2905 = vst [vmem:[%s5322_s25 + $0x48] sm:$0xff] %v2828_v38  ;;  %v5470_v2 = vmul.f32 %v1857_v26, %v3727_v13  ;;  %vm2393_vm15 = vweird.f32 %v5417_v11 }
 0x328   : > { %v2449_v29 = vmul.f32 %v5426_v60, %v2448_v42  ;;  %v2662_v14 = vmax.f32 %v2630_v46, 0.0  ;;  %vm2454_vm2 = vweird.f32 %v5426_v60 }
 0x329   : > { %v2599_v34 = vmul.f32 %v5364_v43, %v2563_v30  ;;  %v5442_v41 = vpop.eup %3294  ;;  %v2150_v36 = vmax.f32 %v2118_v61, 0.0  ;;  %v2087_v38 = vmul.f32 %v5470_v2, %v5470_v2  ;;  %vm5529_vm5 = vmor %vm2453_vm12, %vm2454_vm2 }
 0x32a   : > { %v2438_v4 = vmul.f32 %v5442_v41, %v5414_v39  ;;  %3096 = vmatmul.msk.f32.gmra.mxu2 %vm638_vm1, %v2662_v14  ;;  %v1996_v57 = vpop.xlane.xlu1 %1995  ;;  %v2450_v16 = vmul.f32 0.5, %v2449_v29  ;;  %vm2444_vm14 = vweird.f32 %v5442_v41 }
 0x32b   : > { %v2635_v33 = vadd.f32 %v5372_v54, %v2599_v34  ;;  %v5445_v56 = vpop.eup %3296  ;;  %v5454_v20 = vadd.f32 1e-05, %v2150_v36  ;;  %v2048_v0 = vmul.f32 %v1996_v57, %v3727_v13  ;;  %vm5494_vm3 = vmor %vm2443_vm13, %vm2444_vm14 }
 0x32c   : > { %v2388_v10 = vmul.f32 %v5445_v56, %v5417_v11  ;;  %v1860_v32 = vpop.xlane.xlu0 %1859  ;;  %v2439_v21 = vmul.f32 %v5442_v41, %v2438_v4  ;;  %v2830_v18 = vpop.f32.mrf.mxu2  ;;  %v2451_v5 = vsub.f32 1.5, %v2450_v16  ;;  %vm2394_vm0 = vweird.f32 %v5445_v56 }
 0x32d   : > { %v5459_v55 = vmul.f32 %v1860_v32, %v3727_v13  ;;  %v2667_v49 = vmax.f32 %v2635_v33, 0.0  ;;  %3298 = vrsqrt.f32 %v5454_v20  ;;  %v2112_v48 = vsub.f32 %v2048_v0, %v2080_v7  ;;  %vm5505_vm4 = vmor %vm2393_vm15, %vm2394_vm0 }
 0x32e   : > { %v2020_v3 = vpop.xlane.xlu2 %2019  ;;  %v2389_v40 = vmul.f32 %v5445_v56, %v2388_v10  ;;  %v2440_v50 = vmul.f32 0.5, %v2439_v21  ;;  %v2831_v47 = vadd.f32 %v5317_v17, %v2830_v18  ;;  %v2452_v61 = vmul.f32 %v5426_v60, %v2451_v5 }
 0x32f   : > { %v2088_v15 = vmul.f32 %v5459_v55, %v5459_v55  ;;  %3101 = vmatmul.msk.f32.vlgmr.msra.gmra.mxu3 %vm638_vm1, %v2667_v49  ;;  %v2056_v9 = vmul.f32 %v2020_v3, %v3727_v13  ;;  %v2144_v51 = vmax.f32 %v2112_v48, 0.0  ;;  %v2527_v18 = vsub.f32 %v5149_v1, %v5393_v58 }
 0x330   : > { %v2390_v12 = vmul.f32 0.5, %v2389_v40  ;;  %v2441_v45 = vsub.f32 1.5, %v2440_v50  ;;  %2906 = vst [vmem:[%s5322_s25 + $0x50] sm:$0xff] %v2831_v47  ;;  %v2456_v1 = vsel %vm5529_vm5, %v5426_v60, %v2452_v61  ;;  %v2533_v58 = vsub.f32 %v5129_v8, %v5378_v59 }
 0x331   : > { %v2120_v30 = vsub.f32 %v2056_v9, %v2088_v15  ;;  %v5480_v24 = vadd.f32 1e-05, %v2144_v51  ;;  %v2534_v61 = vsub.f32 %v5184_v52, %v5424_v6  ;;  %vm2463_vm8 = vweird.f32 %v5454_v20 }
 0x332   : > { %v2391_v27 = vsub.f32 1.5, %v2390_v12  ;;  %v2442_v31 = vmul.f32 %v5442_v41, %v2441_v45  ;;  %v2017_v26 = vpop.xlane.xlu1 %2016  ;;  %v2565_v5 = vmul.f32 %v2533_v58, %v2456_v1 }
 0x333   : > { %v5482_v42 = vpop.eup %3298  ;;  %v2152_v46 = vmax.f32 %v2120_v30, 0.0  ;;  %v2055_v34 = vmul.f32 %v2017_v26, %v3727_v13  ;;  %3300 = vrsqrt.f32 %v5480_v24  ;;  %vm2403_vm9 = vweird.f32 %v5480_v24 }
 0x334   : > { %v2392_v63 = vmul.f32 %v5445_v56, %v2391_v27  ;;  %v1839_v29 = vpop.xlane.xlu0 %1838  ;;  %v2458_v36 = vmul.f32 %v5482_v42, %v5454_v20  ;;  %v2833_v33 = vpop.f32.mrf.mxu2  ;;  %v2446_v11 = vsel %vm5494_vm3, %v5442_v41, %v2442_v31  ;;  %vm2464_vm6 = vweird.f32 %v5482_v42 }
 0x335   : > { %v5509_v39 = vadd.f32 1e-05, %v2152_v46  ;;  %v2119_v16 = vsub.f32 %v2055_v34, %v2087_v38  ;;  %v2834_v10 = vadd.f32 %v5317_v17, %v2833_v33  ;;  %v5513_v7 = vmul.f32 %v1839_v29, %v3727_v13  ;;  %vm5587_vm10 = vmor %vm2463_vm8, %vm2464_vm6 }
 0x336   : > { %v1999_v4 = vpop.xlane.xlu2 %1998  ;;  %v2459_v32 = vmul.f32 %v5482_v42, %v2458_v36  ;;  %v2396_v0 = vsel %vm5505_vm4, %v5445_v56, %v2392_v63  ;;  %v2564_v56 = vmul.f32 %v2532_v19, %v2446_v11  ;;  %v2528_v38 = vsub.f32 %v5176_v53, %v5439_v23 }
 0x337   : > { %v2049_v21 = vmul.f32 %v1999_v4, %v3727_v13  ;;  %3302 = vrsqrt.f32 %v5509_v39  ;;  %v2151_v49 = vmax.f32 %v2119_v16, 0.0  ;;  %2907 = vst [vmem:[%s5322_s25 + $0x58] sm:$0xff] %v2834_v10  ;;  %v2081_v41 = vmul.f32 %v5513_v7, %v5513_v7 }
 0x338   : > { %v2460_v40 = vmul.f32 0.5, %v2459_v32  ;;  %v2559_v48 = vmul.f32 %v2527_v18, %v2396_v0  ;;  %v2600_v12 = vmul.f32 %v5364_v43, %v2564_v56  ;;  %v2601_v33 = vmul.f32 %v5364_v43, %v2565_v5 }
 0x339   : > { %v5542_v25 = vadd.f32 1e-05, %v2151_v49  ;;  %v2113_v50 = vsub.f32 %v2049_v21, %v2081_v41  ;;  %v5544_v47 = vpop.eup %3300  ;;  %vm2483_vm13 = vweird.f32 %v5509_v39  ;;  %v2536_v49 = vsub.f32 %v5221_v62, %v5459_v55 }
 0x33a   : > { %v1863_v15 = vpop.xlane.xlu1 %1862  ;;  %v2398_v9 = vmul.f32 %v5544_v47, %v5480_v24  ;;  %v2461_v60 = vsub.f32 1.5, %v2460_v40  ;;  %v2636_v26 = vadd.f32 %v5372_v54, %v2600_v12  ;;  %v2595_v63 = vmul.f32 %v5364_v43, %v2559_v48 }
 0x33b   : > { %3304 = vrsqrt.f32 %v5542_v25  ;;  %v2145_v45 = vmax.f32 %v2113_v50, 0.0  ;;  %v5551_v8 = vmul.f32 %v1863_v15, %v3727_v13  ;;  %vm2404_vm7 = vweird.f32 %v5544_v47 }
 0x33c   : > { %v2023_v19 = vpop.xlane.xlu0 %2022  ;;  %v2836_v59 = vpop.f32.mrf.mxu2  ;;  %v2399_v30 = vmul.f32 %v5544_v47, %v2398_v9  ;;  %v2668_v36 = vmax.f32 %v2636_v26, 0.0  ;;  %v2462_v57 = vmul.f32 %v5482_v42, %v2461_v60  ;;  %v2631_v52 = vadd.f32 %v5372_v54, %v2595_v63  ;;  %vm5598_vm11 = vmor %vm2403_vm9, %vm2404_vm7 }
 0x33d   : > { %v2057_v51 = vmul.f32 %v2023_v19, %v3727_v13  ;;  %v5554_v27 = vpop.eup %3302  ;;  %v2837_v31 = vadd.f32 %v5317_v17, %v2836_v59  ;;  %v5564_v34 = vadd.f32 1e-05, %v2145_v45  ;;  %v2089_v29 = vmul.f32 %v5551_v8, %v5551_v8 }
 0x33e   : > { %v2478_v46 = vmul.f32 %v5554_v27, %v5509_v39  ;;  %v2400_v14 = vmul.f32 0.5, %v2399_v30  ;;  %3102 = vmatmul.msk.f32.gmra.mxu3 %vm638_vm1, %v2668_v36  ;;  %v1866_v0 = vpop.xlane.xlu2 %1865  ;;  %v2663_v18 = vmax.f32 %v2631_v52, 0.0  ;;  %v2637_v24 = vadd.f32 %v5372_v54, %v2601_v33 }
 0x33f   : > { %2908 = vst [vmem:[%s5322_s25 + $0x60] sm:$0xff] %v2837_v31  ;;  %3306 = vrsqrt.f32 %v5564_v34  ;;  %v2121_v23 = vsub.f32 %v2057_v51, %v2089_v29  ;;  %v2466_v12 = vsel %vm5587_vm10, %v5482_v42, %v2462_v57  ;;  %v2535_v19 = vsub.f32 %v5212_v35, %v5470_v2 }
 0x340   : > { %v2479_v53 = vmul.f32 %v5554_v27, %v2478_v46  ;;  %v2401_v16 = vsub.f32 1.5, %v2400_v14  ;;  %3097 = vmatmul.msk.f32.gmra.mxu2 %vm638_vm1, %v2663_v18  ;;  %v5620_v60 = vmul.f32 %v1866_v0, %v3727_v13  ;;  %v2669_v51 = vmax.f32 %v2637_v24, 0.0 }
 0x341   : > { %v5575_v4 = vpop.eup %3304  ;;  %v2153_v10 = vmax.f32 %v2121_v23, 0.0  ;;  %v2566_v42 = vmul.f32 %v2534_v61, %v2466_v12  ;;  %vm2484_vm14 = vweird.f32 %v5554_v27  ;;  %vm2473_vm15 = vweird.f32 %v5542_v25 }
 0x342   : > { %v2468_v6 = vmul.f32 %v5575_v4, %v5542_v25  ;;  %v1842_v32 = vpop.xlane.xlu1 %1841  ;;  %v2402_v11 = vmul.f32 %v5544_v47, %v2401_v16  ;;  %v2480_v41 = vmul.f32 0.5, %v2479_v53  ;;  %vm2474_vm12 = vweird.f32 %v5575_v4  ;;  %vm5655_vm4 = vmor %vm2483_vm13, %vm2484_vm14 }
 0x343   : > { %v5593_v3 = vmul.f32 %v1842_v32, %v3727_v13  ;;  %v5603_v56 = vadd.f32 1e-05, %v2153_v10  ;;  %v2602_v46 = vmul.f32 %v5364_v43, %v2566_v42  ;;  %vm5632_vm0 = vmor %vm2473_vm15, %vm2474_vm12  ;;  %v2090_v25 = vmul.f32 %v5620_v60, %v5620_v60 }
 0x344   : > { %v2002_v20 = vpop.xlane.xlu0 %2001  ;;  %v2469_v40 = vmul.f32 %v5575_v4, %v2468_v6  ;;  %v2839_v1 = vpop.f32.mrf.mxu2  ;;  %v2406_v15 = vsel %vm5598_vm11, %v5544_v47, %v2402_v11  ;;  %v2481_v30 = vsub.f32 1.5, %v2480_v41  ;;  %vm2413_vm3 = vweird.f32 %v5564_v34 }
 0x345   : > { %v2050_v58 = vmul.f32 %v2002_v20, %v3727_v13  ;;  %v2082_v50 = vmul.f32 %v5593_v3, %v5593_v3  ;;  %v2840_v48 = vadd.f32 %v5317_v17, %v2839_v1  ;;  %v3307_v9 = vpop.eup %3306  ;;  %3308 = vrsqrt.f32 %v5603_v56 }
 0x346   : > { %v2470_v5 = vmul.f32 0.5, %v2469_v40  ;;  %v2408_v45 = vmul.f32 %v3307_v9, %v5564_v34  ;;  %v2560_v47 = vmul.f32 %v2528_v38, %v2406_v15  ;;  %3103 = vmatmul.msk.f32.gmra.mxu3 %vm638_vm1, %v2669_v51  ;;  %v2482_v23 = vmul.f32 %v5554_v27, %v2481_v30 }
 0x347   : > { %2909 = vst [vmem:[%s5322_s25 + $0x68] sm:$0xff] %v2840_v48  ;;  %v2114_v59 = vsub.f32 %v2050_v58, %v2082_v50  ;;  %v2638_v16 = vadd.f32 %v5372_v54, %v2602_v46  ;;  %vm2414_vm2 = vweird.f32 %v3307_v9  ;;  %v2529_v24 = vsub.f32 %v5251_v44, %v5513_v7 }
 0x348   : > { %v2471_v31 = vsub.f32 1.5, %v2470_v5  ;;  %v2409_v35 = vmul.f32 %v3307_v9, %v2408_v45  ;;  %v2596_v26 = vmul.f32 %v5364_v43, %v2560_v47  ;;  %vm2415_vm5 = vmor %vm2413_vm3, %vm2414_vm2  ;;  %v2486_v39 = vsel %vm5655_vm4, %v5554_v27, %v2482_v23 }
 0x349   : > { %v2146_v2 = vmax.f32 %v2114_v59, 0.0  ;;  %v2670_v18 = vmax.f32 %v2638_v16, 0.0  ;;  %v2568_v15 = vmul.f32 %v2536_v49, %v2486_v39  ;;  %vm2493_vm7 = vweird.f32 %v5603_v56 }
 0x34a   : > { %v2472_v63 = vmul.f32 %v5575_v4, %v2471_v31  ;;  %v2026_v38 = vpop.xlane.xlu1 %2025  ;;  %v2410_v61 = vmul.f32 0.5, %v2409_v35  ;;  %v2632_v33 = vadd.f32 %v5372_v54, %v2596_v26  ;;  %v2537_v30 = vsub.f32 %v5270_v28, %v5551_v8 }
 0x34b   : > { %v5636_v14 = vadd.f32 1e-05, %v2146_v2  ;;  %v2058_v36 = vmul.f32 %v2026_v38, %v3727_v13  ;;  %v3309_v53 = vpop.eup %3308  ;;  %v2604_v59 = vmul.f32 %v5364_v43, %v2568_v15  ;;  %v2530_v28 = vsub.f32 %v5288_v37, %v5593_v3 }
 0x34c   : > { %v2842_v57 = vpop.f32.mrf.mxu2  ;;  %v2476_v52 = vsel %vm5632_vm0, %v5575_v4, %v2472_v63  ;;  %v2411_v6 = vsub.f32 1.5, %v2410_v61  ;;  %v2488_v13 = vmul.f32 %v3309_v53, %v5603_v56  ;;  %v2664_v21 = vmax.f32 %v2632_v33, 0.0 }
 0x34d   : > { %3310 = vrsqrt.f32 %v5636_v14  ;;  %v2122_v10 = vsub.f32 %v2058_v36, %v2090_v25  ;;  %v2843_v32 = vadd.f32 %v5317_v17, %v2842_v57  ;;  %v2567_v20 = vmul.f32 %v2535_v19, %v2476_v52 }
 0x34e   : > { %v2412_v4 = vmul.f32 %v3307_v9, %v2411_v6  ;;  %v2489_v0 = vmul.f32 %v3309_v53, %v2488_v13  ;;  %3098 = vmatmul.msk.f32.gmra.mxu2 %vm638_vm1, %v2664_v21  ;;  %3104 = vmatmul.msk.f32.gmra.mxu3 %vm638_vm1, %v2670_v18  ;;  %vm2494_vm6 = vweird.f32 %v3309_v53  ;;  %v2640_v2 = vadd.f32 %v5372_v54, %v2604_v59 }
 0x34f   : > { %v2154_v34 = vmax.f32 %v2122_v10, 0.0  ;;  %2910 = vst [vmem:[%s5322_s25 + $0x70] sm:$0xff] %v2843_v32  ;;  %v2603_v40 = vmul.f32 %v5364_v43, %v2567_v20  ;;  %vm2495_vm8 = vmor %vm2493_vm7, %vm2494_vm6  ;;  %vm2423_vm10 = vweird.f32 %v5636_v14  ;;  %v2538_v57 = vsub.f32 %v5285_v22, %v5620_v60 }
 0x350   : > { %v2490_v41 = vmul.f32 0.5, %v2489_v0  ;;  %v2416_v1 = vsel %vm2415_vm5, %v3307_v9, %v2412_v4  ;;  %v2672_v36 = vmax.f32 %v2640_v2, 0.0 }
 0x351   : > { %v2186_v58 = vadd.f32 1e-05, %v2154_v34  ;;  %v2561_v44 = vmul.f32 %v2529_v24, %v2416_v1  ;;  %v2639_v48 = vadd.f32 %v5372_v54, %v2603_v40 }
 0x352   : > { %v2491_v50 = vsub.f32 1.5, %v2490_v41 }
 0x353   : > { %v3311_v7 = vpop.eup %3310  ;;  %3312 = vrsqrt.f32 %v2186_v58  ;;  %v2671_v19 = vmax.f32 %v2639_v48, 0.0  ;;  %v2597_v5 = vmul.f32 %v5364_v43, %v2561_v44  ;;  %vm2503_vm13 = vweird.f32 %v2186_v58 }
 0x354   : > { %v2418_v27 = vmul.f32 %v3311_v7, %v5636_v14  ;;  %v2845_v12 = vpop.f32.mrf.mxu2  ;;  %v2492_v62 = vmul.f32 %v3309_v53, %v2491_v50  ;;  %vm2424_vm9 = vweird.f32 %v3311_v7 }
 0x355   : > { %v2846_v55 = vadd.f32 %v5317_v17, %v2845_v12  ;;  %v2633_v45 = vadd.f32 %v5372_v54, %v2597_v5  ;;  %vm2425_vm11 = vmor %vm2423_vm10, %vm2424_vm9 }
 0x356   : > { %v2419_v9 = vmul.f32 %v3311_v7, %v2418_v27  ;;  %v2496_v47 = vsel %vm2495_vm8, %v3309_v53, %v2492_v62  ;;  %3105 = vmatmul.msk.f32.gmra.mxu3 %vm638_vm1, %v2671_v19 }
 0x357   : > { %2911 = vst [vmem:[%s5322_s25 + $0x78] sm:$0xff] %v2846_v55  ;;  %v2665_v31 = vmax.f32 %v2633_v45, 0.0  ;;  %v2569_v26 = vmul.f32 %v2537_v30, %v2496_v47 }
 0x358   : > { %v2420_v51 = vmul.f32 0.5, %v2419_v9 }
 0x359   : > { %v3313_v42 = vpop.eup %3312  ;;  %3099 = vmatmul.msk.f32.gmra.mxu2 %vm638_vm1, %v2665_v31  ;;  %v2605_v33 = vmul.f32 %v5364_v43, %v2569_v26 }
 0x35a   : > { %v2421_v35 = vsub.f32 1.5, %v2420_v51  ;;  %v2498_v56 = vmul.f32 %v3313_v42, %v2186_v58  ;;  %vm2504_vm12 = vweird.f32 %v3313_v42 }
 0x35b   : > { %v2641_v37 = vadd.f32 %v5372_v54, %v2605_v33  ;;  %vm2505_vm14 = vmor %vm2503_vm13, %vm2504_vm12 }
 0x35c   : > { %v2422_v63 = vmul.f32 %v3311_v7, %v2421_v35  ;;  %v2848_v38 = vpop.f32.mrf.mxu2  ;;  %v2499_v8 = vmul.f32 %v3313_v42, %v2498_v56 }
 0x35d   : > { %v2849_v46 = vadd.f32 %v5317_v17, %v2848_v38  ;;  %v2673_v13 = vmax.f32 %v2641_v37, 0.0 }
 0x35e   : > { %v2426_v29 = vsel %vm2425_vm11, %v3311_v7, %v2422_v63  ;;  %v2500_v61 = vmul.f32 0.5, %v2499_v8  ;;  %3106 = vmatmul.msk.f32.gmra.mxu3 %vm638_vm1, %v2672_v36 }
 0x35f   : > { %2912 = vst [vmem:[%s5322_s25 + $0x80] sm:$0xff] %v2849_v46  ;;  %v2562_v53 = vmul.f32 %v2530_v28, %v2426_v29 }
 0x360   : > { %v2501_v23 = vsub.f32 1.5, %v2500_v61 }
 0x361   : > { %v2598_v14 = vmul.f32 %v5364_v43, %v2562_v53 }
 0x362   : > { %v2502_v25 = vmul.f32 %v3313_v42, %v2501_v23 }
 0x363   : > { %v2634_v3 = vadd.f32 %v5372_v54, %v2598_v14 }
 0x364   : > { %v2506_v52 = vsel %vm2505_vm14, %v3313_v42, %v2502_v25 }
 0x365   : > { %v2666_v16 = vmax.f32 %v2634_v3, 0.0  ;;  %v2570_v6 = vmul.f32 %v2538_v57, %v2506_v52 }
 0x366   : > { %3107 = vmatmul.msk.f32.gmra.mxu3 %vm638_vm1, %v2673_v13 }
 0x367   : > { %3100 = vmatmul.msk.f32.gmra.mxu2 %vm638_vm1, %v2666_v16  ;;  %v2606_v10 = vmul.f32 %v5364_v43, %v2570_v6 }
 0x369   : > { %v2642_v32 = vadd.f32 %v5372_v54, %v2606_v10 }
 0x36b   : > { %v2674_v21 = vmax.f32 %v2642_v32, 0.0 }
 0x36e   : > { %3108 = vmatmul.msk.f32.gmra.mxu3 %vm638_vm1, %v2674_v21 }
 0x39b   : > { %v2851_v22 = vpop.f32.mrf.mxu2 }
 0x39c   : > { %v2852_v60 = vadd.f32 %v5317_v17, %v2851_v22 }
 0x39e   : > { %2913 = vst [vmem:[%s5322_s25 + $0x88] sm:$0xff] %v2852_v60 }
 0x3a3   : > { %v2854_v11 = vpop.f32.mrf.mxu2 }
 0x3a4   : > { %v2855_v4 = vadd.f32 %v5317_v17, %v2854_v11 }
 0x3a6   : > { %2914 = vst [vmem:[%s5322_s25 + $0x90] sm:$0xff] %v2855_v4 }
 0x3ad   : > { %v2857_v43 = vpop.f32.mrf.mxu2 }
 0x3ae   : > { %v2858_v0 = vadd.f32 %v5317_v17, %v2857_v43 }
 0x3b0   : > { %2915 = vst [vmem:[%s5322_s25 + $0x98] sm:$0xff] %v2858_v0 }
 0x3b2   : > { %v2872_v18 = vpop.f32.mrf.mxu3 }
 0x3b3   : > { %v2873_v54 = vadd.f32 %v5317_v17, %v2872_v18 }
 0x3b5   : > { %2920 = vst [vmem:[%s5322_s25 + $0xc0] sm:$0xff] %v2873_v54 }
 0x3c1   : > { %v2875_v20 = vpop.f32.mrf.mxu3 }
 0x3c2   : > { %v2876_v24 = vadd.f32 %v5317_v17, %v2875_v20 }
 0x3c3   : > { %v2860_v34 = vpop.f32.mrf.mxu2 }
 0x3c4   : > { %2921 = vst [vmem:[%s5322_s25 + $0xc8] sm:$0xff] %v2876_v24  ;;  %v2861_v39 = vadd.f32 %v5317_v17, %v2860_v34 }
 0x3c6   : > { %2916 = vst [vmem:[%s5322_s25 + $0xa0] sm:$0xff] %v2861_v39 }
 0x3c9   : > { %v2878_v49 = vpop.f32.mrf.mxu3 }
 0x3ca   : > { %v2879_v41 = vadd.f32 %v5317_v17, %v2878_v49 }
 0x3cc   : > { %2922 = vst [vmem:[%s5322_s25 + $0xd0] sm:$0xff] %v2879_v41 }
 0x3d1   : > { %v2863_v40 = vpop.f32.mrf.mxu2  ;;  %v2881_v58 = vpop.f32.mrf.mxu3 }
 0x3d2   : > { %v2864_v1 = vadd.f32 %v5317_v17, %v2863_v40  ;;  %v2882_v44 = vadd.f32 %v5317_v17, %v2881_v58 }
 0x3d4   : > { %2917 = vst [vmem:[%s5322_s25 + $0xa8] sm:$0xff] %v2864_v1 }
 0x3d5   : > { %2923 = vst [vmem:[%s5322_s25 + $0xd8] sm:$0xff] %v2882_v44 }
 0x3d9   : > { %v2884_v7 = vpop.f32.mrf.mxu3 }
 0x3da   : > { %v2885_v50 = vadd.f32 %v5317_v17, %v2884_v7 }
 0x3dc   : > { %v2866_v48 = vpop.f32.mrf.mxu2  ;;  %2924 = vst [vmem:[%s5322_s25 + $0xe0] sm:$0xff] %v2885_v50 }
 0x3dd   : > { %v2867_v15 = vadd.f32 %v5317_v17, %v2866_v48 }
 0x3df   : > { %2918 = vst [vmem:[%s5322_s25 + $0xb0] sm:$0xff] %v2867_v15 }
 0x3e1   : > { %v2887_v27 = vpop.f32.mrf.mxu3 }
 0x3e2   : > { %v2888_v12 = vadd.f32 %v5317_v17, %v2887_v27 }
 0x3e4   : > { %2925 = vst [vmem:[%s5322_s25 + $0xe8] sm:$0xff] %v2888_v12 }
 0x3e9   : > { %v2890_v19 = vpop.f32.mrf.mxu3 }
 0x3ea   : > { %v2869_v62 = vpop.f32.mrf.mxu2  ;;  %v2891_v5 = vadd.f32 %v5317_v17, %v2890_v19 }
 0x3eb   : > { %v2870_v55 = vadd.f32 %v5317_v17, %v2869_v62 }
 0x3ec   : > { %2926 = vst [vmem:[%s5322_s25 + $0xf0] sm:$0xff] %v2891_v5 }
 0x3ed   : > { %2919 = vst [vmem:[%s5322_s25 + $0xb8] sm:$0xff] %v2870_v55 }
 0x3f1   : > { %v2893_v9 = vpop.f32.mrf.mxu3 }
 0x3f2   : > { %v2894_v45 = vadd.f32 %v5317_v17, %v2893_v9 }
 0x3f4   : > { %2927 = vst [vmem:[%s5322_s25 + $0xf8] sm:$0xff] %v2894_v45 }
 0x3f5   : > { %3347 = shalt.err (!%p3344_p3)
}
 0x3f6   : > { %s3385_s15 = smov 128   ;;  %s3386_s25 = smov 8  }
 0x3f7   : > { %3135 = dma.vmem_to_hbm [thread:$0]  (%p3485_p5), %s2942_s29, 4096, %s2944_s30, %s2929_s21, %s3385_s15, %s3385_s15, %s3386_s25  }
 0x3f8 PF: > { %p3141_p4 = scmp.ge.s32.totalorder %s3382_s20, 2  ;;  %s2958_s16 = sand.u32 1, %s3370_s17  }
 0x3f9   : > { %s2959_s0 = scalar_lea.sflag [#allocation3], %s2958_s16 }
 0x3fa   : > { %p3138_p7 = pnand %p3141_p4, %p3489_p6 }
 0x3fc   : > { %p3139_p8 = pneg %p3138_p7 }
 0x3fe   : > { %3365 = dma.done.wait (%p3139_p8), %s2959_s0, 4096  }
 0x3ff   : > { %3367 = vsyncadd (%p3139_p8), %s2959_s0, 4294963200  ;;  %p21_p9 = scmp.ge.s32.totalorder %s3472_s23, 4   ;;  %s5840_s17 = smov %s3374_s18 }
 0x400   : > { %s5841_s18 = smov %s3378_s19  ;;  %s5842_s19 = smov %s3483_s26 }
 0x401   : > { %s5843_s20 = smov %s3472_s23  ;;  %23 = sbr.rel (!%p21_p9) target bundleno = 5 (0x5), region = 99 }
 0x406   :  { %2965 = vsyncpa [#allocation3], 1 }
 0x407   :  { %2967 = vsyncpa [#allocation3 + $0x1], 1 }

</bundles_post_ra>
